<compile_context>
chip_gen: v7x
topology: tpu7x:2x2x1
jax: 0.10.0
libtpu: 0.0.40
codegen_flags: <defaults>
</compile_context>

<pallas_src>
import numpy as np
import jax
import jax.numpy as jnp
from jax import lax
from jax.experimental import pallas as pl
from jax.experimental.pallas import tpu as pltpu


def _make_fused_kernel(C, H, W, ksize, in_base, scratch_base, scratch_len,
                       tap_is_full):
    """Fused conv->PReLU->conv->PReLU kernel body (one image per grid step)."""
    P = H * W
    pad = ksize // 2
    taps = [(dh, dw) for dh in range(ksize) for dw in range(ksize)]
    pad_r = scratch_len - (scratch_base + P)          # right halo length (== ofs)

    def kernel(x_ref, m_ref, w_ref, b_ref, a_ref, o_ref, h_ref):
        # x_ref: (C, P + 2*in_base)  flat zero-padded input (lane-dense)
        # m_ref: (KK, P)             per-tap validity masks (0/1, f32)
        # w_ref: (2*C, KK*C)         packed weights; row = layer*C + co,
        #                            col = tap*C + ci
        # b_ref: (2*C, 1)            biases as columns (layer*C + co)
        # a_ref: (2,)                PReLU slopes (SMEM scalars)
        # o_ref: (C, P)              lane-dense output
        # h_ref: (C, scratch_len)    VMEM scratch for padded layer-1 output

        def conv_prelu(src_ref, base, layer):
            # Start the accumulator at the bias -> no epilogue bias add.
            bcol = b_ref[pl.ds(layer * C, C), :]                  # (C, 1)
            acc = jnp.broadcast_to(bcol, (C, P)).astype(jnp.float32)
            for t, (dh, dw) in enumerate(taps):
                start = base + (dh - pad) * W + (dw - pad)
                xw = src_ref[:, pl.ds(start, P)]                  # (C, P) window
                if not tap_is_full[t]:                            # trace-time skip
                    xw = xw * m_ref[pl.ds(t, 1), :]               # mask row-wrap/OOB
                for ci in range(C):
                    wcol = w_ref[pl.ds(layer * C, C),
                                 pl.ds(t * C + ci, 1)]            # (C, 1)
                    acc = acc + wcol * xw[ci:ci + 1, :]           # rank-1 VPU FMA
                alpha = a_ref[layer]                              # SMEM scalar
            return jnp.where(acc >= 0, acc, alpha * acc)          # PReLU

        # ---- layer 1: shifted windows straight from the padded input ----
        h1 = conv_prelu(x_ref, in_base, 0)

        # ---- re-pad layer-1 activations in VMEM (zero only the halos) ----
        if scratch_base > 0:
            h_ref[:, pl.ds(0, scratch_base)] = jnp.zeros(
                (C, scratch_base), jnp.float32)
        if pad_r > 0:
            h_ref[:, pl.ds(scratch_base + P, pad_r)] = jnp.zeros(
                (C, pad_r), jnp.float32)
        h_ref[:, pl.ds(scratch_base, P)] = h1                     # lane-aligned

        # ---- layer 2: same conv+PReLU reading from the VMEM scratch ----
        o_ref[...] = conv_prelu(h_ref, scratch_base, 1).astype(o_ref.dtype)

    return kernel


def residual_block_forward(x_nchw, params, kernel_size):
    """Forward pass matching ResidualBlock.forward (NCHW in / NCHW out)."""
    N, C, H, W = x_nchw.shape
    P = H * W
    pad = kernel_size // 2
    KK = kernel_size * kernel_size
    ofs = pad * W + pad                        # max |flat shift| of a tap
    in_len = P + 2 * ofs
    scratch_base = ((ofs + 127) // 128) * 128  # lane-aligned interior offset
    scratch_len = scratch_base + P + ofs

    # ---- pack parameters (XLA-side glue) ----
    def pack_w(w_oihw):                        # (Cout,Cin,kh,kw) -> (Cout, KK*Cin)
        return jnp.transpose(w_oihw, (0, 2, 3, 1)).reshape(C, KK * C)

    w_packed = jnp.concatenate([pack_w(params["w1"]), pack_w(params["w2"])],
                               axis=0)                                    # (2C, KK*C)
    b_packed = jnp.stack([params["b1"], params["b2"]]).reshape(2 * C, 1)  # (2C, 1)
    a_packed = jnp.concatenate([params["a1"], params["a2"]]).astype(jnp.float32)

    # ---- per-tap validity masks over flattened spatial positions (constants) ----
    hh, ww = np.meshgrid(np.arange(H), np.arange(W), indexing="ij")
    mask_list, tap_is_full = [], []
    for dh in range(kernel_size):
        for dw in range(kernel_size):
            oh, ow = dh - pad, dw - pad
            valid = ((hh + oh >= 0) & (hh + oh < H) &
                     (ww + ow >= 0) & (ww + ow < W))
            mask_list.append(valid.reshape(-1))
            tap_is_full.append(bool(valid.all()))          # center tap etc.
    masks = jnp.asarray(np.stack(mask_list).astype(np.float32))           # (KK, P)

    # ---- lane-dense flat activations, zero-padded along the flattened axis ----
    x_flat = x_nchw.reshape(N, C, P).astype(jnp.float32)
    x_fp = jnp.pad(x_flat, ((0, 0), (0, 0), (ofs, ofs)))                  # (N,C,in_len)

    kernel = _make_fused_kernel(C, H, W, kernel_size, ofs, scratch_base,
                                scratch_len, tuple(tap_is_full))

    # Advisory cost hint for XLA's scheduler around the custom call.
    flops = 2 * N * 2 * (C * C * KK * P)                     # 2 conv layers of MACs
    bytes_accessed = 4 * (N * C * in_len + N * C * P + KK * P
                          + 2 * C * KK * C + 2 * C + 2)

    out_flat = pl.pallas_call(
        kernel,
        out_shape=jax.ShapeDtypeStruct((N, C, P), x_nchw.dtype),
        grid=(N,),
        in_specs=[
            pl.BlockSpec((None, C, in_len), lambda n: (n, 0, 0)),
            pl.BlockSpec((KK, P), lambda n: (0, 0)),
            pl.BlockSpec((2 * C, KK * C), lambda n: (0, 0)),
            pl.BlockSpec((2 * C, 1), lambda n: (0, 0)),
            pl.BlockSpec(memory_space=pltpu.MemorySpace.SMEM),
        ],
        out_specs=pl.BlockSpec((None, C, P), lambda n: (n, 0, 0)),
        scratch_shapes=[pltpu.VMEM((C, scratch_len), jnp.float32)],
        compiler_params=pltpu.CompilerParams(
            dimension_semantics=("parallel",)),
        cost_estimate=pl.CostEstimate(flops=flops, transcendentals=0,
                                      bytes_accessed=bytes_accessed),
    )(x_fp, masks, w_packed, b_packed, a_packed)

    return out_flat.reshape(N, C, H, W).astype(x_nchw.dtype)


def init_params(key, channel_size, kernel_size):
    """Deterministic synthetic parameters (shapes per the PyTorch module)."""
    k1, k2, k3, k4 = jax.random.split(key, 4)
    fan_in = channel_size * kernel_size * kernel_size
    bound = 1.0 / float(np.sqrt(fan_in))
    shape_w = (channel_size, channel_size, kernel_size, kernel_size)  # OIHW
    return {
        "w1": jax.random.uniform(k1, shape_w, jnp.float32, -bound, bound),
        "b1": jax.random.uniform(k2, (channel_size,), jnp.float32, -bound, bound),
        "a1": jnp.array([0.25], jnp.float32),   # nn.PReLU() default init
        "w2": jax.random.uniform(k3, shape_w, jnp.float32, -bound, bound),
        "b2": jax.random.uniform(k4, (channel_size,), jnp.float32, -bound, bound),
        "a2": jnp.array([0.25], jnp.float32),
    }


def reference_forward(x_nchw, params, kernel_size):
    """Pure-JAX reference (lax.conv) for correctness checking."""
    pad = kernel_size // 2
    dn = ("NCHW", "OIHW", "NCHW")

    def step(x, w, b, a):
        y = lax.conv_general_dilated(x, w, (1, 1), [(pad, pad), (pad, pad)],
                                     dimension_numbers=dn)
        y = y + b.reshape(1, -1, 1, 1)
        return jnp.where(y >= 0, y, a[0] * y)

    x = step(x_nchw, params["w1"], params["b1"], params["a1"])
    x = step(x, params["w2"], params["b2"], params["a2"])
    return x


if __name__ == "__main__":
    channel_size, kernel_size = 4, 3
    N, H, W = 2, 16, 16

    key = jax.random.PRNGKey(0)
    kx, kp = jax.random.split(key)
    x = jax.random.normal(kx, (N, channel_size, H, W), jnp.float32)  # NCHW
    params = init_params(kp, channel_size, kernel_size)

    out = residual_block_forward(x, params, kernel_size)
    out = jax.block_until_ready(out)

    ref = reference_forward(x, params, kernel_size)
    assert out.shape == (N, channel_size, H, W)
    assert jnp.allclose(out, ref, atol=1e-4, rtol=1e-4), \
        float(jnp.max(jnp.abs(out - ref)))

    print("KERNEL_OK")
</pallas_src>

<mosaic_0001>
module attributes {stable_mosaic.version = 11 : i64} {
  func.func @kernel(%arg0: i32, %arg1: memref<1x4x290xf32, #tpu.memory_space<vmem>>, %arg2: memref<9x256xf32, #tpu.memory_space<vmem>>, %arg3: memref<8x36xf32, #tpu.memory_space<vmem>>, %arg4: memref<8x1xf32, #tpu.memory_space<vmem>>, %arg5: memref<2xf32, #tpu.memory_space<smem>>, %arg6: memref<1x4x256xf32, #tpu.memory_space<vmem>>, %arg7: memref<4x401xf32, #tpu.memory_space<vmem>>) attributes {dimension_semantics = [#tpu.dimension_semantics<parallel>], iteration_bounds = array<i64: 2>, scalar_prefetch = 0 : i64, scratch_operands = 1 : i64, tpu.core_type = #tpu.core_type<tc>, window_params = [{transform_indices = @transform_0, window_bounds = array<i64: 1, 4, 290>}, {pipeline_mode = #tpu.pipeline_mode<synchronous>, transform_indices = @transform_1, window_bounds = array<i64: 9, 256>}, {pipeline_mode = #tpu.pipeline_mode<synchronous>, transform_indices = @transform_2, window_bounds = array<i64: 8, 36>}, {pipeline_mode = #tpu.pipeline_mode<synchronous>, transform_indices = @transform_3, window_bounds = array<i64: 8, 1>}, {transform_indices = @transform_4, window_bounds = array<i64: 2>}, {transform_indices = @transform_5, window_bounds = array<i64: 1, 4, 256>}]} {
    %c0 = arith.constant 0 : index
    %c0_0 = arith.constant 0 : index
    %0 = vector.load %arg4[%c0, %c0_0] : memref<8x1xf32, #tpu.memory_space<vmem>>, vector<4x1xf32>
    %1 = vector.shape_cast %0 : vector<4x1xf32> to vector<4x1xf32>
    %2 = vector.broadcast %1 : vector<4x1xf32> to vector<4x256xf32>
    %c0_1 = arith.constant 0 : index
    %c0_2 = arith.constant 0 : index
    %c0_3 = arith.constant 0 : index
    %3 = vector.load %arg1[%c0_1, %c0_2, %c0_3] : memref<1x4x290xf32, #tpu.memory_space<vmem>>, vector<1x4x256xf32>
    %4 = vector.shape_cast %3 : vector<1x4x256xf32> to vector<4x256xf32>
    %c0_4 = arith.constant 0 : index
    %c0_5 = arith.constant 0 : index
    %5 = vector.load %arg2[%c0_4, %c0_5] : memref<9x256xf32, #tpu.memory_space<vmem>>, vector<1x256xf32>
    %6 = vector.broadcast %5 : vector<1x256xf32> to vector<4x256xf32>
    %7 = arith.mulf %4, %6 : vector<4x256xf32>
    %c0_6 = arith.constant 0 : index
    %c0_7 = arith.constant 0 : index
    %8 = vector.load %arg3[%c0_6, %c0_7] : memref<8x36xf32, #tpu.memory_space<vmem>>, vector<4x1xf32>
    %9 = vector.extract_strided_slice %7 {offsets = [0, 0], sizes = [1, 256], strides = [1, 1]} : vector<4x256xf32> to vector<1x256xf32>
    %10 = vector.broadcast %8 : vector<4x1xf32> to vector<4x256xf32>
    %11 = vector.broadcast %9 : vector<1x256xf32> to vector<4x256xf32>
    %12 = arith.mulf %10, %11 : vector<4x256xf32>
    %13 = arith.addf %2, %12 : vector<4x256xf32>
    %c0_8 = arith.constant 0 : index
    %c1 = arith.constant 1 : index
    %14 = vector.load %arg3[%c0_8, %c1] : memref<8x36xf32, #tpu.memory_space<vmem>>, vector<4x1xf32>
    %15 = vector.extract_strided_slice %7 {offsets = [1, 0], sizes = [1, 256], strides = [1, 1]} : vector<4x256xf32> to vector<1x256xf32>
    %16 = vector.broadcast %14 : vector<4x1xf32> to vector<4x256xf32>
    %17 = vector.broadcast %15 : vector<1x256xf32> to vector<4x256xf32>
    %18 = arith.mulf %16, %17 : vector<4x256xf32>
    %19 = arith.addf %13, %18 : vector<4x256xf32>
    %c0_9 = arith.constant 0 : index
    %c2 = arith.constant 2 : index
    %20 = vector.load %arg3[%c0_9, %c2] : memref<8x36xf32, #tpu.memory_space<vmem>>, vector<4x1xf32>
    %21 = vector.extract_strided_slice %7 {offsets = [2, 0], sizes = [1, 256], strides = [1, 1]} : vector<4x256xf32> to vector<1x256xf32>
    %22 = vector.broadcast %20 : vector<4x1xf32> to vector<4x256xf32>
    %23 = vector.broadcast %21 : vector<1x256xf32> to vector<4x256xf32>
    %24 = arith.mulf %22, %23 : vector<4x256xf32>
    %25 = arith.addf %19, %24 : vector<4x256xf32>
    %c0_10 = arith.constant 0 : index
    %c3 = arith.constant 3 : index
    %26 = vector.load %arg3[%c0_10, %c3] : memref<8x36xf32, #tpu.memory_space<vmem>>, vector<4x1xf32>
    %27 = vector.extract_strided_slice %7 {offsets = [3, 0], sizes = [1, 256], strides = [1, 1]} : vector<4x256xf32> to vector<1x256xf32>
    %28 = vector.broadcast %26 : vector<4x1xf32> to vector<4x256xf32>
    %29 = vector.broadcast %27 : vector<1x256xf32> to vector<4x256xf32>
    %30 = arith.mulf %28, %29 : vector<4x256xf32>
    %31 = arith.addf %25, %30 : vector<4x256xf32>
    %c0_11 = arith.constant 0 : index
    %c0_12 = arith.constant 0 : index
    %c1_13 = arith.constant 1 : index
    %32 = vector.load %arg1[%c0_11, %c0_12, %c1_13] : memref<1x4x290xf32, #tpu.memory_space<vmem>>, vector<1x4x256xf32>
    %33 = vector.shape_cast %32 : vector<1x4x256xf32> to vector<4x256xf32>
    %c1_14 = arith.constant 1 : index
    %c0_15 = arith.constant 0 : index
    %34 = vector.load %arg2[%c1_14, %c0_15] : memref<9x256xf32, #tpu.memory_space<vmem>>, vector<1x256xf32>
    %35 = vector.broadcast %34 : vector<1x256xf32> to vector<4x256xf32>
    %36 = arith.mulf %33, %35 : vector<4x256xf32>
    %c0_16 = arith.constant 0 : index
    %c4 = arith.constant 4 : index
    %37 = vector.load %arg3[%c0_16, %c4] : memref<8x36xf32, #tpu.memory_space<vmem>>, vector<4x1xf32>
    %38 = vector.extract_strided_slice %36 {offsets = [0, 0], sizes = [1, 256], strides = [1, 1]} : vector<4x256xf32> to vector<1x256xf32>
    %39 = vector.broadcast %37 : vector<4x1xf32> to vector<4x256xf32>
    %40 = vector.broadcast %38 : vector<1x256xf32> to vector<4x256xf32>
    %41 = arith.mulf %39, %40 : vector<4x256xf32>
    %42 = arith.addf %31, %41 : vector<4x256xf32>
    %c0_17 = arith.constant 0 : index
    %c5 = arith.constant 5 : index
    %43 = vector.load %arg3[%c0_17, %c5] : memref<8x36xf32, #tpu.memory_space<vmem>>, vector<4x1xf32>
    %44 = vector.extract_strided_slice %36 {offsets = [1, 0], sizes = [1, 256], strides = [1, 1]} : vector<4x256xf32> to vector<1x256xf32>
    %45 = vector.broadcast %43 : vector<4x1xf32> to vector<4x256xf32>
    %46 = vector.broadcast %44 : vector<1x256xf32> to vector<4x256xf32>
    %47 = arith.mulf %45, %46 : vector<4x256xf32>
    %48 = arith.addf %42, %47 : vector<4x256xf32>
    %c0_18 = arith.constant 0 : index
    %c6 = arith.constant 6 : index
    %49 = vector.load %arg3[%c0_18, %c6] : memref<8x36xf32, #tpu.memory_space<vmem>>, vector<4x1xf32>
    %50 = vector.extract_strided_slice %36 {offsets = [2, 0], sizes = [1, 256], strides = [1, 1]} : vector<4x256xf32> to vector<1x256xf32>
    %51 = vector.broadcast %49 : vector<4x1xf32> to vector<4x256xf32>
    %52 = vector.broadcast %50 : vector<1x256xf32> to vector<4x256xf32>
    %53 = arith.mulf %51, %52 : vector<4x256xf32>
    %54 = arith.addf %48, %53 : vector<4x256xf32>
    %c0_19 = arith.constant 0 : index
    %c7 = arith.constant 7 : index
    %55 = vector.load %arg3[%c0_19, %c7] : memref<8x36xf32, #tpu.memory_space<vmem>>, vector<4x1xf32>
    %56 = vector.extract_strided_slice %36 {offsets = [3, 0], sizes = [1, 256], strides = [1, 1]} : vector<4x256xf32> to vector<1x256xf32>
    %57 = vector.broadcast %55 : vector<4x1xf32> to vector<4x256xf32>
    %58 = vector.broadcast %56 : vector<1x256xf32> to vector<4x256xf32>
    %59 = arith.mulf %57, %58 : vector<4x256xf32>
    %60 = arith.addf %54, %59 : vector<4x256xf32>
    %c0_20 = arith.constant 0 : index
    %c0_21 = arith.constant 0 : index
    %c2_22 = arith.constant 2 : index
    %61 = vector.load %arg1[%c0_20, %c0_21, %c2_22] : memref<1x4x290xf32, #tpu.memory_space<vmem>>, vector<1x4x256xf32>
    %62 = vector.shape_cast %61 : vector<1x4x256xf32> to vector<4x256xf32>
    %c2_23 = arith.constant 2 : index
    %c0_24 = arith.constant 0 : index
    %63 = vector.load %arg2[%c2_23, %c0_24] : memref<9x256xf32, #tpu.memory_space<vmem>>, vector<1x256xf32>
    %64 = vector.broadcast %63 : vector<1x256xf32> to vector<4x256xf32>
    %65 = arith.mulf %62, %64 : vector<4x256xf32>
    %c0_25 = arith.constant 0 : index
    %c8 = arith.constant 8 : index
    %66 = vector.load %arg3[%c0_25, %c8] : memref<8x36xf32, #tpu.memory_space<vmem>>, vector<4x1xf32>
    %67 = vector.extract_strided_slice %65 {offsets = [0, 0], sizes = [1, 256], strides = [1, 1]} : vector<4x256xf32> to vector<1x256xf32>
    %68 = vector.broadcast %66 : vector<4x1xf32> to vector<4x256xf32>
    %69 = vector.broadcast %67 : vector<1x256xf32> to vector<4x256xf32>
    %70 = arith.mulf %68, %69 : vector<4x256xf32>
    %71 = arith.addf %60, %70 : vector<4x256xf32>
    %c0_26 = arith.constant 0 : index
    %c9 = arith.constant 9 : index
    %72 = vector.load %arg3[%c0_26, %c9] : memref<8x36xf32, #tpu.memory_space<vmem>>, vector<4x1xf32>
    %73 = vector.extract_strided_slice %65 {offsets = [1, 0], sizes = [1, 256], strides = [1, 1]} : vector<4x256xf32> to vector<1x256xf32>
    %74 = vector.broadcast %72 : vector<4x1xf32> to vector<4x256xf32>
    %75 = vector.broadcast %73 : vector<1x256xf32> to vector<4x256xf32>
    %76 = arith.mulf %74, %75 : vector<4x256xf32>
    %77 = arith.addf %71, %76 : vector<4x256xf32>
    %c0_27 = arith.constant 0 : index
    %c10 = arith.constant 10 : index
    %78 = vector.load %arg3[%c0_27, %c10] : memref<8x36xf32, #tpu.memory_space<vmem>>, vector<4x1xf32>
    %79 = vector.extract_strided_slice %65 {offsets = [2, 0], sizes = [1, 256], strides = [1, 1]} : vector<4x256xf32> to vector<1x256xf32>
    %80 = vector.broadcast %78 : vector<4x1xf32> to vector<4x256xf32>
    %81 = vector.broadcast %79 : vector<1x256xf32> to vector<4x256xf32>
    %82 = arith.mulf %80, %81 : vector<4x256xf32>
    %83 = arith.addf %77, %82 : vector<4x256xf32>
    %c0_28 = arith.constant 0 : index
    %c11 = arith.constant 11 : index
    %84 = vector.load %arg3[%c0_28, %c11] : memref<8x36xf32, #tpu.memory_space<vmem>>, vector<4x1xf32>
    %85 = vector.extract_strided_slice %65 {offsets = [3, 0], sizes = [1, 256], strides = [1, 1]} : vector<4x256xf32> to vector<1x256xf32>
    %86 = vector.broadcast %84 : vector<4x1xf32> to vector<4x256xf32>
    %87 = vector.broadcast %85 : vector<1x256xf32> to vector<4x256xf32>
    %88 = arith.mulf %86, %87 : vector<4x256xf32>
    %89 = arith.addf %83, %88 : vector<4x256xf32>
    %c0_29 = arith.constant 0 : index
    %c0_30 = arith.constant 0 : index
    %c16 = arith.constant 16 : index
    %90 = vector.load %arg1[%c0_29, %c0_30, %c16] : memref<1x4x290xf32, #tpu.memory_space<vmem>>, vector<1x4x256xf32>
    %91 = vector.shape_cast %90 : vector<1x4x256xf32> to vector<4x256xf32>
    %c3_31 = arith.constant 3 : index
    %c0_32 = arith.constant 0 : index
    %92 = vector.load %arg2[%c3_31, %c0_32] : memref<9x256xf32, #tpu.memory_space<vmem>>, vector<1x256xf32>
    %93 = vector.broadcast %92 : vector<1x256xf32> to vector<4x256xf32>
    %94 = arith.mulf %91, %93 : vector<4x256xf32>
    %c0_33 = arith.constant 0 : index
    %c12 = arith.constant 12 : index
    %95 = vector.load %arg3[%c0_33, %c12] : memref<8x36xf32, #tpu.memory_space<vmem>>, vector<4x1xf32>
    %96 = vector.extract_strided_slice %94 {offsets = [0, 0], sizes = [1, 256], strides = [1, 1]} : vector<4x256xf32> to vector<1x256xf32>
    %97 = vector.broadcast %95 : vector<4x1xf32> to vector<4x256xf32>
    %98 = vector.broadcast %96 : vector<1x256xf32> to vector<4x256xf32>
    %99 = arith.mulf %97, %98 : vector<4x256xf32>
    %100 = arith.addf %89, %99 : vector<4x256xf32>
    %c0_34 = arith.constant 0 : index
    %c13 = arith.constant 13 : index
    %101 = vector.load %arg3[%c0_34, %c13] : memref<8x36xf32, #tpu.memory_space<vmem>>, vector<4x1xf32>
    %102 = vector.extract_strided_slice %94 {offsets = [1, 0], sizes = [1, 256], strides = [1, 1]} : vector<4x256xf32> to vector<1x256xf32>
    %103 = vector.broadcast %101 : vector<4x1xf32> to vector<4x256xf32>
    %104 = vector.broadcast %102 : vector<1x256xf32> to vector<4x256xf32>
    %105 = arith.mulf %103, %104 : vector<4x256xf32>
    %106 = arith.addf %100, %105 : vector<4x256xf32>
    %c0_35 = arith.constant 0 : index
    %c14 = arith.constant 14 : index
    %107 = vector.load %arg3[%c0_35, %c14] : memref<8x36xf32, #tpu.memory_space<vmem>>, vector<4x1xf32>
    %108 = vector.extract_strided_slice %94 {offsets = [2, 0], sizes = [1, 256], strides = [1, 1]} : vector<4x256xf32> to vector<1x256xf32>
    %109 = vector.broadcast %107 : vector<4x1xf32> to vector<4x256xf32>
    %110 = vector.broadcast %108 : vector<1x256xf32> to vector<4x256xf32>
    %111 = arith.mulf %109, %110 : vector<4x256xf32>
    %112 = arith.addf %106, %111 : vector<4x256xf32>
    %c0_36 = arith.constant 0 : index
    %c15 = arith.constant 15 : index
    %113 = vector.load %arg3[%c0_36, %c15] : memref<8x36xf32, #tpu.memory_space<vmem>>, vector<4x1xf32>
    %114 = vector.extract_strided_slice %94 {offsets = [3, 0], sizes = [1, 256], strides = [1, 1]} : vector<4x256xf32> to vector<1x256xf32>
    %115 = vector.broadcast %113 : vector<4x1xf32> to vector<4x256xf32>
    %116 = vector.broadcast %114 : vector<1x256xf32> to vector<4x256xf32>
    %117 = arith.mulf %115, %116 : vector<4x256xf32>
    %118 = arith.addf %112, %117 : vector<4x256xf32>
    %c0_37 = arith.constant 0 : index
    %c0_38 = arith.constant 0 : index
    %c17 = arith.constant 17 : index
    %119 = vector.load %arg1[%c0_37, %c0_38, %c17] : memref<1x4x290xf32, #tpu.memory_space<vmem>>, vector<1x4x256xf32>
    %120 = vector.shape_cast %119 : vector<1x4x256xf32> to vector<4x256xf32>
    %c0_39 = arith.constant 0 : index
    %c16_40 = arith.constant 16 : index
    %121 = vector.load %arg3[%c0_39, %c16_40] : memref<8x36xf32, #tpu.memory_space<vmem>>, vector<4x1xf32>
    %122 = vector.extract_strided_slice %120 {offsets = [0, 0], sizes = [1, 256], strides = [1, 1]} : vector<4x256xf32> to vector<1x256xf32>
    %123 = vector.broadcast %121 : vector<4x1xf32> to vector<4x256xf32>
    %124 = vector.broadcast %122 : vector<1x256xf32> to vector<4x256xf32>
    %125 = arith.mulf %123, %124 : vector<4x256xf32>
    %126 = arith.addf %118, %125 : vector<4x256xf32>
    %c0_41 = arith.constant 0 : index
    %c17_42 = arith.constant 17 : index
    %127 = vector.load %arg3[%c0_41, %c17_42] : memref<8x36xf32, #tpu.memory_space<vmem>>, vector<4x1xf32>
    %128 = vector.extract_strided_slice %120 {offsets = [1, 0], sizes = [1, 256], strides = [1, 1]} : vector<4x256xf32> to vector<1x256xf32>
    %129 = vector.broadcast %127 : vector<4x1xf32> to vector<4x256xf32>
    %130 = vector.broadcast %128 : vector<1x256xf32> to vector<4x256xf32>
    %131 = arith.mulf %129, %130 : vector<4x256xf32>
    %132 = arith.addf %126, %131 : vector<4x256xf32>
    %c0_43 = arith.constant 0 : index
    %c18 = arith.constant 18 : index
    %133 = vector.load %arg3[%c0_43, %c18] : memref<8x36xf32, #tpu.memory_space<vmem>>, vector<4x1xf32>
    %134 = vector.extract_strided_slice %120 {offsets = [2, 0], sizes = [1, 256], strides = [1, 1]} : vector<4x256xf32> to vector<1x256xf32>
    %135 = vector.broadcast %133 : vector<4x1xf32> to vector<4x256xf32>
    %136 = vector.broadcast %134 : vector<1x256xf32> to vector<4x256xf32>
    %137 = arith.mulf %135, %136 : vector<4x256xf32>
    %138 = arith.addf %132, %137 : vector<4x256xf32>
    %c0_44 = arith.constant 0 : index
    %c19 = arith.constant 19 : index
    %139 = vector.load %arg3[%c0_44, %c19] : memref<8x36xf32, #tpu.memory_space<vmem>>, vector<4x1xf32>
    %140 = vector.extract_strided_slice %120 {offsets = [3, 0], sizes = [1, 256], strides = [1, 1]} : vector<4x256xf32> to vector<1x256xf32>
    %141 = vector.broadcast %139 : vector<4x1xf32> to vector<4x256xf32>
    %142 = vector.broadcast %140 : vector<1x256xf32> to vector<4x256xf32>
    %143 = arith.mulf %141, %142 : vector<4x256xf32>
    %144 = arith.addf %138, %143 : vector<4x256xf32>
    %c0_45 = arith.constant 0 : index
    %c0_46 = arith.constant 0 : index
    %c18_47 = arith.constant 18 : index
    %145 = vector.load %arg1[%c0_45, %c0_46, %c18_47] : memref<1x4x290xf32, #tpu.memory_space<vmem>>, vector<1x4x256xf32>
    %146 = vector.shape_cast %145 : vector<1x4x256xf32> to vector<4x256xf32>
    %c5_48 = arith.constant 5 : index
    %c0_49 = arith.constant 0 : index
    %147 = vector.load %arg2[%c5_48, %c0_49] : memref<9x256xf32, #tpu.memory_space<vmem>>, vector<1x256xf32>
    %148 = vector.broadcast %147 : vector<1x256xf32> to vector<4x256xf32>
    %149 = arith.mulf %146, %148 : vector<4x256xf32>
    %c0_50 = arith.constant 0 : index
    %c20 = arith.constant 20 : index
    %150 = vector.load %arg3[%c0_50, %c20] : memref<8x36xf32, #tpu.memory_space<vmem>>, vector<4x1xf32>
    %151 = vector.extract_strided_slice %149 {offsets = [0, 0], sizes = [1, 256], strides = [1, 1]} : vector<4x256xf32> to vector<1x256xf32>
    %152 = vector.broadcast %150 : vector<4x1xf32> to vector<4x256xf32>
    %153 = vector.broadcast %151 : vector<1x256xf32> to vector<4x256xf32>
    %154 = arith.mulf %152, %153 : vector<4x256xf32>
    %155 = arith.addf %144, %154 : vector<4x256xf32>
    %c0_51 = arith.constant 0 : index
    %c21 = arith.constant 21 : index
    %156 = vector.load %arg3[%c0_51, %c21] : memref<8x36xf32, #tpu.memory_space<vmem>>, vector<4x1xf32>
    %157 = vector.extract_strided_slice %149 {offsets = [1, 0], sizes = [1, 256], strides = [1, 1]} : vector<4x256xf32> to vector<1x256xf32>
    %158 = vector.broadcast %156 : vector<4x1xf32> to vector<4x256xf32>
    %159 = vector.broadcast %157 : vector<1x256xf32> to vector<4x256xf32>
    %160 = arith.mulf %158, %159 : vector<4x256xf32>
    %161 = arith.addf %155, %160 : vector<4x256xf32>
    %c0_52 = arith.constant 0 : index
    %c22 = arith.constant 22 : index
    %162 = vector.load %arg3[%c0_52, %c22] : memref<8x36xf32, #tpu.memory_space<vmem>>, vector<4x1xf32>
    %163 = vector.extract_strided_slice %149 {offsets = [2, 0], sizes = [1, 256], strides = [1, 1]} : vector<4x256xf32> to vector<1x256xf32>
    %164 = vector.broadcast %162 : vector<4x1xf32> to vector<4x256xf32>
    %165 = vector.broadcast %163 : vector<1x256xf32> to vector<4x256xf32>
    %166 = arith.mulf %164, %165 : vector<4x256xf32>
    %167 = arith.addf %161, %166 : vector<4x256xf32>
    %c0_53 = arith.constant 0 : index
    %c23 = arith.constant 23 : index
    %168 = vector.load %arg3[%c0_53, %c23] : memref<8x36xf32, #tpu.memory_space<vmem>>, vector<4x1xf32>
    %169 = vector.extract_strided_slice %149 {offsets = [3, 0], sizes = [1, 256], strides = [1, 1]} : vector<4x256xf32> to vector<1x256xf32>
    %170 = vector.broadcast %168 : vector<4x1xf32> to vector<4x256xf32>
    %171 = vector.broadcast %169 : vector<1x256xf32> to vector<4x256xf32>
    %172 = arith.mulf %170, %171 : vector<4x256xf32>
    %173 = arith.addf %167, %172 : vector<4x256xf32>
    %c0_54 = arith.constant 0 : index
    %c0_55 = arith.constant 0 : index
    %c32 = arith.constant 32 : index
    %174 = vector.load %arg1[%c0_54, %c0_55, %c32] : memref<1x4x290xf32, #tpu.memory_space<vmem>>, vector<1x4x256xf32>
    %175 = vector.shape_cast %174 : vector<1x4x256xf32> to vector<4x256xf32>
    %c6_56 = arith.constant 6 : index
    %c0_57 = arith.constant 0 : index
    %176 = vector.load %arg2[%c6_56, %c0_57] : memref<9x256xf32, #tpu.memory_space<vmem>>, vector<1x256xf32>
    %177 = vector.broadcast %176 : vector<1x256xf32> to vector<4x256xf32>
    %178 = arith.mulf %175, %177 : vector<4x256xf32>
    %c0_58 = arith.constant 0 : index
    %c24 = arith.constant 24 : index
    %179 = vector.load %arg3[%c0_58, %c24] : memref<8x36xf32, #tpu.memory_space<vmem>>, vector<4x1xf32>
    %180 = vector.extract_strided_slice %178 {offsets = [0, 0], sizes = [1, 256], strides = [1, 1]} : vector<4x256xf32> to vector<1x256xf32>
    %181 = vector.broadcast %179 : vector<4x1xf32> to vector<4x256xf32>
    %182 = vector.broadcast %180 : vector<1x256xf32> to vector<4x256xf32>
    %183 = arith.mulf %181, %182 : vector<4x256xf32>
    %184 = arith.addf %173, %183 : vector<4x256xf32>
    %c0_59 = arith.constant 0 : index
    %c25 = arith.constant 25 : index
    %185 = vector.load %arg3[%c0_59, %c25] : memref<8x36xf32, #tpu.memory_space<vmem>>, vector<4x1xf32>
    %186 = vector.extract_strided_slice %178 {offsets = [1, 0], sizes = [1, 256], strides = [1, 1]} : vector<4x256xf32> to vector<1x256xf32>
    %187 = vector.broadcast %185 : vector<4x1xf32> to vector<4x256xf32>
    %188 = vector.broadcast %186 : vector<1x256xf32> to vector<4x256xf32>
    %189 = arith.mulf %187, %188 : vector<4x256xf32>
    %190 = arith.addf %184, %189 : vector<4x256xf32>
    %c0_60 = arith.constant 0 : index
    %c26 = arith.constant 26 : index
    %191 = vector.load %arg3[%c0_60, %c26] : memref<8x36xf32, #tpu.memory_space<vmem>>, vector<4x1xf32>
    %192 = vector.extract_strided_slice %178 {offsets = [2, 0], sizes = [1, 256], strides = [1, 1]} : vector<4x256xf32> to vector<1x256xf32>
    %193 = vector.broadcast %191 : vector<4x1xf32> to vector<4x256xf32>
    %194 = vector.broadcast %192 : vector<1x256xf32> to vector<4x256xf32>
    %195 = arith.mulf %193, %194 : vector<4x256xf32>
    %196 = arith.addf %190, %195 : vector<4x256xf32>
    %c0_61 = arith.constant 0 : index
    %c27 = arith.constant 27 : index
    %197 = vector.load %arg3[%c0_61, %c27] : memref<8x36xf32, #tpu.memory_space<vmem>>, vector<4x1xf32>
    %198 = vector.extract_strided_slice %178 {offsets = [3, 0], sizes = [1, 256], strides = [1, 1]} : vector<4x256xf32> to vector<1x256xf32>
    %199 = vector.broadcast %197 : vector<4x1xf32> to vector<4x256xf32>
    %200 = vector.broadcast %198 : vector<1x256xf32> to vector<4x256xf32>
    %201 = arith.mulf %199, %200 : vector<4x256xf32>
    %202 = arith.addf %196, %201 : vector<4x256xf32>
    %c0_62 = arith.constant 0 : index
    %c0_63 = arith.constant 0 : index
    %c33 = arith.constant 33 : index
    %203 = vector.load %arg1[%c0_62, %c0_63, %c33] : memref<1x4x290xf32, #tpu.memory_space<vmem>>, vector<1x4x256xf32>
    %204 = vector.shape_cast %203 : vector<1x4x256xf32> to vector<4x256xf32>
    %c7_64 = arith.constant 7 : index
    %c0_65 = arith.constant 0 : index
    %205 = vector.load %arg2[%c7_64, %c0_65] : memref<9x256xf32, #tpu.memory_space<vmem>>, vector<1x256xf32>
    %206 = vector.broadcast %205 : vector<1x256xf32> to vector<4x256xf32>
    %207 = arith.mulf %204, %206 : vector<4x256xf32>
    %c0_66 = arith.constant 0 : index
    %c28 = arith.constant 28 : index
    %208 = vector.load %arg3[%c0_66, %c28] : memref<8x36xf32, #tpu.memory_space<vmem>>, vector<4x1xf32>
    %209 = vector.extract_strided_slice %207 {offsets = [0, 0], sizes = [1, 256], strides = [1, 1]} : vector<4x256xf32> to vector<1x256xf32>
    %210 = vector.broadcast %208 : vector<4x1xf32> to vector<4x256xf32>
    %211 = vector.broadcast %209 : vector<1x256xf32> to vector<4x256xf32>
    %212 = arith.mulf %210, %211 : vector<4x256xf32>
    %213 = arith.addf %202, %212 : vector<4x256xf32>
    %c0_67 = arith.constant 0 : index
    %c29 = arith.constant 29 : index
    %214 = vector.load %arg3[%c0_67, %c29] : memref<8x36xf32, #tpu.memory_space<vmem>>, vector<4x1xf32>
    %215 = vector.extract_strided_slice %207 {offsets = [1, 0], sizes = [1, 256], strides = [1, 1]} : vector<4x256xf32> to vector<1x256xf32>
    %216 = vector.broadcast %214 : vector<4x1xf32> to vector<4x256xf32>
    %217 = vector.broadcast %215 : vector<1x256xf32> to vector<4x256xf32>
    %218 = arith.mulf %216, %217 : vector<4x256xf32>
    %219 = arith.addf %213, %218 : vector<4x256xf32>
    %c0_68 = arith.constant 0 : index
    %c30 = arith.constant 30 : index
    %220 = vector.load %arg3[%c0_68, %c30] : memref<8x36xf32, #tpu.memory_space<vmem>>, vector<4x1xf32>
    %221 = vector.extract_strided_slice %207 {offsets = [2, 0], sizes = [1, 256], strides = [1, 1]} : vector<4x256xf32> to vector<1x256xf32>
    %222 = vector.broadcast %220 : vector<4x1xf32> to vector<4x256xf32>
    %223 = vector.broadcast %221 : vector<1x256xf32> to vector<4x256xf32>
    %224 = arith.mulf %222, %223 : vector<4x256xf32>
    %225 = arith.addf %219, %224 : vector<4x256xf32>
    %c0_69 = arith.constant 0 : index
    %c31 = arith.constant 31 : index
    %226 = vector.load %arg3[%c0_69, %c31] : memref<8x36xf32, #tpu.memory_space<vmem>>, vector<4x1xf32>
    %227 = vector.extract_strided_slice %207 {offsets = [3, 0], sizes = [1, 256], strides = [1, 1]} : vector<4x256xf32> to vector<1x256xf32>
    %228 = vector.broadcast %226 : vector<4x1xf32> to vector<4x256xf32>
    %229 = vector.broadcast %227 : vector<1x256xf32> to vector<4x256xf32>
    %230 = arith.mulf %228, %229 : vector<4x256xf32>
    %231 = arith.addf %225, %230 : vector<4x256xf32>
    %c0_70 = arith.constant 0 : index
    %c0_71 = arith.constant 0 : index
    %c34 = arith.constant 34 : index
    %232 = vector.load %arg1[%c0_70, %c0_71, %c34] : memref<1x4x290xf32, #tpu.memory_space<vmem>>, vector<1x4x256xf32>
    %233 = vector.shape_cast %232 : vector<1x4x256xf32> to vector<4x256xf32>
    %c8_72 = arith.constant 8 : index
    %c0_73 = arith.constant 0 : index
    %234 = vector.load %arg2[%c8_72, %c0_73] : memref<9x256xf32, #tpu.memory_space<vmem>>, vector<1x256xf32>
    %235 = vector.broadcast %234 : vector<1x256xf32> to vector<4x256xf32>
    %236 = arith.mulf %233, %235 : vector<4x256xf32>
    %c0_74 = arith.constant 0 : index
    %c32_75 = arith.constant 32 : index
    %237 = vector.load %arg3[%c0_74, %c32_75] : memref<8x36xf32, #tpu.memory_space<vmem>>, vector<4x1xf32>
    %238 = vector.extract_strided_slice %236 {offsets = [0, 0], sizes = [1, 256], strides = [1, 1]} : vector<4x256xf32> to vector<1x256xf32>
    %239 = vector.broadcast %237 : vector<4x1xf32> to vector<4x256xf32>
    %240 = vector.broadcast %238 : vector<1x256xf32> to vector<4x256xf32>
    %241 = arith.mulf %239, %240 : vector<4x256xf32>
    %242 = arith.addf %231, %241 : vector<4x256xf32>
    %c0_76 = arith.constant 0 : index
    %c33_77 = arith.constant 33 : index
    %243 = vector.load %arg3[%c0_76, %c33_77] : memref<8x36xf32, #tpu.memory_space<vmem>>, vector<4x1xf32>
    %244 = vector.extract_strided_slice %236 {offsets = [1, 0], sizes = [1, 256], strides = [1, 1]} : vector<4x256xf32> to vector<1x256xf32>
    %245 = vector.broadcast %243 : vector<4x1xf32> to vector<4x256xf32>
    %246 = vector.broadcast %244 : vector<1x256xf32> to vector<4x256xf32>
    %247 = arith.mulf %245, %246 : vector<4x256xf32>
    %248 = arith.addf %242, %247 : vector<4x256xf32>
    %c0_78 = arith.constant 0 : index
    %c34_79 = arith.constant 34 : index
    %249 = vector.load %arg3[%c0_78, %c34_79] : memref<8x36xf32, #tpu.memory_space<vmem>>, vector<4x1xf32>
    %250 = vector.extract_strided_slice %236 {offsets = [2, 0], sizes = [1, 256], strides = [1, 1]} : vector<4x256xf32> to vector<1x256xf32>
    %251 = vector.broadcast %249 : vector<4x1xf32> to vector<4x256xf32>
    %252 = vector.broadcast %250 : vector<1x256xf32> to vector<4x256xf32>
    %253 = arith.mulf %251, %252 : vector<4x256xf32>
    %254 = arith.addf %248, %253 : vector<4x256xf32>
    %c0_80 = arith.constant 0 : index
    %c35 = arith.constant 35 : index
    %255 = vector.load %arg3[%c0_80, %c35] : memref<8x36xf32, #tpu.memory_space<vmem>>, vector<4x1xf32>
    %256 = vector.extract_strided_slice %236 {offsets = [3, 0], sizes = [1, 256], strides = [1, 1]} : vector<4x256xf32> to vector<1x256xf32>
    %257 = vector.broadcast %255 : vector<4x1xf32> to vector<4x256xf32>
    %258 = vector.broadcast %256 : vector<1x256xf32> to vector<4x256xf32>
    %259 = arith.mulf %257, %258 : vector<4x256xf32>
    %260 = arith.addf %254, %259 : vector<4x256xf32>
    %c0_81 = arith.constant 0 : index
    %261 = memref.load %arg5[%c0_81] : memref<2xf32, #tpu.memory_space<smem>>
    %cst = arith.constant 0.000000e+00 : f32
    %262 = vector.broadcast %cst : f32 to vector<4x256xf32>
    %263 = arith.cmpf oge, %260, %262 : vector<4x256xf32>
    %264 = vector.broadcast %261 : f32 to vector<4x256xf32>
    %265 = arith.mulf %264, %260 : vector<4x256xf32>
    %266 = arith.select %263, %260, %265 : vector<4x256xi1>, vector<4x256xf32>
    %cst_82 = arith.constant 0.000000e+00 : f32
    %267 = vector.broadcast %cst_82 : f32 to vector<4x128xf32>
    %c0_83 = arith.constant 0 : index
    %c0_84 = arith.constant 0 : index
    %268 = vector.load %arg7[%c0_83, %c0_84] : memref<4x401xf32, #tpu.memory_space<vmem>>, vector<4x128xf32>
    tpu.vector_store %arg7[%c0_83, %c0_84], %267 {strides = array<i32>} : memref<4x401xf32, #tpu.memory_space<vmem>>, vector<4x128xf32>,
    %cst_85 = arith.constant 0.000000e+00 : f32
    %269 = vector.broadcast %cst_85 : f32 to vector<4x17xf32>
    %c0_86 = arith.constant 0 : index
    %c384 = arith.constant 384 : index
    %270 = vector.load %arg7[%c0_86, %c384] : memref<4x401xf32, #tpu.memory_space<vmem>>, vector<4x17xf32>
    tpu.vector_store %arg7[%c0_86, %c384], %269 {strides = array<i32>} : memref<4x401xf32, #tpu.memory_space<vmem>>, vector<4x17xf32>,
    %c0_87 = arith.constant 0 : index
    %c128 = arith.constant 128 : index
    %271 = vector.load %arg7[%c0_87, %c128] : memref<4x401xf32, #tpu.memory_space<vmem>>, vector<4x256xf32>
    tpu.vector_store %arg7[%c0_87, %c128], %266 {strides = array<i32>} : memref<4x401xf32, #tpu.memory_space<vmem>>, vector<4x256xf32>,
    %c4_88 = arith.constant 4 : index
    %c0_89 = arith.constant 0 : index
    %272 = vector.load %arg4[%c4_88, %c0_89] : memref<8x1xf32, #tpu.memory_space<vmem>>, vector<4x1xf32>
    %273 = vector.shape_cast %272 : vector<4x1xf32> to vector<4x1xf32>
    %274 = vector.broadcast %273 : vector<4x1xf32> to vector<4x256xf32>
    %c0_90 = arith.constant 0 : index
    %c111 = arith.constant 111 : index
    %275 = vector.load %arg7[%c0_90, %c111] : memref<4x401xf32, #tpu.memory_space<vmem>>, vector<4x256xf32>
    %c0_91 = arith.constant 0 : index
    %c0_92 = arith.constant 0 : index
    %276 = vector.load %arg2[%c0_91, %c0_92] : memref<9x256xf32, #tpu.memory_space<vmem>>, vector<1x256xf32>
    %277 = vector.broadcast %276 : vector<1x256xf32> to vector<4x256xf32>
    %278 = arith.mulf %275, %277 : vector<4x256xf32>
    %c4_93 = arith.constant 4 : index
    %c0_94 = arith.constant 0 : index
    %279 = vector.load %arg3[%c4_93, %c0_94] : memref<8x36xf32, #tpu.memory_space<vmem>>, vector<4x1xf32>
    %280 = vector.extract_strided_slice %278 {offsets = [0, 0], sizes = [1, 256], strides = [1, 1]} : vector<4x256xf32> to vector<1x256xf32>
    %281 = vector.broadcast %279 : vector<4x1xf32> to vector<4x256xf32>
    %282 = vector.broadcast %280 : vector<1x256xf32> to vector<4x256xf32>
    %283 = arith.mulf %281, %282 : vector<4x256xf32>
    %284 = arith.addf %274, %283 : vector<4x256xf32>
    %c4_95 = arith.constant 4 : index
    %c1_96 = arith.constant 1 : index
    %285 = vector.load %arg3[%c4_95, %c1_96] : memref<8x36xf32, #tpu.memory_space<vmem>>, vector<4x1xf32>
    %286 = vector.extract_strided_slice %278 {offsets = [1, 0], sizes = [1, 256], strides = [1, 1]} : vector<4x256xf32> to vector<1x256xf32>
    %287 = vector.broadcast %285 : vector<4x1xf32> to vector<4x256xf32>
    %288 = vector.broadcast %286 : vector<1x256xf32> to vector<4x256xf32>
    %289 = arith.mulf %287, %288 : vector<4x256xf32>
    %290 = arith.addf %284, %289 : vector<4x256xf32>
    %c4_97 = arith.constant 4 : index
    %c2_98 = arith.constant 2 : index
    %291 = vector.load %arg3[%c4_97, %c2_98] : memref<8x36xf32, #tpu.memory_space<vmem>>, vector<4x1xf32>
    %292 = vector.extract_strided_slice %278 {offsets = [2, 0], sizes = [1, 256], strides = [1, 1]} : vector<4x256xf32> to vector<1x256xf32>
    %293 = vector.broadcast %291 : vector<4x1xf32> to vector<4x256xf32>
    %294 = vector.broadcast %292 : vector<1x256xf32> to vector<4x256xf32>
    %295 = arith.mulf %293, %294 : vector<4x256xf32>
    %296 = arith.addf %290, %295 : vector<4x256xf32>
    %c4_99 = arith.constant 4 : index
    %c3_100 = arith.constant 3 : index
    %297 = vector.load %arg3[%c4_99, %c3_100] : memref<8x36xf32, #tpu.memory_space<vmem>>, vector<4x1xf32>
    %298 = vector.extract_strided_slice %278 {offsets = [3, 0], sizes = [1, 256], strides = [1, 1]} : vector<4x256xf32> to vector<1x256xf32>
    %299 = vector.broadcast %297 : vector<4x1xf32> to vector<4x256xf32>
    %300 = vector.broadcast %298 : vector<1x256xf32> to vector<4x256xf32>
    %301 = arith.mulf %299, %300 : vector<4x256xf32>
    %302 = arith.addf %296, %301 : vector<4x256xf32>
    %c0_101 = arith.constant 0 : index
    %c112 = arith.constant 112 : index
    %303 = vector.load %arg7[%c0_101, %c112] : memref<4x401xf32, #tpu.memory_space<vmem>>, vector<4x256xf32>
    %c1_102 = arith.constant 1 : index
    %c0_103 = arith.constant 0 : index
    %304 = vector.load %arg2[%c1_102, %c0_103] : memref<9x256xf32, #tpu.memory_space<vmem>>, vector<1x256xf32>
    %305 = vector.broadcast %304 : vector<1x256xf32> to vector<4x256xf32>
    %306 = arith.mulf %303, %305 : vector<4x256xf32>
    %c4_104 = arith.constant 4 : index
    %c4_105 = arith.constant 4 : index
    %307 = vector.load %arg3[%c4_104, %c4_105] : memref<8x36xf32, #tpu.memory_space<vmem>>, vector<4x1xf32>
    %308 = vector.extract_strided_slice %306 {offsets = [0, 0], sizes = [1, 256], strides = [1, 1]} : vector<4x256xf32> to vector<1x256xf32>
    %309 = vector.broadcast %307 : vector<4x1xf32> to vector<4x256xf32>
    %310 = vector.broadcast %308 : vector<1x256xf32> to vector<4x256xf32>
    %311 = arith.mulf %309, %310 : vector<4x256xf32>
    %312 = arith.addf %302, %311 : vector<4x256xf32>
    %c4_106 = arith.constant 4 : index
    %c5_107 = arith.constant 5 : index
    %313 = vector.load %arg3[%c4_106, %c5_107] : memref<8x36xf32, #tpu.memory_space<vmem>>, vector<4x1xf32>
    %314 = vector.extract_strided_slice %306 {offsets = [1, 0], sizes = [1, 256], strides = [1, 1]} : vector<4x256xf32> to vector<1x256xf32>
    %315 = vector.broadcast %313 : vector<4x1xf32> to vector<4x256xf32>
    %316 = vector.broadcast %314 : vector<1x256xf32> to vector<4x256xf32>
    %317 = arith.mulf %315, %316 : vector<4x256xf32>
    %318 = arith.addf %312, %317 : vector<4x256xf32>
    %c4_108 = arith.constant 4 : index
    %c6_109 = arith.constant 6 : index
    %319 = vector.load %arg3[%c4_108, %c6_109] : memref<8x36xf32, #tpu.memory_space<vmem>>, vector<4x1xf32>
    %320 = vector.extract_strided_slice %306 {offsets = [2, 0], sizes = [1, 256], strides = [1, 1]} : vector<4x256xf32> to vector<1x256xf32>
    %321 = vector.broadcast %319 : vector<4x1xf32> to vector<4x256xf32>
    %322 = vector.broadcast %320 : vector<1x256xf32> to vector<4x256xf32>
    %323 = arith.mulf %321, %322 : vector<4x256xf32>
    %324 = arith.addf %318, %323 : vector<4x256xf32>
    %c4_110 = arith.constant 4 : index
    %c7_111 = arith.constant 7 : index
    %325 = vector.load %arg3[%c4_110, %c7_111] : memref<8x36xf32, #tpu.memory_space<vmem>>, vector<4x1xf32>
    %326 = vector.extract_strided_slice %306 {offsets = [3, 0], sizes = [1, 256], strides = [1, 1]} : vector<4x256xf32> to vector<1x256xf32>
    %327 = vector.broadcast %325 : vector<4x1xf32> to vector<4x256xf32>
    %328 = vector.broadcast %326 : vector<1x256xf32> to vector<4x256xf32>
    %329 = arith.mulf %327, %328 : vector<4x256xf32>
    %330 = arith.addf %324, %329 : vector<4x256xf32>
    %c0_112 = arith.constant 0 : index
    %c113 = arith.constant 113 : index
    %331 = vector.load %arg7[%c0_112, %c113] : memref<4x401xf32, #tpu.memory_space<vmem>>, vector<4x256xf32>
    %c2_113 = arith.constant 2 : index
    %c0_114 = arith.constant 0 : index
    %332 = vector.load %arg2[%c2_113, %c0_114] : memref<9x256xf32, #tpu.memory_space<vmem>>, vector<1x256xf32>
    %333 = vector.broadcast %332 : vector<1x256xf32> to vector<4x256xf32>
    %334 = arith.mulf %331, %333 : vector<4x256xf32>
    %c4_115 = arith.constant 4 : index
    %c8_116 = arith.constant 8 : index
    %335 = vector.load %arg3[%c4_115, %c8_116] : memref<8x36xf32, #tpu.memory_space<vmem>>, vector<4x1xf32>
    %336 = vector.extract_strided_slice %334 {offsets = [0, 0], sizes = [1, 256], strides = [1, 1]} : vector<4x256xf32> to vector<1x256xf32>
    %337 = vector.broadcast %335 : vector<4x1xf32> to vector<4x256xf32>
    %338 = vector.broadcast %336 : vector<1x256xf32> to vector<4x256xf32>
    %339 = arith.mulf %337, %338 : vector<4x256xf32>
    %340 = arith.addf %330, %339 : vector<4x256xf32>
    %c4_117 = arith.constant 4 : index
    %c9_118 = arith.constant 9 : index
    %341 = vector.load %arg3[%c4_117, %c9_118] : memref<8x36xf32, #tpu.memory_space<vmem>>, vector<4x1xf32>
    %342 = vector.extract_strided_slice %334 {offsets = [1, 0], sizes = [1, 256], strides = [1, 1]} : vector<4x256xf32> to vector<1x256xf32>
    %343 = vector.broadcast %341 : vector<4x1xf32> to vector<4x256xf32>
    %344 = vector.broadcast %342 : vector<1x256xf32> to vector<4x256xf32>
    %345 = arith.mulf %343, %344 : vector<4x256xf32>
    %346 = arith.addf %340, %345 : vector<4x256xf32>
    %c4_119 = arith.constant 4 : index
    %c10_120 = arith.constant 10 : index
    %347 = vector.load %arg3[%c4_119, %c10_120] : memref<8x36xf32, #tpu.memory_space<vmem>>, vector<4x1xf32>
    %348 = vector.extract_strided_slice %334 {offsets = [2, 0], sizes = [1, 256], strides = [1, 1]} : vector<4x256xf32> to vector<1x256xf32>
    %349 = vector.broadcast %347 : vector<4x1xf32> to vector<4x256xf32>
    %350 = vector.broadcast %348 : vector<1x256xf32> to vector<4x256xf32>
    %351 = arith.mulf %349, %350 : vector<4x256xf32>
    %352 = arith.addf %346, %351 : vector<4x256xf32>
    %c4_121 = arith.constant 4 : index
    %c11_122 = arith.constant 11 : index
    %353 = vector.load %arg3[%c4_121, %c11_122] : memref<8x36xf32, #tpu.memory_space<vmem>>, vector<4x1xf32>
    %354 = vector.extract_strided_slice %334 {offsets = [3, 0], sizes = [1, 256], strides = [1, 1]} : vector<4x256xf32> to vector<1x256xf32>
    %355 = vector.broadcast %353 : vector<4x1xf32> to vector<4x256xf32>
    %356 = vector.broadcast %354 : vector<1x256xf32> to vector<4x256xf32>
    %357 = arith.mulf %355, %356 : vector<4x256xf32>
    %358 = arith.addf %352, %357 : vector<4x256xf32>
    %c0_123 = arith.constant 0 : index
    %c127 = arith.constant 127 : index
    %359 = vector.load %arg7[%c0_123, %c127] : memref<4x401xf32, #tpu.memory_space<vmem>>, vector<4x256xf32>
    %c3_124 = arith.constant 3 : index
    %c0_125 = arith.constant 0 : index
    %360 = vector.load %arg2[%c3_124, %c0_125] : memref<9x256xf32, #tpu.memory_space<vmem>>, vector<1x256xf32>
    %361 = vector.broadcast %360 : vector<1x256xf32> to vector<4x256xf32>
    %362 = arith.mulf %359, %361 : vector<4x256xf32>
    %c4_126 = arith.constant 4 : index
    %c12_127 = arith.constant 12 : index
    %363 = vector.load %arg3[%c4_126, %c12_127] : memref<8x36xf32, #tpu.memory_space<vmem>>, vector<4x1xf32>
    %364 = vector.extract_strided_slice %362 {offsets = [0, 0], sizes = [1, 256], strides = [1, 1]} : vector<4x256xf32> to vector<1x256xf32>
    %365 = vector.broadcast %363 : vector<4x1xf32> to vector<4x256xf32>
    %366 = vector.broadcast %364 : vector<1x256xf32> to vector<4x256xf32>
    %367 = arith.mulf %365, %366 : vector<4x256xf32>
    %368 = arith.addf %358, %367 : vector<4x256xf32>
    %c4_128 = arith.constant 4 : index
    %c13_129 = arith.constant 13 : index
    %369 = vector.load %arg3[%c4_128, %c13_129] : memref<8x36xf32, #tpu.memory_space<vmem>>, vector<4x1xf32>
    %370 = vector.extract_strided_slice %362 {offsets = [1, 0], sizes = [1, 256], strides = [1, 1]} : vector<4x256xf32> to vector<1x256xf32>
    %371 = vector.broadcast %369 : vector<4x1xf32> to vector<4x256xf32>
    %372 = vector.broadcast %370 : vector<1x256xf32> to vector<4x256xf32>
    %373 = arith.mulf %371, %372 : vector<4x256xf32>
    %374 = arith.addf %368, %373 : vector<4x256xf32>
    %c4_130 = arith.constant 4 : index
    %c14_131 = arith.constant 14 : index
    %375 = vector.load %arg3[%c4_130, %c14_131] : memref<8x36xf32, #tpu.memory_space<vmem>>, vector<4x1xf32>
    %376 = vector.extract_strided_slice %362 {offsets = [2, 0], sizes = [1, 256], strides = [1, 1]} : vector<4x256xf32> to vector<1x256xf32>
    %377 = vector.broadcast %375 : vector<4x1xf32> to vector<4x256xf32>
    %378 = vector.broadcast %376 : vector<1x256xf32> to vector<4x256xf32>
    %379 = arith.mulf %377, %378 : vector<4x256xf32>
    %380 = arith.addf %374, %379 : vector<4x256xf32>
    %c4_132 = arith.constant 4 : index
    %c15_133 = arith.constant 15 : index
    %381 = vector.load %arg3[%c4_132, %c15_133] : memref<8x36xf32, #tpu.memory_space<vmem>>, vector<4x1xf32>
    %382 = vector.extract_strided_slice %362 {offsets = [3, 0], sizes = [1, 256], strides = [1, 1]} : vector<4x256xf32> to vector<1x256xf32>
    %383 = vector.broadcast %381 : vector<4x1xf32> to vector<4x256xf32>
    %384 = vector.broadcast %382 : vector<1x256xf32> to vector<4x256xf32>
    %385 = arith.mulf %383, %384 : vector<4x256xf32>
    %386 = arith.addf %380, %385 : vector<4x256xf32>
    %c0_134 = arith.constant 0 : index
    %c128_135 = arith.constant 128 : index
    %387 = vector.load %arg7[%c0_134, %c128_135] : memref<4x401xf32, #tpu.memory_space<vmem>>, vector<4x256xf32>
    %c4_136 = arith.constant 4 : index
    %c16_137 = arith.constant 16 : index
    %388 = vector.load %arg3[%c4_136, %c16_137] : memref<8x36xf32, #tpu.memory_space<vmem>>, vector<4x1xf32>
    %389 = vector.extract_strided_slice %387 {offsets = [0, 0], sizes = [1, 256], strides = [1, 1]} : vector<4x256xf32> to vector<1x256xf32>
    %390 = vector.broadcast %388 : vector<4x1xf32> to vector<4x256xf32>
    %391 = vector.broadcast %389 : vector<1x256xf32> to vector<4x256xf32>
    %392 = arith.mulf %390, %391 : vector<4x256xf32>
    %393 = arith.addf %386, %392 : vector<4x256xf32>
    %c4_138 = arith.constant 4 : index
    %c17_139 = arith.constant 17 : index
    %394 = vector.load %arg3[%c4_138, %c17_139] : memref<8x36xf32, #tpu.memory_space<vmem>>, vector<4x1xf32>
    %395 = vector.extract_strided_slice %387 {offsets = [1, 0], sizes = [1, 256], strides = [1, 1]} : vector<4x256xf32> to vector<1x256xf32>
    %396 = vector.broadcast %394 : vector<4x1xf32> to vector<4x256xf32>
    %397 = vector.broadcast %395 : vector<1x256xf32> to vector<4x256xf32>
    %398 = arith.mulf %396, %397 : vector<4x256xf32>
    %399 = arith.addf %393, %398 : vector<4x256xf32>
    %c4_140 = arith.constant 4 : index
    %c18_141 = arith.constant 18 : index
    %400 = vector.load %arg3[%c4_140, %c18_141] : memref<8x36xf32, #tpu.memory_space<vmem>>, vector<4x1xf32>
    %401 = vector.extract_strided_slice %387 {offsets = [2, 0], sizes = [1, 256], strides = [1, 1]} : vector<4x256xf32> to vector<1x256xf32>
    %402 = vector.broadcast %400 : vector<4x1xf32> to vector<4x256xf32>
    %403 = vector.broadcast %401 : vector<1x256xf32> to vector<4x256xf32>
    %404 = arith.mulf %402, %403 : vector<4x256xf32>
    %405 = arith.addf %399, %404 : vector<4x256xf32>
    %c4_142 = arith.constant 4 : index
    %c19_143 = arith.constant 19 : index
    %406 = vector.load %arg3[%c4_142, %c19_143] : memref<8x36xf32, #tpu.memory_space<vmem>>, vector<4x1xf32>
    %407 = vector.extract_strided_slice %387 {offsets = [3, 0], sizes = [1, 256], strides = [1, 1]} : vector<4x256xf32> to vector<1x256xf32>
    %408 = vector.broadcast %406 : vector<4x1xf32> to vector<4x256xf32>
    %409 = vector.broadcast %407 : vector<1x256xf32> to vector<4x256xf32>
    %410 = arith.mulf %408, %409 : vector<4x256xf32>
    %411 = arith.addf %405, %410 : vector<4x256xf32>
    %c0_144 = arith.constant 0 : index
    %c129 = arith.constant 129 : index
    %412 = vector.load %arg7[%c0_144, %c129] : memref<4x401xf32, #tpu.memory_space<vmem>>, vector<4x256xf32>
    %c5_145 = arith.constant 5 : index
    %c0_146 = arith.constant 0 : index
    %413 = vector.load %arg2[%c5_145, %c0_146] : memref<9x256xf32, #tpu.memory_space<vmem>>, vector<1x256xf32>
    %414 = vector.broadcast %413 : vector<1x256xf32> to vector<4x256xf32>
    %415 = arith.mulf %412, %414 : vector<4x256xf32>
    %c4_147 = arith.constant 4 : index
    %c20_148 = arith.constant 20 : index
    %416 = vector.load %arg3[%c4_147, %c20_148] : memref<8x36xf32, #tpu.memory_space<vmem>>, vector<4x1xf32>
    %417 = vector.extract_strided_slice %415 {offsets = [0, 0], sizes = [1, 256], strides = [1, 1]} : vector<4x256xf32> to vector<1x256xf32>
    %418 = vector.broadcast %416 : vector<4x1xf32> to vector<4x256xf32>
    %419 = vector.broadcast %417 : vector<1x256xf32> to vector<4x256xf32>
    %420 = arith.mulf %418, %419 : vector<4x256xf32>
    %421 = arith.addf %411, %420 : vector<4x256xf32>
    %c4_149 = arith.constant 4 : index
    %c21_150 = arith.constant 21 : index
    %422 = vector.load %arg3[%c4_149, %c21_150] : memref<8x36xf32, #tpu.memory_space<vmem>>, vector<4x1xf32>
    %423 = vector.extract_strided_slice %415 {offsets = [1, 0], sizes = [1, 256], strides = [1, 1]} : vector<4x256xf32> to vector<1x256xf32>
    %424 = vector.broadcast %422 : vector<4x1xf32> to vector<4x256xf32>
    %425 = vector.broadcast %423 : vector<1x256xf32> to vector<4x256xf32>
    %426 = arith.mulf %424, %425 : vector<4x256xf32>
    %427 = arith.addf %421, %426 : vector<4x256xf32>
    %c4_151 = arith.constant 4 : index
    %c22_152 = arith.constant 22 : index
    %428 = vector.load %arg3[%c4_151, %c22_152] : memref<8x36xf32, #tpu.memory_space<vmem>>, vector<4x1xf32>
    %429 = vector.extract_strided_slice %415 {offsets = [2, 0], sizes = [1, 256], strides = [1, 1]} : vector<4x256xf32> to vector<1x256xf32>
    %430 = vector.broadcast %428 : vector<4x1xf32> to vector<4x256xf32>
    %431 = vector.broadcast %429 : vector<1x256xf32> to vector<4x256xf32>
    %432 = arith.mulf %430, %431 : vector<4x256xf32>
    %433 = arith.addf %427, %432 : vector<4x256xf32>
    %c4_153 = arith.constant 4 : index
    %c23_154 = arith.constant 23 : index
    %434 = vector.load %arg3[%c4_153, %c23_154] : memref<8x36xf32, #tpu.memory_space<vmem>>, vector<4x1xf32>
    %435 = vector.extract_strided_slice %415 {offsets = [3, 0], sizes = [1, 256], strides = [1, 1]} : vector<4x256xf32> to vector<1x256xf32>
    %436 = vector.broadcast %434 : vector<4x1xf32> to vector<4x256xf32>
    %437 = vector.broadcast %435 : vector<1x256xf32> to vector<4x256xf32>
    %438 = arith.mulf %436, %437 : vector<4x256xf32>
    %439 = arith.addf %433, %438 : vector<4x256xf32>
    %c0_155 = arith.constant 0 : index
    %c143 = arith.constant 143 : index
    %440 = vector.load %arg7[%c0_155, %c143] : memref<4x401xf32, #tpu.memory_space<vmem>>, vector<4x256xf32>
    %c6_156 = arith.constant 6 : index
    %c0_157 = arith.constant 0 : index
    %441 = vector.load %arg2[%c6_156, %c0_157] : memref<9x256xf32, #tpu.memory_space<vmem>>, vector<1x256xf32>
    %442 = vector.broadcast %441 : vector<1x256xf32> to vector<4x256xf32>
    %443 = arith.mulf %440, %442 : vector<4x256xf32>
    %c4_158 = arith.constant 4 : index
    %c24_159 = arith.constant 24 : index
    %444 = vector.load %arg3[%c4_158, %c24_159] : memref<8x36xf32, #tpu.memory_space<vmem>>, vector<4x1xf32>
    %445 = vector.extract_strided_slice %443 {offsets = [0, 0], sizes = [1, 256], strides = [1, 1]} : vector<4x256xf32> to vector<1x256xf32>
    %446 = vector.broadcast %444 : vector<4x1xf32> to vector<4x256xf32>
    %447 = vector.broadcast %445 : vector<1x256xf32> to vector<4x256xf32>
    %448 = arith.mulf %446, %447 : vector<4x256xf32>
    %449 = arith.addf %439, %448 : vector<4x256xf32>
    %c4_160 = arith.constant 4 : index
    %c25_161 = arith.constant 25 : index
    %450 = vector.load %arg3[%c4_160, %c25_161] : memref<8x36xf32, #tpu.memory_space<vmem>>, vector<4x1xf32>
    %451 = vector.extract_strided_slice %443 {offsets = [1, 0], sizes = [1, 256], strides = [1, 1]} : vector<4x256xf32> to vector<1x256xf32>
    %452 = vector.broadcast %450 : vector<4x1xf32> to vector<4x256xf32>
    %453 = vector.broadcast %451 : vector<1x256xf32> to vector<4x256xf32>
    %454 = arith.mulf %452, %453 : vector<4x256xf32>
    %455 = arith.addf %449, %454 : vector<4x256xf32>
    %c4_162 = arith.constant 4 : index
    %c26_163 = arith.constant 26 : index
    %456 = vector.load %arg3[%c4_162, %c26_163] : memref<8x36xf32, #tpu.memory_space<vmem>>, vector<4x1xf32>
    %457 = vector.extract_strided_slice %443 {offsets = [2, 0], sizes = [1, 256], strides = [1, 1]} : vector<4x256xf32> to vector<1x256xf32>
    %458 = vector.broadcast %456 : vector<4x1xf32> to vector<4x256xf32>
    %459 = vector.broadcast %457 : vector<1x256xf32> to vector<4x256xf32>
    %460 = arith.mulf %458, %459 : vector<4x256xf32>
    %461 = arith.addf %455, %460 : vector<4x256xf32>
    %c4_164 = arith.constant 4 : index
    %c27_165 = arith.constant 27 : index
    %462 = vector.load %arg3[%c4_164, %c27_165] : memref<8x36xf32, #tpu.memory_space<vmem>>, vector<4x1xf32>
    %463 = vector.extract_strided_slice %443 {offsets = [3, 0], sizes = [1, 256], strides = [1, 1]} : vector<4x256xf32> to vector<1x256xf32>
    %464 = vector.broadcast %462 : vector<4x1xf32> to vector<4x256xf32>
    %465 = vector.broadcast %463 : vector<1x256xf32> to vector<4x256xf32>
    %466 = arith.mulf %464, %465 : vector<4x256xf32>
    %467 = arith.addf %461, %466 : vector<4x256xf32>
    %c0_166 = arith.constant 0 : index
    %c144 = arith.constant 144 : index
    %468 = vector.load %arg7[%c0_166, %c144] : memref<4x401xf32, #tpu.memory_space<vmem>>, vector<4x256xf32>
    %c7_167 = arith.constant 7 : index
    %c0_168 = arith.constant 0 : index
    %469 = vector.load %arg2[%c7_167, %c0_168] : memref<9x256xf32, #tpu.memory_space<vmem>>, vector<1x256xf32>
    %470 = vector.broadcast %469 : vector<1x256xf32> to vector<4x256xf32>
    %471 = arith.mulf %468, %470 : vector<4x256xf32>
    %c4_169 = arith.constant 4 : index
    %c28_170 = arith.constant 28 : index
    %472 = vector.load %arg3[%c4_169, %c28_170] : memref<8x36xf32, #tpu.memory_space<vmem>>, vector<4x1xf32>
    %473 = vector.extract_strided_slice %471 {offsets = [0, 0], sizes = [1, 256], strides = [1, 1]} : vector<4x256xf32> to vector<1x256xf32>
    %474 = vector.broadcast %472 : vector<4x1xf32> to vector<4x256xf32>
    %475 = vector.broadcast %473 : vector<1x256xf32> to vector<4x256xf32>
    %476 = arith.mulf %474, %475 : vector<4x256xf32>
    %477 = arith.addf %467, %476 : vector<4x256xf32>
    %c4_171 = arith.constant 4 : index
    %c29_172 = arith.constant 29 : index
    %478 = vector.load %arg3[%c4_171, %c29_172] : memref<8x36xf32, #tpu.memory_space<vmem>>, vector<4x1xf32>
    %479 = vector.extract_strided_slice %471 {offsets = [1, 0], sizes = [1, 256], strides = [1, 1]} : vector<4x256xf32> to vector<1x256xf32>
    %480 = vector.broadcast %478 : vector<4x1xf32> to vector<4x256xf32>
    %481 = vector.broadcast %479 : vector<1x256xf32> to vector<4x256xf32>
    %482 = arith.mulf %480, %481 : vector<4x256xf32>
    %483 = arith.addf %477, %482 : vector<4x256xf32>
    %c4_173 = arith.constant 4 : index
    %c30_174 = arith.constant 30 : index
    %484 = vector.load %arg3[%c4_173, %c30_174] : memref<8x36xf32, #tpu.memory_space<vmem>>, vector<4x1xf32>
    %485 = vector.extract_strided_slice %471 {offsets = [2, 0], sizes = [1, 256], strides = [1, 1]} : vector<4x256xf32> to vector<1x256xf32>
    %486 = vector.broadcast %484 : vector<4x1xf32> to vector<4x256xf32>
    %487 = vector.broadcast %485 : vector<1x256xf32> to vector<4x256xf32>
    %488 = arith.mulf %486, %487 : vector<4x256xf32>
    %489 = arith.addf %483, %488 : vector<4x256xf32>
    %c4_175 = arith.constant 4 : index
    %c31_176 = arith.constant 31 : index
    %490 = vector.load %arg3[%c4_175, %c31_176] : memref<8x36xf32, #tpu.memory_space<vmem>>, vector<4x1xf32>
    %491 = vector.extract_strided_slice %471 {offsets = [3, 0], sizes = [1, 256], strides = [1, 1]} : vector<4x256xf32> to vector<1x256xf32>
    %492 = vector.broadcast %490 : vector<4x1xf32> to vector<4x256xf32>
    %493 = vector.broadcast %491 : vector<1x256xf32> to vector<4x256xf32>
    %494 = arith.mulf %492, %493 : vector<4x256xf32>
    %495 = arith.addf %489, %494 : vector<4x256xf32>
    %c0_177 = arith.constant 0 : index
    %c145 = arith.constant 145 : index
    %496 = vector.load %arg7[%c0_177, %c145] : memref<4x401xf32, #tpu.memory_space<vmem>>, vector<4x256xf32>
    %c8_178 = arith.constant 8 : index
    %c0_179 = arith.constant 0 : index
    %497 = vector.load %arg2[%c8_178, %c0_179] : memref<9x256xf32, #tpu.memory_space<vmem>>, vector<1x256xf32>
    %498 = vector.broadcast %497 : vector<1x256xf32> to vector<4x256xf32>
    %499 = arith.mulf %496, %498 : vector<4x256xf32>
    %c4_180 = arith.constant 4 : index
    %c32_181 = arith.constant 32 : index
    %500 = vector.load %arg3[%c4_180, %c32_181] : memref<8x36xf32, #tpu.memory_space<vmem>>, vector<4x1xf32>
    %501 = vector.extract_strided_slice %499 {offsets = [0, 0], sizes = [1, 256], strides = [1, 1]} : vector<4x256xf32> to vector<1x256xf32>
    %502 = vector.broadcast %500 : vector<4x1xf32> to vector<4x256xf32>
    %503 = vector.broadcast %501 : vector<1x256xf32> to vector<4x256xf32>
    %504 = arith.mulf %502, %503 : vector<4x256xf32>
    %505 = arith.addf %495, %504 : vector<4x256xf32>
    %c4_182 = arith.constant 4 : index
    %c33_183 = arith.constant 33 : index
    %506 = vector.load %arg3[%c4_182, %c33_183] : memref<8x36xf32, #tpu.memory_space<vmem>>, vector<4x1xf32>
    %507 = vector.extract_strided_slice %499 {offsets = [1, 0], sizes = [1, 256], strides = [1, 1]} : vector<4x256xf32> to vector<1x256xf32>
    %508 = vector.broadcast %506 : vector<4x1xf32> to vector<4x256xf32>
    %509 = vector.broadcast %507 : vector<1x256xf32> to vector<4x256xf32>
    %510 = arith.mulf %508, %509 : vector<4x256xf32>
    %511 = arith.addf %505, %510 : vector<4x256xf32>
    %c4_184 = arith.constant 4 : index
    %c34_185 = arith.constant 34 : index
    %512 = vector.load %arg3[%c4_184, %c34_185] : memref<8x36xf32, #tpu.memory_space<vmem>>, vector<4x1xf32>
    %513 = vector.extract_strided_slice %499 {offsets = [2, 0], sizes = [1, 256], strides = [1, 1]} : vector<4x256xf32> to vector<1x256xf32>
    %514 = vector.broadcast %512 : vector<4x1xf32> to vector<4x256xf32>
    %515 = vector.broadcast %513 : vector<1x256xf32> to vector<4x256xf32>
    %516 = arith.mulf %514, %515 : vector<4x256xf32>
    %517 = arith.addf %511, %516 : vector<4x256xf32>
    %c4_186 = arith.constant 4 : index
    %c35_187 = arith.constant 35 : index
    %518 = vector.load %arg3[%c4_186, %c35_187] : memref<8x36xf32, #tpu.memory_space<vmem>>, vector<4x1xf32>
    %519 = vector.extract_strided_slice %499 {offsets = [3, 0], sizes = [1, 256], strides = [1, 1]} : vector<4x256xf32> to vector<1x256xf32>
    %520 = vector.broadcast %518 : vector<4x1xf32> to vector<4x256xf32>
    %521 = vector.broadcast %519 : vector<1x256xf32> to vector<4x256xf32>
    %522 = arith.mulf %520, %521 : vector<4x256xf32>
    %523 = arith.addf %517, %522 : vector<4x256xf32>
    %c1_188 = arith.constant 1 : index
    %524 = memref.load %arg5[%c1_188] : memref<2xf32, #tpu.memory_space<smem>>
    %cst_189 = arith.constant 0.000000e+00 : f32
    %525 = vector.broadcast %cst_189 : f32 to vector<4x256xf32>
    %526 = arith.cmpf oge, %523, %525 : vector<4x256xf32>
    %527 = vector.broadcast %524 : f32 to vector<4x256xf32>
    %528 = arith.mulf %527, %523 : vector<4x256xf32>
    %529 = arith.select %526, %523, %528 : vector<4x256xi1>, vector<4x256xf32>
    %c0_190 = arith.constant 0 : index
    %c0_191 = arith.constant 0 : index
    %c0_192 = arith.constant 0 : index
    %530 = vector.load %arg6[%c0_190, %c0_191, %c0_192] : memref<1x4x256xf32, #tpu.memory_space<vmem>>, vector<1x4x256xf32>
    %531 = vector.shape_cast %530 : vector<1x4x256xf32> to vector<4x256xf32>
    %532 = vector.shape_cast %529 : vector<4x256xf32> to vector<1x4x256xf32>
    tpu.vector_store %arg6[%c0_190, %c0_191, %c0_192], %532 {strides = array<i32>} : memref<1x4x256xf32, #tpu.memory_space<vmem>>, vector<1x4x256xf32>,
    return
  }
  func.func @transform_0(%arg0: i32) -> (i32, i32, i32) {
    %c0_i32 = arith.constant 0 : i32
    %c0_i32_0 = arith.constant 0 : i32
    %c0_i32_1 = arith.constant 0 : i32
    return %arg0, %c0_i32, %c0_i32_0 : i32, i32, i32
  }
  func.func @transform_1(%arg0: i32) -> (i32, i32) {
    %c0_i32 = arith.constant 0 : i32
    %c0_i32_0 = arith.constant 0 : i32
    %c0_i32_1 = arith.constant 0 : i32
    return %c0_i32, %c0_i32_0 : i32, i32
  }
  func.func @transform_2(%arg0: i32) -> (i32, i32) {
    %c0_i32 = arith.constant 0 : i32
    %c0_i32_0 = arith.constant 0 : i32
    %c0_i32_1 = arith.constant 0 : i32
    return %c0_i32, %c0_i32_0 : i32, i32
  }
  func.func @transform_3(%arg0: i32) -> (i32, i32) {
    %c0_i32 = arith.constant 0 : i32
    %c0_i32_0 = arith.constant 0 : i32
    %c0_i32_1 = arith.constant 0 : i32
    return %c0_i32, %c0_i32_0 : i32, i32
  }
  func.func @transform_4(%arg0: i32) -> i32 {
    %c0_i32 = arith.constant 0 : i32
    %c0_i32_0 = arith.constant 0 : i32
    return %c0_i32 : i32
  }
  func.func @transform_5(%arg0: i32) -> (i32, i32, i32) {
    %c0_i32 = arith.constant 0 : i32
    %c0_i32_0 = arith.constant 0 : i32
    %c0_i32_1 = arith.constant 0 : i32
    return %arg0, %c0_i32, %c0_i32_0 : i32, i32, i32
  }
}

</mosaic_0001>

<bundles_post_ra>
// kernel: tpu_custom_call.1
= control target key start
LH: loop header
LB: loop body
LE: loop exit
PB: predicated region body
PF: predicated region fallthrough
CT: control target
= control target key end

     0   :  { %10 = vsyncpa [#allocation4], 0  ;;  %s6597_s0 = inlined_call_operand.hbm [shape: f32[2,4,290], index: 0, kind: input, shape index: {}]   ;;  %s6598_s1 = inlined_call_operand.hbm [shape: f32[9,256], index: 1, kind: input, shape index: {}]   ;;  %s6599_s2 = inlined_call_operand.vmem [shape: f32[8,36], index: 2, kind: input, shape index: {}]   ;;  %s6600_s3 = inlined_call_operand.vmem [shape: f32[8,1], index: 3, kind: input, shape index: {}]   ;;  %s6601_s4 = inlined_call_operand.vmem [shape: f32[2], index: 4, kind: input, shape index: {}]   ;;  %s6602_s5 = inlined_call_operand.hbm [shape: f32[2,4,256], index: 5, kind: output, shape index: {}]  }
   0x1   :  { %12 = vsyncpa [#allocation4 + $0x1], 0 }
   0x2   :  { %13 = vsyncpa [#allocation8], 0 }
   0x3   :  { %14 = vsyncpa [#allocation6], 0 }
   0x4   :  { %15 = vsyncpa [#allocation5], 0 }
   0x5   :  { %17 = vsyncpa [#allocation5 + $0x1], 0  ;;  %s4707_s18 = smov 0   ;;  %s4709_s19 = smov 0  }
   0x6   :  { %s4711_s20 = smov 0   ;;  %s4713_s21 = smov 0  }
   0x7 LB: > { %s4728_s22 = sadd.s32 4294967295, %s4614_s21   ;;  %s4248_s23 = sadd.s32 4294967294, %s4614_s21   ;;  %s4614_s21 = sphi %s4713_s21, %s6828_s21   ;;  %s4610_s20 = sphi %s4711_s20, %s6827_s20   ;;  %s4606_s19 = sphi %s4709_s19, %s6826_s19   ;;  %s4602_s18 = sphi %s4707_s18, %s6825_s18  }
   0x8   : > { %p43_p0 = scmp.ne.s32.totalorder %s4606_s19, %s4602_s18  ;;  %p6603_p1 = scmp.eq.s32.totalorder %s4728_s22, 0 }
   0x9   : > { %p157_p3 = scmp.eq.s32.totalorder %s4248_s23, 1  ;;  %p4249_p5 = scmp.ge.s32.totalorder %s4614_s21, 1 }
   0xa   : > { %p4737_p4 = por %p6603_p1, %p43_p0  ;;  %p164_p7 = scmp.lt.s32.totalorder %s4614_s21, 3 }
   0xb   : > { %p4742_p6 = por %p157_p3, %p43_p0  ;;  %s4616_s27 = smov [#allocation7]  }
   0xc   : > { %s6665_s24 = scalar_select %p4737_p4, 1, 0 }
   0xd   : > { %s6666_s25 = scalar_select %p4742_p6, 1, 0 }
   0xe   : > { %p4747_p8 = pnand %p4249_p5, %p164_p7  ;;  %s176_s28 = sshll.u32 %s4616_s27, 4  ;;  %s177_s28 = int_to_ptr.vmem [resolvable:$true] %s176_s28 }
   0xf   : > { %s196_s6 = sshll.u32 %s6601_s4, 4  ;;  %s4467_s10 = scalar_lea.hbm %s6598_s1, 512  ;;  %s4763_s6 = int_to_ptr.vmem [resolvable:$true] %s196_s6 }
  0x10   : > { %s6667_s26 = scalar_select %p4747_p8, 1, 0 }
  0x11   : > { %p4280_p9 = pneg %p4747_p8  ;;  %p4468_p12 = scmp.ne.s32.totalorder %s6598_s1, %s4467_s10 }
  0x12   : > { %p4474_p5 = scmp.lt.u32.totalorder %s4467_s10, %s6598_s1 }
  0x13   : > { %p4759_p11 = pnand %p4280_p9, %p6603_p1 }
  0x15   : > { %p4469_p13 = pneg %p4759_p11 }
  0x17   : > { %p4470_p0 = pnand %p4469_p13, %p4468_p12 }
  0x19   : > { %p4471_p3 = pneg %p4470_p0 }
  0x1b   : > { %p4476_p7 = pnand %p4474_p5, %p4471_p3 }
  0x1d   : > { %4479 = shalt.err (!%p4476_p7)
}
  0x1e   : > { %s4480_s15 = scalar_lea.vmem %s177_s28, 512  ;;  %p4488_p2 = scmp.lt.s32.totalorder %s177_s28, %s177_s28 }
  0x1f   : > { %p4481_p9 = scmp.ne.s32.totalorder %s177_s28, %s4480_s15  ;;  %p4489_p6 = scmp.lt.s32.totalorder %s4480_s15, %s4480_s15 }
  0x21   : > { %p4483_p10 = pnand %p4481_p9, %p4469_p13  ;;  %p4490_p4 = por %p4489_p6, %p4488_p2 }
  0x23   : > { %p4484_p1 = pneg %p4483_p10 }
  0x25   : > { %p4491_p8 = pnand %p4490_p4, %p4484_p1 }
  0x27   : > { %4494 = shalt.err (!%p4491_p8)
}
  0x28   : > { %s4617_s16 = smov 256   ;;  %s4618_s17 = smov 16  }
  0x29   : > { %4283 = dma.hbm_to_vmem [thread:$0]  (!%p4759_p11), %s6598_s1, 512, %s177_s28, [#allocation8], %s4617_s16, %s4617_s16, %s4618_s17  }
  0x2a   : > { %s4495_s29 = scalar_lea.vmem %s4763_s6, 16  ;;  %p4503_p1 = scmp.lt.s32.totalorder %s4763_s6, %s4763_s6 }
  0x2b   : > { %p4496_p12 = scmp.ne.s32.totalorder %s4763_s6, %s4495_s29  ;;  %p4504_p4 = scmp.lt.s32.totalorder %s4495_s29, %s4495_s29 }
  0x2d   : > { %p4498_p10 = pnand %p4496_p12, %p4469_p13  ;;  %p4505_p6 = por %p4504_p4, %p4503_p1 }
  0x2f   : > { %p4499_p2 = pneg %p4498_p10 }
  0x31   : > { %p4506_p8 = pnand %p4505_p6, %p4499_p2 }
  0x33   : > { %4509 = shalt.err (!%p4506_p8)
}
  0x34   : > { %s4619_s30 = smov [#allocation9]   ;;  %s4798_s28 = sadd.s32 1, %s4614_s21  }
  0x35   : > { %4286 = dma.vmem_to_smem (!%p4759_p11), %s4763_s6, 16, %s4619_s30, [#allocation6]  }
  0x36   : > { %s30_s8 = sadd.s32 1, %s4610_s20  ;;  %s27_s9 = ssub.s32 %s4614_s21, %s4798_s28 }
  0x37   : > { %p37_p13 = scmp.ne.s32.totalorder %s4610_s20, %s4606_s19  ;;  %p28_p0 = scmp.eq.s32.totalorder %s27_s9, 0 }
  0x38   : > { %p38_p3 = scmp.eq.s32.totalorder %s4614_s21, 0  ;;  %p6669_p5 = scmp.eq.s32.totalorder %s4728_s22, 1 }
  0x39   : > { %p4297_p9 = scmp.lt.s32.totalorder %s4614_s21, 2  ;;  %s207_s11 = sand.u32 1, %s4610_s20  }
  0x3a   : > { %p4808_p7 = por %p6669_p5, %p37_p13  ;;  %p39_p12 = por %p38_p3, %p37_p13 }
  0x3b   : > { %s4814_s10 = scalar_select %p28_p0, %s4610_s20, %s30_s8  }
  0x3c   : > { %s4265_s12 = smul.u32 12, %s207_s11  ;;  %p4818_p11 = pnand %p4297_p9, %p39_p12 }
  0x3d   : > { %s4266_s6 = smul.u32 192, %s4614_s21  ;;  %s208_s27 = scalar_lea.sflag [#allocation4], %s207_s11 }
  0x3e   : > { %s211_s17 = scalar_lea.vmem [#allocation3], %s4265_s12  ;;  %p4512_p2 = pneg %p4818_p11 }
  0x3f   : > { %s4825_s16 = scalar_lea.hbm %s6597_s0, %s4266_s6  ;;  %s219_s23 = sshll.u32 %s211_s17, 4  ;;  %s4827_s23 = int_to_ptr.vmem [resolvable:$true] %s219_s23 }
  0x40   : > { %s4510_s29 = scalar_lea.hbm %s4825_s16, 192  ;;  %s4515_s9 = scalar_lea.hbm %s6597_s0, 384 }
  0x41   : > { %p4511_p10 = scmp.ne.s32.totalorder %s4825_s16, %s4510_s29  ;;  %p4516_p6 = scmp.lt.u32.totalorder %s4825_s16, %s6597_s0 }
  0x42   : > { %p4517_p8 = scmp.lt.u32.totalorder %s4515_s9, %s4510_s29  ;;  %p4519_p0 = scmp.lt.u32.totalorder %s4510_s29, %s4825_s16 }
  0x43   : > { %p4513_p1 = pnand %p4512_p2, %p4511_p10 }
  0x44   : > { %p4518_p13 = por %p4517_p8, %p4516_p6 }
  0x45   : > { %p4514_p4 = pneg %p4513_p1 }
  0x46   : > { %p4520_p3 = por %p4519_p0, %p4518_p13 }
  0x48   : > { %p4521_p5 = pnand %p4520_p3, %p4514_p4 }
  0x4a   : > { %4524 = shalt.err (!%p4521_p5)
}
  0x4b   : > { %s4525_s11 = scalar_lea.vmem %s4827_s23, 192  ;;  %s4620_s12 = smov [#allocation3]  }
  0x4c   : > { %p4526_p9 = scmp.ne.s32.totalorder %s4827_s23, %s4525_s11  ;;  %s4530_s15 = sshll.u32 %s4620_s12, 4  ;;  %s4531_s15 = int_to_ptr.vmem [resolvable:$false] %s4530_s15 }
  0x4d   : > { %s4532_s17 = scalar_lea.vmem %s4531_s15, 384  ;;  %p4533_p1 = scmp.lt.s32.totalorder %s4827_s23, %s4531_s15 }
  0x4e   : > { %p4528_p12 = pnand %p4526_p9, %p4512_p2  ;;  %p4534_p6 = scmp.lt.s32.totalorder %s4532_s17, %s4525_s11 }
  0x50   : > { %p4529_p10 = pneg %p4528_p12  ;;  %p4535_p8 = por %p4534_p6, %p4533_p1 }
  0x52   : > { %p4536_p13 = pnand %p4535_p8, %p4529_p10 }
  0x54   : > { %4539 = shalt.err (!%p4536_p13)
}
  0x55   : > { %4290 = dma.hbm_to_vmem [thread:$0]  (!%p4818_p11), %s4825_s16, 192, %s4827_s23, %s208_s27  }
  0x56   : > { %p6672_p4 = scmp.ne.s32.totalorder %s6667_s26, 0 }
  0x58   : > { %228 = sbr.rel (%p6672_p4) target bundleno = 3935 (0xf5f), region = 40 }
  0x5f   : > { %s4857_s29 = sand.u32 1, %s4606_s19   ;;  %p6673_p2 = scmp.ne.s32.totalorder %s6665_s24, 0 }
  0x60   : > { %s4267_s30 = smul.u32 12, %s4857_s29  ;;  %s231_s8 = scalar_lea.sflag [#allocation4], %s4857_s29 }
  0x62   : > { %s4861_s9 = scalar_lea.vmem [#allocation3], %s4267_s30 }
  0x63   : > { %4585 = dma.done.wait (%p6673_p2), %s231_s8, 192  }
  0x64   : > { %4587 = vsyncadd (%p6673_p2), %s231_s8, 4294967104  ;;  %p6674_p11 = scmp.eq.s32.totalorder %s4728_s22, 0 }
  0x66   : > { %4589 = dma.done.wait (%p6674_p11), [#allocation8], 512   ;;  %p6675_p0 = pmov %p6674_p11 }
  0x68   : > { %4591 = vsyncadd (%p6675_p0), [#allocation8], 4294966784  ;;  %p6676_p3 = pmov %p6675_p0 }
  0x69   : > { %p6677_p5 = pmov %p6675_p0 }
  0x6a   : > { %4593 = dma.done.wait (%p6676_p3), [#allocation6], 16  }
  0x6b   : > { %4595 = vsyncadd (%p6677_p5), [#allocation6], 4294967280 }
  0x6c   : > { %247 = sfence }
  0x6d   : > { %v290_v0 = vld [vmem:[%s6599_s2] sm:$0xf]  ;;  %v279_v2 = vlaneseq  ;;  %v6627_v3 = vmov 1   ;;  %v6626_v4 = vmov 0   ;;  %v6625_v9 = vmov 2   ;;  %s4625_s23 = smov 1  }
  0x6e   : > { %v270_v1 = vld [vmem:[%s6600_s3] sm:$0xf]  ;;  %4393 = vset.pattern.permute.xlu1 %v6627_v3  ;;  %4392 = vset.pattern.permute.xlu0 %v6626_v4  ;;  %v400_v6 = vld [vmem:[#allocation7 + $0x1] ss:$8 sm:$0x3]  ;;  %v6624_v13 = vmov 3  }
  0x6f   : > { %320 = vperm.xlu1 %4393, %v290_v0   ;;  %273 = vperm.xlu0 %4392, %v270_v1   ;;  %v4883_v5 = vshrl.u32 %v279_v2, 7  ;;  %v6622_v14 = vmov 4   ;;  %v420_v15 = vld [vmem:[%s6599_s2] sm:$0xf]  ;;  %v6623_v17 = vmov 8   ;;  %v6621_v18 = vmov 5  }
  0x70   : > { %v644_v16 = vld [vmem:[%s6599_s2] sm:$0xf]  ;;  %v6616_v20 = vmov 12   ;;  %v624_v21 = vld [vmem:[#allocation7 + $0x2] ss:$8 sm:$0x3] }
  0x71   : > { %v4886_v7 = vsub.s32 0, %v4883_v5  ;;  %v4889_v8 = vsub.s32 1, %v4883_v5  ;;  %v4908_v19 = vld [vmem:[%s6599_s2] sm:$0xf]  ;;  %v6620_v22 = vmov 6   ;;  %v6619_v25 = vmov 7  }
  0x72   : > { %s4632_s17 = smov 2   ;;  %v6618_v27 = vmov 9   ;;  %v848_v28 = vld [vmem:[#allocation7 + $0x3] ss:$8 sm:$0x3]  ;;  %v6615_v29 = vmov 10  }
  0x73   : > { %4394 = vset.pattern.permute.xlu1 %v6625_v9  ;;  %293 = vperm.xlu0 %4392, %v290_v0   ;;  %v405_v10 = vrot.slane %v400_v6, %v4886_v7  ;;  %v409_v11 = vrot.slane %v400_v6, %v4889_v8  ;;  %v629_v23 = vrot.slane %v624_v21, %v4886_v7  ;;  %v6614_v32 = vmov 11   ;;  %s4636_s30 = smov 16   ;;  %v4965_v56 = vld [vmem:[%s4861_s9] sm:$0xff]  ;;  %v4972_v59 = vld [vmem:[%s4861_s9 + $0x8] sm:$0xf]  ;;  %s4644_s8 = smov 111  }
  0x74   : > { %346 = vperm.xlu1 %4394, %v290_v0   ;;  %v633_v24 = vrot.slane %v624_v21, %v4889_v8  ;;  %v853_v30 = vrot.slane %v848_v28, %v4886_v7  ;;  %v857_v31 = vrot.slane %v848_v28, %v4889_v8  ;;  %v6613_v34 = vmov 13   ;;  %s4645_s26 = smov 127   ;;  %s4646_s13 = smov 126  }
  0x75   : > { %v410_v12 = vcombine.low %v405_v10, %v409_v11  ;;  %v6612_v35 = vmov 14   ;;  %v6611_v36 = vmov 15   ;;  %v6610_v37 = vmov 16   ;;  %s4647_s16 = smov 112   ;;  %s4649_s24 = smov 18  }
  0x76   : > { %v634_v26 = vcombine.low %v629_v23, %v633_v24  ;;  %v858_v33 = vcombine.low %v853_v30, %v857_v31  ;;  %v6607_v38 = vmov 17   ;;  %v6608_v39 = vmov 18   ;;  %s4651_s14 = smov 110   ;;  %s4655_s11 = smov 32  }
  0x77   : > { %4395 = vset.pattern.permute.xlu0 %v6624_v13  ;;  %v6606_v44 = vmov 19   ;;  %v4962_v55 = vsub.s32 4, %v4883_v5  ;;  %v1080_v58 = vrot.slane %v4965_v56, %v4886_v7  ;;  %v4977_v61 = vsub.s32 5, %v4883_v5  ;;  %s4667_s12 = smov 34   ;;  %s4669_s27 = smov 94  }
  0x78   : > { %411 = vrot.lane.b32.xlu1 %v410_v12, %s4625_s23  ;;  %372 = vperm.xlu0 %4395, %v290_v0   ;;  %vm414_vm0 = vcmask 7168   ;;  %v1088_v1 = vrot.slane %v4972_v59, %v4886_v7  ;;  %v4986_v6 = vsub.s32 6, %v4883_v5  ;;  %v1130_v21 = vrot.slane %v4965_v56, %v4889_v8  ;;  %s4673_s15 = smov 113   ;;  %s4675_s6 = smov 17  }
  0x79   : > { %4396 = vset.pattern.permute.xlu1 %v6622_v14  ;;  %6678 = vst [vmem:[#allocation15_spill] sm:$0xff] %v4962_v55  ;;  %v1084_v57 = vrot.slane %v4965_v56, %v4962_v55  ;;  %v1095_v0 = vrot.slane %v1080_v58, %v4886_v7  ;;  %v1134_v2 = vrot.slane %v4965_v56, %v4977_v61  ;;  %v5001_v28 = vsub.s32 2, %v4883_v5 }
  0x7a   : > { %vm638_vm1 = vcmask 15360   ;;  %vm862_vm2 = vcmask 130048   ;;  %vm1285_vm3 = vcmask 146432   ;;  %vm1509_vm4 = vcmask 261120  }
  0x7b   : > { %v1099_v63 = vrot.slane %v1084_v57, %v4886_v7  ;;  %v1149_v23 = vrot.slane %v1134_v2, %v4889_v8  ;;  %v398_v57 = vld [vmem:[%s4861_s9 + $0x8] sm:$0xf]  ;;  %vm1733_vm5 = vcmask 269312   ;;  %vm1957_vm6 = vcmask 277504  }
  0x7c   : > { %423 = vperm.xlu1 %4396, %v420_v15   ;;  %4400 = vset.pattern.permute.xlu0 %v6623_v17  ;;  %vm467_vm7 = vcmask 1039360   ;;  %vm691_vm8 = vcmask 1031168   ;;  %vm915_vm9 = vcmask 916480   ;;  %vm1116_vm10 = vcmask 908288  }
  0x7d   : > { %647 = vperm.xlu0 %4400, %v644_v16   ;;  %vm1338_vm11 = vcmask 900096   ;;  %vm1562_vm12 = vcmask 785408   ;;  %vm1786_vm13 = vcmask 777216   ;;  %vm2010_vm14 = vcmask 769024  }
  0x80   : > { %4397 = vset.pattern.permute.xlu1 %v6621_v18 }
  0x81   : > { %475 = vperm.xlu1 %4397, %v420_v15   ;;  %4404 = vset.pattern.permute.xlu0 %v6616_v20 }
  0x82   : > { %871 = vperm.xlu0 %4404, %v4908_v19  }
  0x85   : > { %4398 = vset.pattern.permute.xlu1 %v6620_v22 }
  0x86   : > { %524 = vperm.xlu1 %4398, %v420_v15  }
  0x8a   : > { %4399 = vset.pattern.permute.xlu1 %v6619_v25 }
  0x8b   : > { %573 = vperm.xlu1 %4399, %v420_v15  }
  0x8f   : > { %635 = vrot.lane.b32.xlu1 %v634_v26, %s4632_s17  ;;  %v1183_v26 = vrot.slane %v4965_v56, %v4986_v6  ;;  %s4657_s17 = smov 96  }
  0x90   : > { %4401 = vset.pattern.permute.xlu1 %v6618_v27 }
  0x93   : > { %699 = vperm.xlu1 %4401, %v644_v16  }
  0x97   : > { %4402 = vset.pattern.permute.xlu1 %v6615_v29 }
  0x98   : > { %748 = vperm.xlu1 %4402, %v644_v16  }
  0x9c   : > { %4403 = vset.pattern.permute.xlu1 %v6614_v32 }
  0x9d   : > { %797 = vperm.xlu1 %4403, %v644_v16   ;;  %v1103_v16 = vrot.slane %v1088_v1, %v4886_v7 }
  0xa1   : > { %859 = vrot.lane.b32.xlu1 %v858_v33, %s4636_s30  ;;  %v1145_v33 = vrot.slane %v1130_v21, %v4889_v8 }
  0xa2   : > { %4405 = vset.pattern.permute.xlu1 %v6613_v34 }
  0xa5   : > { %923 = vperm.xlu1 %4405, %v4908_v19  }
  0xa9   : > { %4406 = vset.pattern.permute.xlu1 %v6612_v35 }
  0xaa   : > { %972 = vperm.xlu1 %4406, %v4908_v19  }
  0xae   : > { %4407 = vset.pattern.permute.xlu1 %v6611_v36 }
  0xaf   : > { %1021 = vperm.xlu1 %4407, %v4908_v19  }
  0xb3   : > { %4408 = vset.pattern.permute.xlu1 %v6610_v37 }
  0xb4   : > { %1072 = vperm.xlu1 %4408, %v4908_v19  }
  0xb8   : > { %4409 = vset.pattern.permute.xlu1 %v6607_v38 }
  0xb9   : > { %1124 = vperm.xlu1 %4409, %v4908_v19  }
  0xbd   : > { %4410 = vset.pattern.permute.xlu1 %v6608_v39 }
  0xbe   : > { %1173 = vperm.xlu1 %4410, %v4908_v19  }
  0xc2   : > { %4411 = vset.pattern.permute.xlu1 %v6606_v44 }
  0xee   : > { %v4934_v40 = vpop.permute.xlu1 %320 }
  0xf3   : > { %v4936_v41 = vpop.permute.xlu1 %346 }
  0xf7   : > { %v412_v42 = vpop.permute.xlu1 %411 }
  0xf8   : > { %v413_v62 = vrot.slane %v412_v42, 4 }
  0xfa   : > { %v415_v10 = vsel %vm414_vm0, %v413_v62, %v412_v42  ;;  %v1138_v42 = vrot.slane %v4972_v59, %v4889_v8  ;;  %v419_v1 = vmul.f32 %v413_v62, %v398_v57 }
  0xfb   : > { %v4938_v43 = vpop.permute.xlu1 %423  ;;  %v4994_v24 = vmul.f32 %v415_v10, %v4965_v56 }
  0xfc   : > { %v1153_v10 = vrot.slane %v1138_v42, %v4889_v8 }
  0xfd   : > { %v485_v21 = vrot.slane %v4994_v24, %v4977_v61 }
  0xff   : > { %v500_v57 = vrot.slane %v485_v21, %v4889_v8 }
 0x100   : > { %v4941_v45 = vpop.permute.xlu1 %475 }
 0x105   : > { %v4943_v46 = vpop.permute.xlu1 %524 }
 0x10a   : > { %v4945_v47 = vpop.permute.xlu1 %573 }
 0x10e   : > { %v4947_v48 = vpop.permute.xlu1 %635 }
 0x112   : > { %v4949_v49 = vpop.permute.xlu1 %699 }
 0x117   : > { %v4951_v50 = vpop.permute.xlu1 %748 }
 0x11c   : > { %v4953_v51 = vpop.permute.xlu1 %797 }
 0x120   : > { %v4955_v52 = vpop.permute.xlu1 %859 }
 0x124   : > { %v4957_v53 = vpop.permute.xlu1 %923 }
 0x129   : > { %v4959_v54 = vpop.permute.xlu1 %972 }
 0x12e   : > { %v4974_v60 = vpop.permute.xlu1 %1021 }
 0x133   : > { %v1073_v11 = vpop.permute.xlu1 %1072 }
 0x134   : > { %v1105_v12 = vmul.f32 %v1099_v63, %v1073_v11  ;;  %v1104_v15 = vmul.f32 %v1095_v0, %v1073_v11  ;;  %v1106_v31 = vmul.f32 %v1103_v16, %v1073_v11  ;;  %v1198_v63 = vrot.slane %v1183_v26, %v5001_v28 }
 0x135   : > { %v435_v0 = vrot.slane %v4994_v24, %v4962_v55  ;;  %v1179_v11 = vrot.slane %v4965_v56, %v5001_v28 }
 0x136   : > { %1112 = vrot.lane.b32.xlu1 %v1105_v12, %s4644_s8  ;;  %1110 = vrot.lane.b32.xlu0 %v1104_v15, %s4644_s8 }
 0x137   : > { %v450_v16 = vrot.slane %v435_v0, %v4886_v7  ;;  %v1194_v26 = vrot.slane %v1179_v11, %v5001_v28  ;;  %v534_v0 = vrot.slane %v4994_v24, %v4986_v6 }
 0x138   : > { %v1125_v30 = vpop.permute.xlu1 %1124 }
 0x139   : > { %v1155_v58 = vmul.f32 %v1149_v23, %v1125_v30  ;;  %v1154_v2 = vmul.f32 %v1145_v33, %v1125_v30  ;;  %v637_v23 = vrot.slane %v4947_v48, 4  ;;  %v1156_v62 = vmul.f32 %v1153_v10, %v1125_v30  ;;  %v5026_v33 = vpop.permute.xlu0 %273 }
 0x13a   : > { %1114 = vrot.lane.b32.xlu0 %v1106_v31, %s4644_s8  ;;  %v439_v31 = vrot.slane %v419_v1, %v4886_v7  ;;  %v456_v42 = vmul.f32 %v450_v16, %v4938_v43  ;;  %v5039_v10 = vsub.s32 7, %v4883_v5  ;;  %v549_v21 = vrot.slane %v534_v0, %v5001_v28 }
 0x13b   : > { %1162 = vrot.lane.b32.xlu1 %v1155_v58, %s4644_s8  ;;  %v639_v58 = vsel %vm638_vm1, %v637_v23, %v4947_v48  ;;  %v506_v48 = vmul.f32 %v500_v57, %v4941_v45 }
 0x13c   : > { %v5042_v11 = vmul.f32 %v639_v58, %v4965_v56  ;;  %v555_v57 = vmul.f32 %v549_v21, %v4943_v46  ;;  %v538_v58 = vrot.slane %v419_v1, %v5001_v28 }
 0x13d   : > { %v5015_v12 = vpop.permute.xlu1 %1173 }
 0x13e   : > { %1160 = vrot.lane.b32.xlu0 %v1154_v2, %s4644_s8  ;;  %v1204_v15 = vmul.f32 %v1198_v63, %v5015_v12  ;;  %v1203_v30 = vmul.f32 %v1194_v26, %v5015_v12  ;;  %v454_v63 = vrot.slane %v439_v31, %v4886_v7  ;;  %v489_v2 = vrot.slane %v419_v1, %v4889_v8  ;;  %v622_v31 = vld [vmem:[%s4861_s9 + $0x8] sm:$0xf] }
 0x13f   : > { %v583_v26 = vrot.slane %v4994_v24, %v5039_v10  ;;  %v643_v0 = vmul.f32 %v637_v23, %v622_v31  ;;  %v553_v21 = vrot.slane %v538_v58, %v5001_v28  ;;  %v659_v38 = vrot.slane %v5042_v11, %v4962_v55 }
 0x140   : > { %1211 = vrot.lane.b32.xlu1 %v1204_v15, %s4644_s8  ;;  %v5046_v15 = vpop.permute.xlu0 %293  ;;  %v457_v16 = vmul.f32 %v454_v63, %v4938_v43  ;;  %v709_v58 = vrot.slane %v5042_v11, %v4977_v61 }
 0x142   : > { %1164 = vrot.lane.b32.xlu0 %v1156_v62, %s4644_s8  ;;  %v504_v62 = vrot.slane %v489_v2, %v4889_v8 }
 0x144   : > { %463 = vrot.lane.b32.xlu1 %v456_v42, %s4645_s26  ;;  %v5056_v42 = vsub.s32 3, %v4883_v5  ;;  %v5063_v63 = vpop.permute.xlu0 %372  ;;  %v507_v2 = vmul.f32 %v504_v62, %v4941_v45  ;;  %v556_v62 = vmul.f32 %v553_v21, %v4943_v46 }
 0x146   : > { %1209 = vrot.lane.b32.xlu0 %v1203_v30, %s4644_s8  ;;  %v655_v30 = vrot.slane %v5042_v11, %v4886_v7  ;;  %v587_v5 = vrot.slane %v419_v1, %v5056_v42 }
 0x148   : > { %513 = vrot.lane.b32.xlu1 %v506_v48, %s4645_s26  ;;  %v598_v48 = vrot.slane %v583_v26, %v5056_v42  ;;  %v670_v44 = vrot.slane %v655_v30, %v4886_v7  ;;  %v648_v23 = vpop.permute.xlu0 %647  ;;  %v663_v26 = vrot.slane %v643_v0, %v4886_v7  ;;  %v602_v31 = vrot.slane %v587_v5, %v5056_v42 }
 0x149   : > { %v861_v30 = vrot.slane %v4955_v52, 4 }
 0x14a   : > { %465 = vrot.lane.b32.xlu0 %v457_v16, %s4645_s26  ;;  %v604_v16 = vmul.f32 %v598_v48, %v4945_v47  ;;  %v679_v1 = vmul.f32 %v670_v44, %v648_v23  ;;  %v678_v48 = vrot.slane %v663_v26, %v4886_v7  ;;  %v713_v44 = vrot.slane %v643_v0, %v4889_v8 }
 0x14b   : > { %v863_v21 = vsel %vm862_vm2, %v861_v30, %v4955_v52  ;;  %v762_v26 = vrot.slane %v643_v0, %v5001_v28 }
 0x14c   : > { %562 = vrot.lane.b32.xlu1 %v555_v57, %s4645_s26  ;;  %v674_v57 = vrot.slane %v659_v38, %v4886_v7  ;;  %v724_v38 = vrot.slane %v709_v58, %v4889_v8  ;;  %v5099_v39 = vmul.f32 %v863_v21, %v4965_v56 }
 0x14e   : > { %515 = vrot.lane.b32.xlu0 %v507_v2, %s4645_s26  ;;  %v605_v2 = vmul.f32 %v602_v31, %v4945_v47  ;;  %v680_v5 = vmul.f32 %v674_v57, %v648_v23  ;;  %v846_v31 = vld [vmem:[%s4861_s9 + $0x8] sm:$0xf]  ;;  %v730_v57 = vmul.f32 %v724_v38, %v4949_v49  ;;  %v879_v38 = vrot.slane %v5099_v39, %v4886_v7 }
 0x150   : > { %611 = vrot.lane.b32.xlu1 %v604_v16, %s4645_s26  ;;  %v758_v16 = vrot.slane %v5042_v11, %v4986_v6 }
 0x152   : > { %564 = vrot.lane.b32.xlu0 %v556_v62, %s4645_s26  ;;  %v681_v62 = vmul.f32 %v678_v48, %v648_v23  ;;  %v773_v58 = vrot.slane %v758_v16, %v5001_v28  ;;  %v777_v23 = vrot.slane %v762_v26, %v5001_v28  ;;  %v807_v48 = vrot.slane %v5042_v11, %v5039_v10 }
 0x153   : > { %v894_v26 = vrot.slane %v879_v38, %v4886_v7 }
 0x154   : > { %685 = vrot.lane.b32.xlu1 %v679_v1, %s4646_s13  ;;  %v728_v1 = vrot.slane %v713_v44, %v4889_v8  ;;  %v779_v44 = vmul.f32 %v773_v58, %v4951_v50  ;;  %v822_v16 = vrot.slane %v807_v48, %v5056_v42 }
 0x156   : > { %613 = vrot.lane.b32.xlu0 %v605_v2, %s4645_s26  ;;  %v867_v2 = vmul.f32 %v861_v30, %v846_v31  ;;  %v731_v52 = vmul.f32 %v728_v1, %v4949_v49  ;;  %v780_v30 = vmul.f32 %v777_v23, %v4951_v50  ;;  %v872_v31 = vpop.permute.xlu0 %871 }
 0x157   : > { %v903_v23 = vmul.f32 %v894_v26, %v872_v31 }
 0x158   : > { %687 = vrot.lane.b32.xlu1 %v680_v5, %s4646_s13  ;;  %v811_v5 = vrot.slane %v643_v0, %v5056_v42  ;;  %v887_v21 = vrot.slane %v867_v2, %v4886_v7  ;;  %v883_v0 = vrot.slane %v5099_v39, %v4962_v55 }
 0x15a   : > { %689 = vrot.lane.b32.xlu0 %v681_v62, %s4646_s13  ;;  %v828_v62 = vmul.f32 %v822_v16, %v4953_v51  ;;  %v826_v1 = vrot.slane %v811_v5, %v5056_v42  ;;  %v902_v58 = vrot.slane %v887_v21, %v4886_v7  ;;  %v898_v48 = vrot.slane %v883_v0, %v4886_v7 }
 0x15c   : > { %737 = vrot.lane.b32.xlu1 %v730_v57, %s4646_s13  ;;  %v829_v57 = vmul.f32 %v826_v1, %v4953_v51  ;;  %v905_v5 = vmul.f32 %v902_v58, %v872_v31  ;;  %v904_v16 = vmul.f32 %v898_v48, %v872_v31  ;;  %v1035_v58 = vrot.slane %v867_v2, %v5056_v42 }
 0x15e   : > { %739 = vrot.lane.b32.xlu0 %v731_v52, %s4646_s13  ;;  %v937_v52 = vrot.slane %v867_v2, %v4889_v8 }
 0x160   : > { %786 = vrot.lane.b32.xlu1 %v779_v44, %s4646_s13  ;;  %v933_v44 = vrot.slane %v5099_v39, %v4977_v61  ;;  %v952_v38 = vrot.slane %v937_v52, %v4889_v8  ;;  %v1031_v52 = vrot.slane %v5099_v39, %v5039_v10 }
 0x162   : > { %788 = vrot.lane.b32.xlu0 %v780_v30, %s4646_s13  ;;  %v986_v30 = vrot.slane %v867_v2, %v5001_v28  ;;  %v948_v21 = vrot.slane %v933_v44, %v4889_v8  ;;  %v955_v1 = vmul.f32 %v952_v38, %v4957_v53  ;;  %v1050_v44 = vrot.slane %v1035_v58, %v5056_v42 }
 0x163   : > { %v705_v58 = vrot.slane %v5042_v11, %v4889_v8 }
 0x164   : > { %835 = vrot.lane.b32.xlu1 %v828_v62, %s4646_s13  ;;  %v982_v62 = vrot.slane %v5099_v39, %v4986_v6  ;;  %v1001_v26 = vrot.slane %v986_v30, %v5001_v28  ;;  %v954_v0 = vmul.f32 %v948_v21, %v4957_v53  ;;  %v1053_v2 = vmul.f32 %v1050_v44, %v4974_v60 }
 0x165   : > { %v481_v30 = vrot.slane %v4994_v24, %v4889_v8  ;;  %v929_v44 = vrot.slane %v5099_v39, %v4889_v8 }
 0x166   : > { %837 = vrot.lane.b32.xlu0 %v829_v57, %s4646_s13  ;;  %v997_v57 = vrot.slane %v982_v62, %v5001_v28  ;;  %v1004_v31 = vmul.f32 %v1001_v26, %v4959_v54 }
 0x167   : > { %v496_v62 = vrot.slane %v481_v30, %v4889_v8  ;;  %v1027_v30 = vrot.slane %v5099_v39, %v5056_v42 }
 0x168   : > { %909 = vrot.lane.b32.xlu1 %v903_v23, %s4647_s16  ;;  %v431_v23 = vrot.slane %v4994_v24, %v4886_v7  ;;  %v1003_v48 = vmul.f32 %v997_v57, %v4959_v54  ;;  %v579_v57 = vrot.slane %v4994_v24, %v5056_v42 }
 0x169   : > { %v505_v26 = vmul.f32 %v496_v62, %v4941_v45  ;;  %v720_v45 = vrot.slane %v705_v58, %v4889_v8 }
 0x16a   : > { %913 = vrot.lane.b32.xlu0 %v905_v5, %s4647_s16  ;;  %v1046_v5 = vrot.slane %v1031_v52, %v5056_v42  ;;  %v446_v38 = vrot.slane %v431_v23, %v4886_v7  ;;  %v754_v52 = vrot.slane %v5042_v11, %v5001_v28  ;;  %v6609_v23 = vmov 20  }
 0x16b   : > { %4412 = vset.pattern.permute.xlu0 %v6609_v23 }
 0x16c   : > { %911 = vrot.lane.b32.xlu1 %v904_v16, %s4647_s16  ;;  %v1052_v16 = vmul.f32 %v1046_v5, %v4974_v60  ;;  %v455_v21 = vmul.f32 %v446_v38, %v4938_v43  ;;  %v978_v38 = vrot.slane %v5099_v39, %v5001_v28 }
 0x16e   : > { %963 = vrot.lane.b32.xlu0 %v955_v1, %s4647_s16  ;;  %v530_v1 = vrot.slane %v4994_v24, %v5001_v28  ;;  %v769_v24 = vrot.slane %v754_v52, %v5001_v28 }
 0x170   : > { %961 = vrot.lane.b32.xlu1 %v954_v0, %s4647_s16  ;;  %v545_v0 = vrot.slane %v530_v1, %v5001_v28 }
 0x172   : > { %1012 = vrot.lane.b32.xlu0 %v1004_v31, %s4647_s16  ;;  %v554_v43 = vmul.f32 %v545_v0, %v4943_v46  ;;  %v594_v31 = vrot.slane %v579_v57, %v5056_v42  ;;  %v729_v46 = vmul.f32 %v720_v45, %v4949_v49  ;;  %v944_v49 = vrot.slane %v929_v44, %v4889_v8 }
 0x174   : > { %1010 = vrot.lane.b32.xlu1 %v1003_v48, %s4647_s16  ;;  %v803_v48 = vrot.slane %v5042_v11, %v5056_v42  ;;  %v953_v11 = vmul.f32 %v944_v49, %v4957_v53 }
 0x176   : > { %1061 = vrot.lane.b32.xlu0 %v1053_v2, %s4647_s16  ;;  %v818_v2 = vrot.slane %v803_v48, %v5056_v42 }
 0x178   : > { %1059 = vrot.lane.b32.xlu1 %v1052_v16, %s4647_s16  ;;  %v827_v5 = vmul.f32 %v818_v2, %v4953_v51  ;;  %v1187_v51 = vrot.slane %v4972_v59, %v5001_v28 }
 0x17a   : > { %461 = vrot.lane.b32.xlu0 %v455_v21, %s4645_s26  ;;  %v1042_v21 = vrot.slane %v1027_v30, %v5056_v42  ;;  %v1202_v53 = vrot.slane %v1187_v51, %v5001_v28 }
 0x17c   : > { %1222 = vperm.xlu1 %4411, %v4908_v19   ;;  %v603_v19 = vmul.f32 %v594_v31, %v4945_v47  ;;  %v778_v47 = vmul.f32 %v769_v24, %v4951_v50  ;;  %v993_v50 = vrot.slane %v978_v38, %v5001_v28  ;;  %v1051_v62 = vmul.f32 %v1042_v21, %v4974_v60 }
 0x17d   : > { %v1205_v1 = vmul.f32 %v1202_v53, %v5015_v12 }
 0x17e   : > { %511 = vrot.lane.b32.xlu0 %v505_v26, %s4645_s26  ;;  %v1002_v16 = vmul.f32 %v993_v50, %v4959_v54  ;;  %v1228_v50 = vrot.slane %v4965_v56, %v5056_v42 }
 0x180   : > { %v1243_v21 = vrot.slane %v1228_v50, %v5056_v42 }
 0x182   : > { %560 = vrot.lane.b32.xlu0 %v554_v43, %s4645_s26 }
 0x186   : > { %609 = vrot.lane.b32.xlu0 %v603_v19, %s4645_s26 }
 0x18a   : > { %735 = vrot.lane.b32.xlu0 %v729_v46, %s4646_s13 }
 0x18e   : > { %784 = vrot.lane.b32.xlu0 %v778_v47, %s4646_s13 }
 0x192   : > { %833 = vrot.lane.b32.xlu0 %v827_v5, %s4646_s13 }
 0x196   : > { %959 = vrot.lane.b32.xlu0 %v953_v11, %s4647_s16  ;;  %v1232_v11 = vrot.slane %v4965_v56, %v5039_v10 }
 0x198   : > { %v1247_v51 = vrot.slane %v1232_v11, %v5056_v42 }
 0x19a   : > { %1008 = vrot.lane.b32.xlu0 %v1002_v16, %s4647_s16  ;;  %v1271_v16 = vld [vmem:[#allocation7 + $0x5] ss:$8 sm:$0x3] }
 0x19b   : > { %v1280_v23 = vrot.slane %v1271_v16, %v4889_v8 }
 0x19e   : > { %1057 = vrot.lane.b32.xlu0 %v1051_v62, %s4647_s16  ;;  %v1236_v62 = vrot.slane %v4972_v59, %v5056_v42 }
 0x1a0   : > { %v1251_v34 = vrot.slane %v1236_v62, %v5056_v42 }
 0x1a2   : > { %1213 = vrot.lane.b32.xlu0 %v1205_v1, %s4644_s8  ;;  %v1276_v1 = vrot.slane %v1271_v16, %v4886_v7  ;;  %v5283_v16 = vld [vmem:[%s6599_s2] sm:$0xf] }
 0x1a4   : > { %v1281_v11 = vcombine.low %v1276_v1, %v1280_v23 }
 0x1a8   : > { %v5216_v39 = vpop.permute.xlu1 %1112  ;;  %v5238_v45 = vpop.permute.xlu0 %1110 }
 0x1a9   : > { %6679 = vst [vmem:[#allocation16_spill] sm:$0xff] %v5216_v39  ;;  %6682 = vst [vmem:[#allocation19_spill] sm:$0xff] %v5238_v45 }
 0x1ac   : > { %v5242_v46 = vpop.permute.xlu0 %1114 }
 0x1ad   : > { %v5218_v54 = vpop.permute.xlu1 %1162  ;;  %6683 = vst [vmem:[#allocation20_spill] sm:$0xff] %v5242_v46 }
 0x1ae   : > { %6680 = vst [vmem:[#allocation17_spill] sm:$0xff] %v5218_v54 }
 0x1b0   : > { %v5246_v48 = vpop.permute.xlu0 %1160 }
 0x1b1   : > { %6684 = vst [vmem:[#allocation21_spill] sm:$0xff] %v5246_v48 }
 0x1b2   : > { %v5220_v26 = vpop.permute.xlu1 %1211 }
 0x1b3   : > { %6681 = vst [vmem:[#allocation18_spill] sm:$0xff] %v5220_v26 }
 0x1b4   : > { %v5250_v44 = vpop.permute.xlu0 %1164 }
 0x1b5   : > { %6685 = vst [vmem:[#allocation22_spill] sm:$0xff] %v5250_v44 }
 0x1b6   : > { %v5222_v0 = vpop.permute.xlu1 %463 }
 0x1b8   : > { %v5254_v5 = vpop.permute.xlu0 %1209 }
 0x1b9   : > { %6686 = vst [vmem:[#allocation23_spill] sm:$0xff] %v5254_v5 }
 0x1ba   : > { %v5224_v57 = vpop.permute.xlu1 %513 }
 0x1bc   : > { %v5258_v38 = vpop.permute.xlu0 %465 }
 0x1be   : > { %v5226_v43 = vpop.permute.xlu1 %562 }
 0x1c0   : > { %v5270_v53 = vpop.permute.xlu0 %515 }
 0x1c2   : > { %v5228_v60 = vpop.permute.xlu1 %611 }
 0x1c4   : > { %v5277_v50 = vpop.permute.xlu0 %564 }
 0x1c6   : > { %v5230_v58 = vpop.permute.xlu1 %685 }
 0x1ca   : > { %v5232_v31 = vpop.permute.xlu1 %687 }
 0x1ce   : > { %v5234_v12 = vpop.permute.xlu1 %737 }
 0x1d2   : > { %v5236_v19 = vpop.permute.xlu1 %786 }
 0x1d6   : > { %v5240_v52 = vpop.permute.xlu1 %835 }
 0x1da   : > { %v5244_v24 = vpop.permute.xlu1 %909 }
 0x1de   : > { %v5248_v47 = vpop.permute.xlu1 %911 }
 0x1e2   : > { %v5252_v2 = vpop.permute.xlu1 %961 }
 0x1e6   : > { %v5256_v49 = vpop.permute.xlu1 %1010 }
 0x1ea   : > { %v5264_v30 = vpop.permute.xlu1 %1059 }
 0x1fb   : > { %v1223_v37 = vpop.permute.xlu1 %1222 }
 0x1fc   : > { %v1253_v36 = vmul.f32 %v1247_v51, %v1223_v37  ;;  %v1252_v35 = vmul.f32 %v1243_v21, %v1223_v37  ;;  %v1254_v32 = vmul.f32 %v1251_v34, %v1223_v37  ;;  %v5285_v51 = vpop.permute.xlu0 %613 }
 0x1fe   : > { %1260 = vrot.lane.b32.xlu1 %v1253_v36, %s4644_s8  ;;  %1258 = vrot.lane.b32.xlu0 %v1252_v35, %s4644_s8  ;;  %v6617_v35 = vmov 21  }
 0x1ff   : > { %4413 = vset.pattern.permute.xlu1 %v6617_v35 }
 0x200   : > { %v5288_v36 = vpop.permute.xlu0 %689 }
 0x202   : > { %1262 = vrot.lane.b32.xlu0 %v1254_v32, %s4644_s8  ;;  %1282 = vrot.lane.b32.xlu1 %v1281_v11, %s4649_s24  ;;  %s4661_s24 = smov 33  }
 0x204   : > { %v5291_v23 = vpop.permute.xlu0 %739 }
 0x206   : > { %1294 = vperm.xlu0 %4412, %v5283_v16  }
 0x208   : > { %v5293_v34 = vpop.permute.xlu0 %788 }
 0x20c   : > { %v5295_v32 = vpop.permute.xlu0 %837 }
 0x210   : > { %v5297_v37 = vpop.permute.xlu0 %913 }
 0x214   : > { %v5299_v21 = vpop.permute.xlu0 %963 }
 0x218   : > { %v5301_v62 = vpop.permute.xlu0 %1012 }
 0x21c   : > { %v5303_v1 = vpop.permute.xlu0 %1061 }
 0x21d   : > { %6687 = vst [vmem:[#allocation24_spill] sm:$0xff] %v5303_v1 }
 0x220   : > { %v5305_v11 = vpop.permute.xlu0 %461 }
 0x224   : > { %v5307_v29 = vpop.permute.xlu0 %511 }
 0x228   : > { %v5309_v20 = vpop.permute.xlu0 %560 }
 0x22c   : > { %v5311_v35 = vpop.permute.xlu0 %609 }
 0x230   : > { %v5313_v27 = vpop.permute.xlu0 %735 }
 0x234   : > { %v5315_v25 = vpop.permute.xlu0 %784 }
 0x238   : > { %v5317_v22 = vpop.permute.xlu0 %833 }
 0x23c   : > { %v5319_v18 = vpop.permute.xlu0 %959 }
 0x240   : > { %v5321_v14 = vpop.permute.xlu0 %1008 }
 0x244   : > { %v5325_v13 = vpop.permute.xlu0 %1057 }
 0x248   : > { %v5327_v3 = vpop.permute.xlu0 %1213 }
 0x249   : > { %6689 = vst [vmem:[#allocation26_spill] sm:$0xff] %v5327_v3 }
 0x270   : > { %v5323_v17 = vpop.permute.xlu1 %1260  ;;  %v5332_v26 = vpop.permute.xlu0 %1258 }
 0x271   : > { %6688 = vst [vmem:[#allocation25_spill] sm:$0xff] %v5323_v17  ;;  %6690 = vst [vmem:[#allocation27_spill] sm:$0xff] %v5332_v26 }
 0x274   : > { %v1283_v9 = vpop.permute.xlu1 %1282  ;;  %v5338_v54 = vpop.permute.xlu0 %1262 }
 0x275   : > { %v1284_v4 = vrot.slane %v1283_v9, 4  ;;  %6691 = vst [vmem:[#allocation28_spill] sm:$0xff] %v5338_v54 }
 0x277   : > { %v1286_v44 = vsel %vm1285_vm3, %v1284_v4, %v1283_v9  ;;  %v5330_v5 = vmul.f32 %v1284_v4, %v4972_v59  ;;  %vm2604_vm3 = vcmask 924672  }
 0x278   : > { %v1289_v46 = vmul.f32 %v1286_v44, %v4965_v56 }
 0x279   : > { %v1310_v48 = vrot.slane %v5330_v5, %v4886_v7 }
 0x27a   : > { %v1302_v17 = vrot.slane %v1289_v46, %v4886_v7  ;;  %v1306_v9 = vrot.slane %v1289_v46, %v4962_v55 }
 0x27b   : > { %v1325_v1 = vrot.slane %v1310_v48, %v4886_v7  ;;  %v6631_v48 = vmov 22  }
 0x27c   : > { %v1317_v45 = vrot.slane %v1302_v17, %v4886_v7  ;;  %v1321_v56 = vrot.slane %v1306_v9, %v4886_v7 }
 0x285   : > { %v1295_v3 = vpop.permute.xlu0 %1294 }
 0x286   : > { %v1328_v4 = vmul.f32 %v1325_v1, %v1295_v3  ;;  %v1326_v59 = vmul.f32 %v1317_v45, %v1295_v3  ;;  %v1327_v44 = vmul.f32 %v1321_v56, %v1295_v3  ;;  %v1356_v1 = vrot.slane %v1289_v46, %v4977_v61 }
 0x287   : > { %v1352_v45 = vrot.slane %v1289_v46, %v4889_v8  ;;  %v1360_v3 = vrot.slane %v5330_v5, %v4889_v8 }
 0x288   : > { %1336 = vrot.lane.b32.xlu0 %v1328_v4, %s4651_s14  ;;  %1332 = vrot.lane.b32.xlu1 %v1326_v59, %s4651_s14  ;;  %v1371_v4 = vrot.slane %v1356_v1, %v4889_v8  ;;  %v6633_v1 = vmov 23  }
 0x289   : > { %v1367_v9 = vrot.slane %v1352_v45, %v4889_v8  ;;  %v1405_v45 = vrot.slane %v1289_v46, %v4986_v6 }
 0x28c   : > { %1334 = vrot.lane.b32.xlu1 %v1327_v44, %s4651_s14 }
 0x290   : > { %1346 = vperm.xlu1 %4413, %v5283_v16  }
 0x294   : > { %4414 = vset.pattern.permute.xlu1 %v6631_v48  ;;  %v1375_v48 = vrot.slane %v1360_v3, %v4889_v8 }
 0x2fa   : > { %v5349_v17 = vpop.permute.xlu1 %1332 }
 0x2fb   : > { %6692 = vst [vmem:[#allocation29_spill] sm:$0xff] %v5349_v17 }
 0x2fe   : > { %v5353_v54 = vpop.permute.xlu1 %1334 }
 0x2ff   : > { %6693 = vst [vmem:[#allocation30_spill] sm:$0xff] %v5353_v54  ;;  %v1401_v54 = vrot.slane %v1289_v46, %v5001_v28 }
 0x30f   : > { %v1347_v59 = vpop.permute.xlu1 %1346 }
 0x310   : > { %v1377_v56 = vmul.f32 %v1371_v4, %v1347_v59  ;;  %v1376_v44 = vmul.f32 %v1367_v9, %v1347_v59  ;;  %v1378_v17 = vmul.f32 %v1375_v48, %v1347_v59  ;;  %v1420_v9 = vrot.slane %v1405_v45, %v5001_v28 }
 0x311   : > { %v1409_v48 = vrot.slane %v5330_v5, %v5001_v28  ;;  %v6635_v45 = vmov 24  }
 0x312   : > { %1384 = vrot.lane.b32.xlu1 %v1377_v56, %s4651_s14  ;;  %1382 = vrot.lane.b32.xlu0 %v1376_v44, %s4651_s14  ;;  %v1416_v56 = vrot.slane %v1401_v54, %v5001_v28  ;;  %v1454_v54 = vrot.slane %v1289_v46, %v5039_v10 }
 0x313   : > { %4416 = vset.pattern.permute.xlu0 %v6635_v45 }
 0x316   : > { %1395 = vperm.xlu1 %4414, %v5283_v16   ;;  %1386 = vrot.lane.b32.xlu0 %v1378_v17, %s4651_s14  ;;  %v1424_v17 = vrot.slane %v1409_v48, %v5001_v28  ;;  %v1469_v48 = vrot.slane %v1454_v54, %v5056_v42 }
 0x31a   : > { %4415 = vset.pattern.permute.xlu1 %v6633_v1 }
 0x384   : > { %v5367_v4 = vpop.permute.xlu1 %1384 }
 0x385   : > { %6694 = vst [vmem:[#allocation31_spill] sm:$0xff] %v5367_v4  ;;  %v1450_v4 = vrot.slane %v1289_v46, %v5056_v42 }
 0x395   : > { %v1396_v3 = vpop.permute.xlu1 %1395 }
 0x396   : > { %v1426_v59 = vmul.f32 %v1420_v9, %v1396_v3  ;;  %v1425_v44 = vmul.f32 %v1416_v56, %v1396_v3  ;;  %v1427_v1 = vmul.f32 %v1424_v17, %v1396_v3  ;;  %v1495_v56 = vld [vmem:[#allocation7 + $0x6] ss:$8 sm:$0x3]  ;;  %v1465_v3 = vrot.slane %v1450_v4, %v5056_v42 }
 0x397   : > { %v6637_v4 = vmov 25  }
 0x398   : > { %1433 = vrot.lane.b32.xlu1 %v1426_v59, %s4651_s14  ;;  %1431 = vrot.lane.b32.xlu0 %v1425_v44, %s4651_s14  ;;  %v1458_v59 = vrot.slane %v5330_v5, %v5056_v42  ;;  %v5396_v5 = vld [vmem:[%s6599_s2] sm:$0xf] }
 0x39a   : > { %v1473_v46 = vrot.slane %v1458_v59, %v5056_v42 }
 0x39c   : > { %1444 = vperm.xlu1 %4415, %v5283_v16   ;;  %1435 = vrot.lane.b32.xlu0 %v1427_v1, %s4651_s14  ;;  %v1500_v16 = vrot.slane %v1495_v56, %v4886_v7  ;;  %v1504_v1 = vrot.slane %v1495_v56, %v4889_v8 }
 0x3a0   : > { %4417 = vset.pattern.permute.xlu1 %v6637_v4 }
 0x40a   : > { %v5381_v9 = vpop.permute.xlu1 %1433 }
 0x40b   : > { %6695 = vst [vmem:[#allocation32_spill] sm:$0xff] %v5381_v9  ;;  %v1505_v9 = vcombine.low %v1500_v16, %v1504_v1  ;;  %v1493_v16 = vld [vmem:[%s4861_s9 + $0x8] sm:$0xf]  ;;  %v5414_v1 = vld [vmem:[%s4861_s9] sm:$0xff] }
 0x41b   : > { %v1445_v44 = vpop.permute.xlu1 %1444 }
 0x41c   : > { %v1475_v17 = vmul.f32 %v1469_v48, %v1445_v44  ;;  %v1474_v45 = vmul.f32 %v1465_v3, %v1445_v44  ;;  %v1476_v26 = vmul.f32 %v1473_v46, %v1445_v44 }
 0x41e   : > { %1482 = vrot.lane.b32.xlu1 %v1475_v17, %s4651_s14  ;;  %1480 = vrot.lane.b32.xlu0 %v1474_v45, %s4651_s14  ;;  %v5400_v45 = vpop.permute.xlu0 %1336 }
 0x41f   : > { %6696 = vst [vmem:[#allocation33_spill] sm:$0xff] %v5400_v45 }
 0x422   : > { %1484 = vrot.lane.b32.xlu0 %v1476_v26, %s4651_s14  ;;  %1506 = vrot.lane.b32.xlu1 %v1505_v9, %s4655_s11  ;;  %v5402_v54 = vpop.permute.xlu0 %1382  ;;  %s4663_s11 = smov 95  }
 0x423   : > { %6697 = vst [vmem:[#allocation34_spill] sm:$0xff] %v5402_v54 }
 0x426   : > { %1518 = vperm.xlu0 %4416, %v5396_v5   ;;  %v5404_v56 = vpop.permute.xlu0 %1386 }
 0x427   : > { %6698 = vst [vmem:[#allocation35_spill] sm:$0xff] %v5404_v56 }
 0x42a   : > { %v5408_v59 = vpop.permute.xlu0 %1431 }
 0x42b   : > { %6700 = vst [vmem:[#allocation37_spill] sm:$0xff] %v5408_v59 }
 0x42e   : > { %v5410_v3 = vpop.permute.xlu0 %1435 }
 0x42f   : > { %6701 = vst [vmem:[#allocation38_spill] sm:$0xff] %v5410_v3 }
 0x490   : > { %v5406_v26 = vpop.permute.xlu1 %1482  ;;  %v5418_v46 = vpop.permute.xlu0 %1480 }
 0x491   : > { %6699 = vst [vmem:[#allocation36_spill] sm:$0xff] %v5406_v26  ;;  %6702 = vst [vmem:[#allocation39_spill] sm:$0xff] %v5418_v46 }
 0x494   : > { %v1507_v9 = vpop.permute.xlu1 %1506  ;;  %v5424_v59 = vpop.permute.xlu0 %1484 }
 0x495   : > { %v1508_v48 = vrot.slane %v1507_v9, 4  ;;  %6703 = vst [vmem:[#allocation40_spill] sm:$0xff] %v5424_v59 }
 0x497   : > { %v1510_v44 = vsel %vm1509_vm4, %v1508_v48, %v1507_v9  ;;  %v5416_v17 = vmul.f32 %v1508_v48, %v1493_v16  ;;  %vm2173_vm4 = vcmask 134144  }
 0x498   : > { %v1513_v4 = vmul.f32 %v1510_v44, %v5414_v1 }
 0x499   : > { %v1534_v26 = vrot.slane %v5416_v17, %v4886_v7 }
 0x49a   : > { %v1526_v56 = vrot.slane %v1513_v4, %v4886_v7  ;;  %v1530_v54 = vrot.slane %v1513_v4, %v4962_v55 }
 0x49b   : > { %v1549_v45 = vrot.slane %v1534_v26, %v4886_v7  ;;  %v6639_v26 = vmov 26  }
 0x49c   : > { %v1541_v3 = vrot.slane %v1526_v56, %v4886_v7  ;;  %v1545_v44 = vrot.slane %v1530_v54, %v4886_v7 }
 0x4a5   : > { %v1519_v9 = vpop.permute.xlu0 %1518 }
 0x4a6   : > { %v1552_v48 = vmul.f32 %v1549_v45, %v1519_v9  ;;  %v1550_v16 = vmul.f32 %v1541_v3, %v1519_v9  ;;  %v1551_v46 = vmul.f32 %v1545_v44, %v1519_v9  ;;  %v1580_v45 = vrot.slane %v1513_v4, %v4977_v61 }
 0x4a7   : > { %v1576_v3 = vrot.slane %v1513_v4, %v4889_v8 }
 0x4a8   : > { %1560 = vrot.lane.b32.xlu0 %v1552_v48, %s4657_s17  ;;  %1556 = vrot.lane.b32.xlu1 %v1550_v16, %s4657_s17  ;;  %v1595_v48 = vrot.slane %v1580_v45, %v4889_v8  ;;  %v6641_v45 = vmov 27  }
 0x4a9   : > { %v1591_v54 = vrot.slane %v1576_v3, %v4889_v8  ;;  %v1629_v3 = vrot.slane %v1513_v4, %v4986_v6 }
 0x4ac   : > { %1558 = vrot.lane.b32.xlu1 %v1551_v46, %s4657_s17  ;;  %v1584_v46 = vrot.slane %v5416_v17, %v4889_v8 }
 0x4b0   : > { %1570 = vperm.xlu1 %4417, %v5396_v5  }
 0x4b4   : > { %4418 = vset.pattern.permute.xlu1 %v6639_v26  ;;  %v1599_v26 = vrot.slane %v1584_v46, %v4889_v8 }
 0x51a   : > { %v5435_v56 = vpop.permute.xlu1 %1556 }
 0x51b   : > { %6704 = vst [vmem:[#allocation41_spill] sm:$0xff] %v5435_v56 }
 0x51e   : > { %v5439_v59 = vpop.permute.xlu1 %1558 }
 0x51f   : > { %6705 = vst [vmem:[#allocation42_spill] sm:$0xff] %v5439_v59  ;;  %v1625_v59 = vrot.slane %v1513_v4, %v5001_v28 }
 0x52f   : > { %v1571_v9 = vpop.permute.xlu1 %1570 }
 0x530   : > { %v1601_v16 = vmul.f32 %v1595_v48, %v1571_v9  ;;  %v1600_v44 = vmul.f32 %v1591_v54, %v1571_v9  ;;  %v1602_v56 = vmul.f32 %v1599_v26, %v1571_v9  ;;  %v1644_v54 = vrot.slane %v1629_v3, %v5001_v28 }
 0x531   : > { %v1633_v26 = vrot.slane %v5416_v17, %v5001_v28  ;;  %v6643_v3 = vmov 28  }
 0x532   : > { %1608 = vrot.lane.b32.xlu1 %v1601_v16, %s4657_s17  ;;  %1606 = vrot.lane.b32.xlu0 %v1600_v44, %s4657_s17  ;;  %v1640_v16 = vrot.slane %v1625_v59, %v5001_v28  ;;  %v1674_v59 = vrot.slane %v1513_v4, %v5056_v42 }
 0x533   : > { %4420 = vset.pattern.permute.xlu0 %v6643_v3 }
 0x536   : > { %1619 = vperm.xlu1 %4418, %v5396_v5   ;;  %1610 = vrot.lane.b32.xlu0 %v1602_v56, %s4657_s17  ;;  %v1648_v56 = vrot.slane %v1633_v26, %v5001_v28  ;;  %v1689_v26 = vrot.slane %v1674_v59, %v5056_v42 }
 0x53a   : > { %4419 = vset.pattern.permute.xlu1 %v6641_v45 }
 0x5a4   : > { %v5453_v48 = vpop.permute.xlu1 %1608 }
 0x5a5   : > { %6706 = vst [vmem:[#allocation43_spill] sm:$0xff] %v5453_v48  ;;  %v1678_v48 = vrot.slane %v1513_v4, %v5039_v10 }
 0x5b5   : > { %v1620_v46 = vpop.permute.xlu1 %1619 }
 0x5b6   : > { %v1650_v9 = vmul.f32 %v1644_v54, %v1620_v46  ;;  %v1649_v44 = vmul.f32 %v1640_v16, %v1620_v46  ;;  %v1651_v45 = vmul.f32 %v1648_v56, %v1620_v46  ;;  %v1719_v16 = vld [vmem:[#allocation7 + $0x7] ss:$8 sm:$0x3]  ;;  %v1693_v46 = vrot.slane %v1678_v48, %v5056_v42 }
 0x5b7   : > { %v6646_v48 = vmov 29  }
 0x5b8   : > { %1657 = vrot.lane.b32.xlu1 %v1650_v9, %s4657_s17  ;;  %1655 = vrot.lane.b32.xlu0 %v1649_v44, %s4657_s17  ;;  %v1682_v9 = vrot.slane %v5416_v17, %v5056_v42  ;;  %v5482_v17 = vld [vmem:[%s6599_s2] sm:$0xf] }
 0x5ba   : > { %v1697_v39 = vrot.slane %v1682_v9, %v5056_v42 }
 0x5bc   : > { %1668 = vperm.xlu1 %4419, %v5396_v5   ;;  %1659 = vrot.lane.b32.xlu0 %v1651_v45, %s4657_s17  ;;  %v1724_v5 = vrot.slane %v1719_v16, %v4886_v7  ;;  %v1728_v45 = vrot.slane %v1719_v16, %v4889_v8 }
 0x5be   : > { %v1729_v4 = vcombine.low %v1724_v5, %v1728_v45  ;;  %v1717_v5 = vld [vmem:[%s4861_s9 + $0x8] sm:$0xf] }
 0x5c0   : > { %4421 = vset.pattern.permute.xlu1 %v6646_v48 }
 0x62a   : > { %v5467_v54 = vpop.permute.xlu1 %1657 }
 0x62b   : > { %6707 = vst [vmem:[#allocation44_spill] sm:$0xff] %v5467_v54 }
 0x63b   : > { %v1669_v44 = vpop.permute.xlu1 %1668 }
 0x63c   : > { %v1698_v56 = vmul.f32 %v1689_v26, %v1669_v44  ;;  %v1699_v3 = vmul.f32 %v1693_v46, %v1669_v44  ;;  %v1700_v54 = vmul.f32 %v1697_v39, %v1669_v44 }
 0x63e   : > { %1706 = vrot.lane.b32.xlu1 %v1699_v3, %s4657_s17  ;;  %1704 = vrot.lane.b32.xlu0 %v1698_v56, %s4657_s17  ;;  %v5486_v3 = vpop.permute.xlu0 %1560 }
 0x63f   : > { %6708 = vst [vmem:[#allocation45_spill] sm:$0xff] %v5486_v3 }
 0x642   : > { %1708 = vrot.lane.b32.xlu0 %v1700_v54, %s4657_s17  ;;  %1730 = vrot.lane.b32.xlu1 %v1729_v4, %s4661_s24  ;;  %v5488_v59 = vpop.permute.xlu0 %1606  ;;  %s4142_s24 = scalar_lea.sflag [#allocation5], %s4857_s29 }
 0x643   : > { %6709 = vst [vmem:[#allocation46_spill] sm:$0xff] %v5488_v59 }
 0x646   : > { %1742 = vperm.xlu0 %4420, %v5482_v17   ;;  %v5490_v39 = vpop.permute.xlu0 %1610 }
 0x647   : > { %6710 = vst [vmem:[#allocation47_spill] sm:$0xff] %v5490_v39 }
 0x64a   : > { %v5494_v16 = vpop.permute.xlu0 %1655 }
 0x64b   : > { %6712 = vst [vmem:[#allocation49_spill] sm:$0xff] %v5494_v16 }
 0x64e   : > { %v5496_v46 = vpop.permute.xlu0 %1659 }
 0x64f   : > { %6713 = vst [vmem:[#allocation50_spill] sm:$0xff] %v5496_v46 }
 0x6b0   : > { %v5492_v54 = vpop.permute.xlu1 %1706  ;;  %v5501_v56 = vpop.permute.xlu0 %1704 }
 0x6b1   : > { %6711 = vst [vmem:[#allocation48_spill] sm:$0xff] %v5492_v54  ;;  %6714 = vst [vmem:[#allocation51_spill] sm:$0xff] %v5501_v56 }
 0x6b4   : > { %v1731_v9 = vpop.permute.xlu1 %1730  ;;  %v5507_v39 = vpop.permute.xlu0 %1708 }
 0x6b5   : > { %v1732_v26 = vrot.slane %v1731_v9, 4  ;;  %6715 = vst [vmem:[#allocation52_spill] sm:$0xff] %v5507_v39 }
 0x6b7   : > { %v1734_v45 = vsel %vm1733_vm5, %v1732_v26, %v1731_v9  ;;  %v5499_v44 = vmul.f32 %v1732_v26, %v1717_v5 }
 0x6b8   : > { %v1737_v4 = vmul.f32 %v1734_v45, %v5414_v1 }
 0x6b9   : > { %v1758_v48 = vrot.slane %v5499_v44, %v4886_v7 }
 0x6ba   : > { %v1750_v54 = vrot.slane %v1737_v4, %v4886_v7  ;;  %v1754_v3 = vrot.slane %v1737_v4, %v4962_v55 }
 0x6bb   : > { %v1773_v16 = vrot.slane %v1758_v48, %v4886_v7  ;;  %v6648_v48 = vmov 30  }
 0x6bc   : > { %v1765_v46 = vrot.slane %v1750_v54, %v4886_v7  ;;  %v1769_v56 = vrot.slane %v1754_v3, %v4886_v7  ;;  %v1800_v54 = vrot.slane %v1737_v4, %v4889_v8 }
 0x6c5   : > { %v1743_v9 = vpop.permute.xlu0 %1742 }
 0x6c6   : > { %v1774_v26 = vmul.f32 %v1765_v46, %v1743_v9  ;;  %v1776_v5 = vmul.f32 %v1773_v16, %v1743_v9  ;;  %v1775_v45 = vmul.f32 %v1769_v56, %v1743_v9  ;;  %v1804_v16 = vrot.slane %v1737_v4, %v4977_v61 }
 0x6c7   : > { %v1808_v46 = vrot.slane %v5499_v44, %v4889_v8  ;;  %v1815_v56 = vrot.slane %v1800_v54, %v4889_v8  ;;  %v1849_v54 = vrot.slane %v1737_v4, %v5001_v28 }
 0x6c8   : > { %1784 = vrot.lane.b32.xlu0 %v1776_v5, %s4663_s11  ;;  %1780 = vrot.lane.b32.xlu1 %v1774_v26, %s4663_s11  ;;  %v1819_v9 = vrot.slane %v1804_v16, %v4889_v8  ;;  %v1853_v16 = vrot.slane %v1737_v4, %v4986_v6 }
 0x6cc   : > { %1782 = vrot.lane.b32.xlu1 %v1775_v45, %s4663_s11 }
 0x6d0   : > { %1794 = vperm.xlu1 %4421, %v5482_v17  }
 0x6d4   : > { %4422 = vset.pattern.permute.xlu1 %v6648_v48  ;;  %v1823_v48 = vrot.slane %v1808_v46, %v4889_v8  ;;  %v1857_v46 = vrot.slane %v5499_v44, %v5001_v28 }
 0x73a   : > { %v5518_v39 = vpop.permute.xlu1 %1780 }
 0x73b   : > { %6716 = vst [vmem:[#allocation53_spill] sm:$0xff] %v5518_v39 }
 0x73e   : > { %v5522_v3 = vpop.permute.xlu1 %1782 }
 0x73f   : > { %6717 = vst [vmem:[#allocation54_spill] sm:$0xff] %v5522_v3  ;;  %v6650_v3 = vmov 31  }
 0x74f   : > { %v1795_v26 = vpop.permute.xlu1 %1794 }
 0x750   : > { %v1824_v5 = vmul.f32 %v1815_v56, %v1795_v26  ;;  %v1825_v45 = vmul.f32 %v1819_v9, %v1795_v26  ;;  %v1826_v39 = vmul.f32 %v1823_v48, %v1795_v26  ;;  %v1864_v9 = vrot.slane %v1849_v54, %v5001_v28 }
 0x751   : > { %v1868_v48 = vrot.slane %v1853_v16, %v5001_v28  ;;  %v1898_v54 = vrot.slane %v1737_v4, %v5056_v42  ;;  %v1902_v16 = vrot.slane %v1737_v4, %v5039_v10 }
 0x752   : > { %1832 = vrot.lane.b32.xlu1 %v1825_v45, %s4663_s11  ;;  %1830 = vrot.lane.b32.xlu0 %v1824_v5, %s4663_s11 }
 0x756   : > { %1843 = vperm.xlu1 %4422, %v5482_v17   ;;  %1834 = vrot.lane.b32.xlu0 %v1826_v39, %s4663_s11  ;;  %v1872_v39 = vrot.slane %v1857_v46, %v5001_v28  ;;  %v1906_v46 = vrot.slane %v5499_v44, %v5056_v42  ;;  %v5565_v44 = vld [vmem:[%s6599_s2] sm:$0xf] }
 0x758   : > { %v1921_v59 = vrot.slane %v1906_v46, %v5056_v42 }
 0x75a   : > { %4423 = vset.pattern.permute.xlu1 %v6650_v3 }
 0x7c4   : > { %v5536_v56 = vpop.permute.xlu1 %1832 }
 0x7c5   : > { %6718 = vst [vmem:[#allocation55_spill] sm:$0xff] %v5536_v56  ;;  %v6652_v56 = vmov 32  }
 0x7c6   : > { %4424 = vset.pattern.permute.xlu0 %v6652_v56 }
 0x7d5   : > { %v1844_v26 = vpop.permute.xlu1 %1843 }
 0x7d6   : > { %v1873_v5 = vmul.f32 %v1864_v9, %v1844_v26  ;;  %v1874_v45 = vmul.f32 %v1868_v48, %v1844_v26  ;;  %v1875_v3 = vmul.f32 %v1872_v39, %v1844_v26  ;;  %v1943_v48 = vld [vmem:[#allocation7 + $0x10] ss:$8 sm:$0x3]  ;;  %v1917_v26 = vrot.slane %v1902_v16, %v5056_v42 }
 0x7d7   : > { %v6654_v16 = vmov 33  }
 0x7d8   : > { %1881 = vrot.lane.b32.xlu1 %v1874_v45, %s4663_s11  ;;  %1879 = vrot.lane.b32.xlu0 %v1873_v5, %s4663_s11  ;;  %v1913_v5 = vrot.slane %v1898_v54, %v5056_v42  ;;  %v6720_v54 = vmov 1  }
 0x7dc   : > { %1892 = vperm.xlu1 %4423, %v5482_v17   ;;  %1883 = vrot.lane.b32.xlu0 %v1875_v3, %s4663_s11  ;;  %v1948_v17 = vrot.slane %v1943_v48, %v4886_v7  ;;  %v1952_v3 = vrot.slane %v1943_v48, %v4889_v8 }
 0x7de   : > { %v1953_v4 = vcombine.low %v1948_v17, %v1952_v3  ;;  %v1941_v3 = vld [vmem:[%s4861_s9 + $0x8] sm:$0xf] }
 0x7e0   : > { %4425 = vset.pattern.permute.xlu1 %v6654_v16 }
 0x84a   : > { %v5550_v9 = vpop.permute.xlu1 %1881 }
 0x84b   : > { %6719 = vst [vmem:[#allocation56_spill] sm:$0xff] %v5550_v9 }
 0x85b   : > { %v1893_v45 = vpop.permute.xlu1 %1892 }
 0x85c   : > { %v1922_v39 = vmul.f32 %v1913_v5, %v1893_v45  ;;  %v1923_v56 = vmul.f32 %v1917_v26, %v1893_v45  ;;  %v1924_v9 = vmul.f32 %v1921_v59, %v1893_v45 }
 0x85e   : > { %1930 = vrot.lane.b32.xlu1 %v1923_v56, %s4663_s11  ;;  %1928 = vrot.lane.b32.xlu0 %v1922_v39, %s4663_s11  ;;  %v5570_v56 = vpop.permute.xlu0 %1784 }
 0x85f   : > { %6721 = vst [vmem:[#allocation57_spill] sm:$0xff] %v5570_v56 }
 0x862   : > { %1932 = vrot.lane.b32.xlu0 %v1924_v9, %s4663_s11  ;;  %1954 = vrot.lane.b32.xlu1 %v1953_v4, %s4667_s12  ;;  %v5572_v59 = vpop.permute.xlu0 %1830  ;;  %s2164_s12 = sld [smem:[#allocation9]] }
 0x863   : > { %6722 = vst [vmem:[#allocation58_spill] sm:$0xff] %v5572_v59  ;;  %v6739_v59 = vmov 6  }
 0x866   : > { %1966 = vperm.xlu0 %4424, %v5565_v44   ;;  %v5574_v9 = vpop.permute.xlu0 %1834 }
 0x867   : > { %6723 = vst [vmem:[#allocation59_spill] sm:$0xff] %v5574_v9 }
 0x86a   : > { %4429 = vset.pattern.permute.xlu0 %v6720_v54  ;;  %v5578_v46 = vpop.permute.xlu0 %1879 }
 0x86b   : > { %6725 = vst [vmem:[#allocation61_spill] sm:$0xff] %v5578_v46 }
 0x86e   : > { %v5580_v17 = vpop.permute.xlu0 %1883 }
 0x86f   : > { %6726 = vst [vmem:[#allocation62_spill] sm:$0xff] %v5580_v17 }
 0x8d0   : > { %v5576_v48 = vpop.permute.xlu1 %1930  ;;  %v5585_v4 = vpop.permute.xlu0 %1928 }
 0x8d1   : > { %6724 = vst [vmem:[#allocation60_spill] sm:$0xff] %v5576_v48  ;;  %6727 = vst [vmem:[#allocation63_spill] sm:$0xff] %v5585_v4 }
 0x8d4   : > { %v1955_v5 = vpop.permute.xlu1 %1954  ;;  %v5591_v9 = vpop.permute.xlu0 %1932 }
 0x8d5   : > { %v1956_v26 = vrot.slane %v1955_v5, 4  ;;  %6728 = vst [vmem:[#allocation64_spill] sm:$0xff] %v5591_v9 }
 0x8d7   : > { %v1958_v45 = vsel %vm1957_vm6, %v1956_v26, %v1955_v5  ;;  %v5583_v39 = vmul.f32 %v1956_v26, %v1941_v3 }
 0x8d8   : > { %v1961_v54 = vmul.f32 %v1958_v45, %v5414_v1 }
 0x8d9   : > { %v1982_v16 = vrot.slane %v5583_v39, %v4886_v7 }
 0x8da   : > { %v1974_v48 = vrot.slane %v1961_v54, %v4886_v7  ;;  %v1978_v56 = vrot.slane %v1961_v54, %v4962_v55 }
 0x8db   : > { %v1997_v46 = vrot.slane %v1982_v16, %v4886_v7  ;;  %v6656_v16 = vmov 34  }
 0x8dc   : > { %v1989_v17 = vrot.slane %v1974_v48, %v4886_v7  ;;  %v1993_v4 = vrot.slane %v1978_v56, %v4886_v7  ;;  %v2024_v48 = vrot.slane %v1961_v54, %v4889_v8 }
 0x8e5   : > { %v1967_v5 = vpop.permute.xlu0 %1966 }
 0x8e6   : > { %v1998_v26 = vmul.f32 %v1989_v17, %v1967_v5  ;;  %v2000_v3 = vmul.f32 %v1997_v46, %v1967_v5  ;;  %v1999_v1 = vmul.f32 %v1993_v4, %v1967_v5  ;;  %v2028_v46 = vrot.slane %v1961_v54, %v4977_v61 }
 0x8e7   : > { %v2032_v17 = vrot.slane %v5583_v39, %v4889_v8  ;;  %v2039_v4 = vrot.slane %v2024_v48, %v4889_v8  ;;  %v2073_v48 = vrot.slane %v1961_v54, %v5001_v28 }
 0x8e8   : > { %2008 = vrot.lane.b32.xlu0 %v2000_v3, %s4669_s27  ;;  %2004 = vrot.lane.b32.xlu1 %v1998_v26, %s4669_s27  ;;  %v2043_v5 = vrot.slane %v2028_v46, %v4889_v8  ;;  %v2077_v46 = vrot.slane %v1961_v54, %v4986_v6 }
 0x8ec   : > { %2006 = vrot.lane.b32.xlu1 %v1999_v1, %s4669_s27 }
 0x8f0   : > { %2018 = vperm.xlu1 %4425, %v5565_v44  }
 0x8f4   : > { %4426 = vset.pattern.permute.xlu1 %v6656_v16  ;;  %v2047_v16 = vrot.slane %v2032_v17, %v4889_v8  ;;  %v2081_v17 = vrot.slane %v5583_v39, %v5001_v28 }
 0x95a   : > { %v5602_v45 = vpop.permute.xlu1 %2004 }
 0x95b   : > { %6729 = vst [vmem:[#allocation65_spill] sm:$0xff] %v5602_v45  ;;  %v6657_v45 = vmov 35  }
 0x95e   : > { %v5606_v56 = vpop.permute.xlu1 %2006 }
 0x95f   : > { %6730 = vst [vmem:[#allocation66_spill] sm:$0xff] %v5606_v56 }
 0x96f   : > { %v2019_v26 = vpop.permute.xlu1 %2018 }
 0x970   : > { %v2048_v3 = vmul.f32 %v2039_v4, %v2019_v26  ;;  %v2049_v1 = vmul.f32 %v2043_v5, %v2019_v26  ;;  %v2050_v9 = vmul.f32 %v2047_v16, %v2019_v26  ;;  %v2088_v5 = vrot.slane %v2073_v48, %v5001_v28 }
 0x971   : > { %v2092_v16 = vrot.slane %v2077_v46, %v5001_v28  ;;  %v2122_v48 = vrot.slane %v1961_v54, %v5056_v42  ;;  %v2126_v46 = vrot.slane %v1961_v54, %v5039_v10 }
 0x972   : > { %2056 = vrot.lane.b32.xlu1 %v2049_v1, %s4669_s27  ;;  %2054 = vrot.lane.b32.xlu0 %v2048_v3, %s4669_s27 }
 0x976   : > { %2067 = vperm.xlu1 %4426, %v5565_v44   ;;  %2058 = vrot.lane.b32.xlu0 %v2050_v9, %s4669_s27  ;;  %v2096_v9 = vrot.slane %v2081_v17, %v5001_v28  ;;  %v2130_v17 = vrot.slane %v5583_v39, %v5056_v42  ;;  %v277_v39 = vld [vmem:[#allocation7] ss:$8 sm:$0x3] }
 0x97a   : > { %4427 = vset.pattern.permute.xlu1 %v6657_v45 }
 0x9e4   : > { %v5620_v4 = vpop.permute.xlu1 %2056 }
 0x9e5   : > { %6731 = vst [vmem:[#allocation67_spill] sm:$0xff] %v5620_v4  ;;  %v6732_v4 = vmov 0  }
 0x9f5   : > { %v2068_v26 = vpop.permute.xlu1 %2067 }
 0x9f6   : > { %v2097_v3 = vmul.f32 %v2088_v5, %v2068_v26  ;;  %v2098_v1 = vmul.f32 %v2092_v16, %v2068_v26  ;;  %v2099_v45 = vmul.f32 %v2096_v9, %v2068_v26  ;;  %v2137_v5 = vrot.slane %v2122_v48, %v5056_v42  ;;  %v2180_v48 = vld [vmem:[%s6600_s3 + $0x4] sm:$0xf] }
 0x9f7   : > { %v2141_v16 = vrot.slane %v2126_v46, %v5056_v42  ;;  %v6661_v9 = vmov 0.0  }
 0x9f8   : > { %2105 = vrot.lane.b32.xlu1 %v2098_v1, %s4669_s27  ;;  %2103 = vrot.lane.b32.xlu0 %v2097_v3, %s4669_s27  ;;  %v2188_v3 = vld [vmem:[#allocation7] ss:$8 sm:$0x3]  ;;  %2172 = vst [vmem:[#allocation2] sm:$0xf] %v6661_v9 }
 0x9f9   : > { %v2193_v54 = vrot.slane %v2188_v3, %v4886_v7 }
 0x9fc   : > { %2116 = vperm.xlu1 %4427, %v5565_v44   ;;  %2107 = vrot.lane.b32.xlu0 %v2099_v45, %s4669_s27  ;;  %v2145_v45 = vrot.slane %v2130_v17, %v5056_v42  ;;  %v282_v17 = vrot.slane %v277_v39, %v4886_v7 }
 0xa00   : > { %4428 = vset.pattern.permute.xlu1 %v6732_v4  ;;  %v2197_v4 = vrot.slane %v2188_v3, %v4889_v8  ;;  %v2207_v3 = vld [vmem:[%s6599_s2 + $0x4] sm:$0xf] }
 0xa6a   : > { %v5634_v56 = vpop.permute.xlu1 %2105 }
 0xa6b   : > { %6733 = vst [vmem:[#allocation68_spill] sm:$0xff] %v5634_v56 }
 0xa7b   : > { %v2117_v26 = vpop.permute.xlu1 %2116 }
 0xa7c   : > { %v2146_v44 = vmul.f32 %v2137_v5, %v2117_v26  ;;  %v2147_v1 = vmul.f32 %v2141_v16, %v2117_v26  ;;  %v2148_v46 = vmul.f32 %v2145_v45, %v2117_v26  ;;  %v286_v5 = vrot.slane %v277_v39, %v4889_v8  ;;  %v4465_v45 = vld [vmem:[%s4861_s9] sm:$0xff] }
 0xa7d   : > { %v2198_v16 = vcombine.low %v2193_v54, %v2197_v4  ;;  %v6734_v39 = vmov 2   ;;  %v6735_v4 = vmov 3  }
 0xa7e   : > { %2154 = vrot.lane.b32.xlu1 %v2147_v1, %s4669_s27  ;;  %2152 = vrot.lane.b32.xlu0 %v2146_v44, %s4669_s27  ;;  %v2361_v44 = vld [vmem:[#allocation7 + $0x1] ss:$8 sm:$0x3]  ;;  %v287_v1 = vcombine.low %v282_v17, %v286_v5 }
 0xa7f   : > { %v2366_v9 = vrot.slane %v2361_v44, %v4886_v7  ;;  %v2370_v26 = vrot.slane %v2361_v44, %v4889_v8  ;;  %v6737_v44 = vmov 4  }
 0xa80   : > { %v289_v56 = vmul.f32 %v4465_v45, %v287_v1 }
 0xa82   : > { %2183 = vperm.xlu1 %4428, %v2180_v48   ;;  %2156 = vrot.lane.b32.xlu0 %v2148_v46, %s4669_s27  ;;  %v2371_v48 = vcombine.low %v2366_v9, %v2370_v26  ;;  %v300_v54 = vrot.slane %v289_v56, %v4886_v7  ;;  %v6736_v46 = vmov 8   ;;  %v326_v5 = vrot.slane %v289_v56, %v4889_v8 }
 0xa83   : > { %v352_v26 = vrot.slane %v289_v56, %v5001_v28 }
 0xa84   : > { %v310_v17 = vrot.slane %v300_v54, %v4886_v7  ;;  %v336_v1 = vrot.slane %v326_v5, %v4889_v8  ;;  %v304_v54 = vrot.slane %v289_v56, %v4962_v55 }
 0xa86   : > { %2210 = vperm.xlu1 %4428, %v2207_v3   ;;  %2199 = vrot.lane.b32.xlu0 %v2198_v16, %s4644_s8  ;;  %v2380_v16 = vld [vmem:[%s6599_s2 + $0x4] sm:$0xf]  ;;  %v315_v9 = vmul.f32 %v310_v17, %v5046_v15  ;;  %v314_v5 = vrot.slane %v304_v54, %v4886_v7  ;;  %v517_v54 = vsel %vm467_vm7, %v5307_v29, %v5224_v57 }
 0xa87   : > { %v615_v29 = vsel %vm467_vm7, %v5311_v35, %v5228_v60  ;;  %v469_v35 = vsel %vm467_vm7, %v5222_v0, %v5258_v38 }
 0xa88   : > { %v317_v45 = vadd.f32 %v315_v9, %v5026_v33  ;;  %v330_v9 = vrot.slane %v289_v56, %v4977_v61  ;;  %v316_v55 = vmul.f32 %v314_v5, %v5046_v15  ;;  %v382_v15 = vrot.slane %v289_v56, %v5039_v10 }
 0xa8a   : > { %4430 = vset.pattern.permute.xlu1 %v6734_v39  ;;  %2249 = vperm.xlu0 %4429, %v2207_v3   ;;  %v378_v39 = vrot.slane %v289_v56, %v5056_v42 }
 0xa8b   : > { %2286 = vperm.xlu1 %4430, %v2207_v3  }
 0xa8c   : > { %v388_v17 = vrot.slane %v378_v39, %v5056_v42  ;;  %v340_v39 = vrot.slane %v330_v9, %v4889_v8  ;;  %v6741_v9 = vmov 9  }
 0xa8e   : > { %2372 = vrot.lane.b32.xlu0 %v2371_v48, %s4647_s16  ;;  %v341_v48 = vmul.f32 %v336_v1, %v4934_v40  ;;  %v393_v1 = vmul.f32 %v388_v17, %v5063_v63  ;;  %v342_v17 = vmul.f32 %v340_v39, %v4934_v40 }
 0xa8f   : > { %4431 = vset.pattern.permute.xlu1 %v6735_v4  ;;  %4436 = vset.pattern.permute.xlu0 %v6736_v46  ;;  %v362_v4 = vrot.slane %v352_v26, %v5001_v28  ;;  %v468_v26 = vsel %vm467_vm7, %v5305_v11, %v5222_v0  ;;  %v566_v11 = vsel %vm467_vm7, %v5309_v20, %v5226_v43 }
 0xa90   : > { %2323 = vperm.xlu1 %4431, %v2207_v3   ;;  %v6738_v3 = vmov 5   ;;  %v343_v46 = vadd.f32 %v341_v48, %v317_v45  ;;  %v6740_v45 = vmov 7   ;;  %v356_v48 = vrot.slane %v289_v56, %v4986_v6 }
 0xa91   : > { %v839_v0 = vsel %vm691_vm8, %v5317_v22, %v5240_v52  ;;  %v916_v22 = vsel %vm915_vm9, %v5244_v24, %v5248_v47 }
 0xa92   : > { %v366_v5 = vrot.slane %v356_v48, %v5001_v28 }
 0xa94   : > { %4432 = vset.pattern.permute.xlu1 %v6737_v44  ;;  %v367_v44 = vmul.f32 %v362_v4, %v4936_v41  ;;  %v318_v4 = vadd.f32 %v316_v55, %v5026_v33  ;;  %v392_v55 = vrot.slane %v382_v15, %v5056_v42  ;;  %v368_v56 = vmul.f32 %v366_v5, %v4936_v41  ;;  %v6742_v5 = vld [vmem:[#allocation16_spill] sm:$0xff] }
 0xa95   : > { %2383 = vperm.xlu1 %4432, %v2380_v16   ;;  %v518_v41 = vsel %vm467_vm7, %v5224_v57, %v5270_v53  ;;  %v616_v57 = vsel %vm467_vm7, %v5228_v60, %v5285_v51  ;;  %v791_v60 = vsel %vm691_vm8, %v5236_v19, %v5293_v34  ;;  %v965_v51 = vsel %vm915_vm9, %v5319_v18, %v5252_v2 }
 0xa96   : > { %v394_v40 = vmul.f32 %v392_v55, %v5063_v63  ;;  %v790_v63 = vsel %vm691_vm8, %v5315_v25, %v5236_v19  ;;  %v693_v25 = vsel %vm691_vm8, %v5232_v31, %v5288_v36  ;;  %v840_v36 = vsel %vm691_vm8, %v5240_v52, %v5295_v32 }
 0xa97   : > { %v1063_v19 = vsel %vm915_vm9, %v5325_v13, %v5264_v30  ;;  %v966_v52 = vsel %vm915_vm9, %v5252_v2, %v5299_v21  ;;  %v6745_v2 = vld [vmem:[#allocation17_spill] sm:$0xff] }
 0xa98   : > { %v6746_v21 = vld [vmem:[#allocation21_spill] sm:$0xff] }
 0xa99   : > { %4433 = vset.pattern.permute.xlu1 %v6738_v3  ;;  %v369_v3 = vadd.f32 %v367_v44, %v343_v46  ;;  %v1166_v55 = vsel %vm1116_vm10, %v6746_v21, %v6745_v2 }
 0xa9a   : > { %2436 = vperm.xlu1 %4433, %v2380_v16  }
 0xa9e   : > { %4434 = vset.pattern.permute.xlu1 %v6739_v59  ;;  %v395_v59 = vadd.f32 %v393_v1, %v369_v3  ;;  %v692_v1 = vsel %vm691_vm8, %v5230_v58, %v5232_v31 }
 0xa9f   : > { %2487 = vperm.xlu1 %4434, %v2380_v16  }
 0xaa0   : > { %v472_v46 = vadd.f32 %v468_v26, %v395_v59  ;;  %v567_v59 = vsel %vm467_vm7, %v5226_v43, %v5277_v50  ;;  %v742_v43 = vsel %vm691_vm8, %v5234_v12, %v5291_v23 }
 0xaa2   : > { %v521_v44 = vadd.f32 %v517_v54, %v472_v46  ;;  %v917_v46 = vsel %vm915_vm9, %v5248_v47, %v5297_v37  ;;  %v6743_v47 = vld [vmem:[#allocation19_spill] sm:$0xff] }
 0xaa3   : > { %4435 = vset.pattern.permute.xlu1 %v6740_v45  ;;  %v741_v45 = vsel %vm691_vm8, %v5313_v27, %v5234_v12  ;;  %v1014_v12 = vsel %vm915_vm9, %v5321_v14, %v5256_v49  ;;  %v1015_v14 = vsel %vm915_vm9, %v5256_v49, %v5301_v62  ;;  %v1117_v37 = vsel %vm1116_vm10, %v6743_v47, %v6742_v5 }
 0xaa4   : > { %2538 = vperm.xlu1 %4435, %v2380_v16   ;;  %v344_v16 = vadd.f32 %v342_v17, %v318_v4  ;;  %v570_v33 = vadd.f32 %v566_v11, %v521_v44  ;;  %v6744_v44 = vld [vmem:[#allocation24_spill] sm:$0xff] }
 0xaa5   : > { %v1064_v13 = vsel %vm915_vm9, %v5264_v30, %v6744_v44  ;;  %v6751_v30 = vld [vmem:[#allocation27_spill] sm:$0xff]  ;;  %v6768_v44 = vld [vmem:[#allocation40_spill] sm:$0xff] }
 0xaa6   : > { %v619_v3 = vadd.f32 %v615_v29, %v570_v33  ;;  %v370_v20 = vadd.f32 %v368_v56, %v344_v16  ;;  %v6747_v56 = vld [vmem:[#allocation20_spill] sm:$0xff] }
 0xaa7   : > { %v1118_v49 = vsel %vm1116_vm10, %v6742_v5, %v6747_v56 }
 0xaa8   : > { %4437 = vset.pattern.permute.xlu1 %v6741_v9  ;;  %v696_v26 = vadd.f32 %v692_v1, %v619_v3  ;;  %v396_v39 = vadd.f32 %v394_v40, %v370_v20  ;;  %v6748_v3 = vld [vmem:[#allocation18_spill] sm:$0xff]  ;;  %v6749_v20 = vld [vmem:[#allocation23_spill] sm:$0xff]  ;;  %v6750_v1 = vld [vmem:[#allocation25_spill] sm:$0xff] }
 0xaa9   : > { %v1215_v40 = vsel %vm1116_vm10, %v6749_v20, %v6748_v3 }
 0xaaa   : > { %v473_v48 = vadd.f32 %v469_v35, %v396_v39  ;;  %v745_v58 = vadd.f32 %v741_v45, %v696_v26  ;;  %v1264_v26 = vsel %vm1116_vm10, %v6751_v30, %v6750_v1  ;;  %v6752_v45 = vld [vmem:[#allocation22_spill] sm:$0xff] }
 0xaab   : > { %v1167_v39 = vsel %vm1116_vm10, %v6745_v2, %v6752_v45 }
 0xaac   : > { %v522_v27 = vadd.f32 %v518_v41, %v473_v48  ;;  %v794_v38 = vadd.f32 %v790_v63, %v745_v58  ;;  %v6753_v41 = vld [vmem:[#allocation26_spill] sm:$0xff]  ;;  %v6755_v58 = vld [vmem:[#allocation29_spill] sm:$0xff] }
 0xaad   : > { %v1216_v63 = vsel %vm1116_vm10, %v6748_v3, %v6753_v41  ;;  %v6754_v48 = vld [vmem:[#allocation30_spill] sm:$0xff] }
 0xaae   : > { %v571_v53 = vadd.f32 %v567_v59, %v522_v27  ;;  %v843_v54 = vadd.f32 %v839_v0, %v794_v38  ;;  %v1339_v59 = vsel %vm1338_vm11, %v6755_v58, %v6754_v48  ;;  %v6756_v38 = vld [vmem:[#allocation28_spill] sm:$0xff]  ;;  %v6778_v58 = vld [vmem:[#allocation54_spill] sm:$0xff] }
 0xab0   : > { %v620_v4 = vadd.f32 %v616_v57, %v571_v53  ;;  %v920_v15 = vadd.f32 %v916_v22, %v843_v54  ;;  %v1265_v57 = vsel %vm1116_vm10, %v6750_v1, %v6756_v38  ;;  %v6757_v53 = vld [vmem:[#allocation31_spill] sm:$0xff]  ;;  %v6758_v54 = vld [vmem:[#allocation34_spill] sm:$0xff]  ;;  %v6759_v22 = vld [vmem:[#allocation33_spill] sm:$0xff] }
 0xab1   : > { %v6774_v1 = vld [vmem:[#allocation47_spill] sm:$0xff] }
 0xab2   : > { %v697_v50 = vadd.f32 %v693_v25, %v620_v4  ;;  %v969_v23 = vadd.f32 %v965_v51, %v920_v15  ;;  %v1388_v25 = vsel %vm1338_vm11, %v6758_v54, %v6757_v53  ;;  %v6760_v15 = vld [vmem:[#allocation32_spill] sm:$0xff] }
 0xab4   : > { %v746_v31 = vadd.f32 %v742_v43, %v697_v50  ;;  %v1018_v34 = vadd.f32 %v1014_v12, %v969_v23  ;;  %v1340_v50 = vsel %vm1338_vm11, %v6754_v48, %v6759_v22  ;;  %v6762_v12 = vld [vmem:[#allocation35_spill] sm:$0xff]  ;;  %v6763_v23 = vld [vmem:[#allocation36_spill] sm:$0xff] }
 0xab6   : > { %v795_v24 = vadd.f32 %v791_v60, %v746_v31  ;;  %v1067_v11 = vadd.f32 %v1063_v19, %v1018_v34  ;;  %v6761_v60 = vld [vmem:[#allocation37_spill] sm:$0xff] }
 0xab7   : > { %v1437_v51 = vsel %vm1338_vm11, %v6761_v60, %v6760_v15 }
 0xab8   : > { %v844_v18 = vadd.f32 %v840_v36, %v795_v24  ;;  %v1121_v29 = vadd.f32 %v1117_v37, %v1067_v11  ;;  %v1389_v24 = vsel %vm1338_vm11, %v6757_v53, %v6762_v12  ;;  %v6780_v53 = vld [vmem:[#allocation52_spill] sm:$0xff] }
 0xaba   : > { %v921_v32 = vadd.f32 %v917_v46, %v844_v18  ;;  %v1170_v33 = vadd.f32 %v1166_v55, %v1121_v29  ;;  %v6764_v46 = vld [vmem:[#allocation39_spill] sm:$0xff]  ;;  %v6770_v29 = vld [vmem:[#allocation46_spill] sm:$0xff] }
 0xabb   : > { %v1486_v19 = vsel %vm1338_vm11, %v6764_v46, %v6763_v23  ;;  %v6786_v46 = vld [vmem:[#allocation59_spill] sm:$0xff] }
 0xabc   : > { %v970_v17 = vadd.f32 %v966_v52, %v921_v32  ;;  %v1219_v35 = vadd.f32 %v1215_v40, %v1170_v33  ;;  %v2009_v52 = vpop.permute.xlu0 %2008  ;;  %v6765_v32 = vld [vmem:[#allocation38_spill] sm:$0xff]  ;;  %v6771_v33 = vld [vmem:[#allocation45_spill] sm:$0xff] }
 0xabd   : > { %v1438_v11 = vsel %vm1338_vm11, %v6760_v15, %v6765_v32  ;;  %v6783_v15 = vld [vmem:[#allocation57_spill] sm:$0xff] }
 0xabe   : > { %v1019_v9 = vadd.f32 %v1015_v14, %v970_v17  ;;  %v1268_v27 = vadd.f32 %v1264_v26, %v1219_v35  ;;  %v6766_v14 = vld [vmem:[#allocation42_spill] sm:$0xff]  ;;  %v6767_v17 = vld [vmem:[#allocation41_spill] sm:$0xff]  ;;  %v6775_v26 = vld [vmem:[#allocation48_spill] sm:$0xff]  ;;  %v1788_v60 = vsel %vm1786_vm13, %v6778_v58, %v6783_v15 }
 0xabf   : > { %v1563_v5 = vsel %vm1562_vm12, %v6767_v17, %v6766_v14  ;;  %v1564_v56 = vsel %vm1562_vm12, %v6766_v14, %v6771_v33  ;;  %v6776_v35 = vld [vmem:[#allocation51_spill] sm:$0xff]  ;;  %v1711_v54 = vsel %vm1562_vm12, %v6775_v26, %v6780_v53  ;;  %v6789_v17 = vld [vmem:[#allocation62_spill] sm:$0xff] }
 0xac0   : > { %v1068_v16 = vadd.f32 %v1064_v13, %v1019_v9  ;;  %v1343_v43 = vadd.f32 %v1339_v59, %v1268_v27  ;;  %v1487_v13 = vsel %vm1338_vm11, %v6763_v23, %v6768_v44  ;;  %v6769_v9 = vld [vmem:[#allocation43_spill] sm:$0xff]  ;;  %v2055_v55 = vpop.permute.xlu0 %2054  ;;  %v1710_v45 = vsel %vm1562_vm12, %v6776_v35, %v6775_v26  ;;  %v6779_v59 = vld [vmem:[#allocation53_spill] sm:$0xff] }
 0xac1   : > { %v1613_v30 = vsel %vm1562_vm12, %v6769_v9, %v6774_v1 }
 0xac2   : > { %v1122_v62 = vadd.f32 %v1118_v49, %v1068_v16  ;;  %v1392_v36 = vadd.f32 %v1388_v25, %v1343_v43  ;;  %v1612_v16 = vsel %vm1562_vm12, %v6770_v29, %v6769_v9  ;;  %v6772_v49 = vld [vmem:[#allocation44_spill] sm:$0xff]  ;;  %v6781_v25 = vld [vmem:[#allocation55_spill] sm:$0xff] }
 0xac3   : > { %v6792_v29 = vld [vmem:[#allocation64_spill] sm:$0xff] }
 0xac4   : > { %v1171_v0 = vadd.f32 %v1167_v39, %v1122_v62  ;;  %v1441_v34 = vadd.f32 %v1437_v51, %v1392_v36  ;;  %v6773_v62 = vld [vmem:[#allocation49_spill] sm:$0xff]  ;;  %v6784_v51 = vld [vmem:[#allocation56_spill] sm:$0xff] }
 0xac5   : > { %v1661_v3 = vsel %vm1562_vm12, %v6773_v62, %v6772_v49 }
 0xac6   : > { %v1220_v4 = vadd.f32 %v1216_v63, %v1171_v0  ;;  %v1490_v37 = vadd.f32 %v1486_v19, %v1441_v34  ;;  %v6777_v63 = vld [vmem:[#allocation50_spill] sm:$0xff]  ;;  %v1787_v0 = vsel %vm1786_vm13, %v6779_v59, %v6778_v58  ;;  %v1837_v19 = vsel %vm1786_vm13, %v6781_v25, %v6786_v46  ;;  %v6788_v34 = vld [vmem:[#allocation63_spill] sm:$0xff] }
 0xac7   : > { %v1662_v48 = vsel %vm1562_vm12, %v6772_v49, %v6777_v63 }
 0xac8   : > { %v1269_v31 = vadd.f32 %v1265_v57, %v1220_v4  ;;  %v1567_v21 = vadd.f32 %v1563_v5, %v1490_v37  ;;  %v2059_v57 = vpop.permute.xlu0 %2058  ;;  %v6782_v4 = vld [vmem:[#allocation58_spill] sm:$0xff]  ;;  %v1886_v5 = vsel %vm1786_vm13, %v6784_v51, %v6789_v17  ;;  %v6791_v37 = vld [vmem:[#allocation65_spill] sm:$0xff] }
 0xac9   : > { %v1836_v43 = vsel %vm1786_vm13, %v6782_v4, %v6781_v25 }
 0xaca   : > { %v1344_v18 = vadd.f32 %v1340_v50, %v1269_v31  ;;  %v1616_v40 = vadd.f32 %v1612_v16, %v1567_v21  ;;  %v6785_v31 = vld [vmem:[#allocation61_spill] sm:$0xff] }
 0xacb   : > { %v1885_v36 = vsel %vm1786_vm13, %v6785_v31, %v6784_v51 }
 0xacc   : > { %v1393_v47 = vadd.f32 %v1389_v24, %v1344_v18  ;;  %v1665_v41 = vadd.f32 %v1661_v3, %v1616_v40  ;;  %v2104_v23 = vpop.permute.xlu0 %2103  ;;  %v6787_v18 = vld [vmem:[#allocation60_spill] sm:$0xff] }
 0xacd   : > { %v1934_v32 = vsel %vm1786_vm13, %v6788_v34, %v6787_v18  ;;  %v1935_v16 = vsel %vm1786_vm13, %v6787_v18, %v6792_v29  ;;  %v6794_v3 = vld [vmem:[#allocation68_spill] sm:$0xff]  ;;  %v6795_v18 = vld [vmem:[#allocation15_spill] sm:$0xff] }
 0xace   : > { %v1442_v2 = vadd.f32 %v1438_v11, %v1393_v47  ;;  %v1714_v38 = vadd.f32 %v1710_v45, %v1665_v41  ;;  %v6790_v47 = vld [vmem:[#allocation66_spill] sm:$0xff] }
 0xacf   : > { %v2011_v44 = vsel %vm2010_vm14, %v6791_v37, %v6790_v47  ;;  %v2012_v62 = vsel %vm2010_vm14, %v6790_v47, %v2009_v52  ;;  %v2167_v52 = vstv %s2164_s12 }
 0xad0   : > { %v1491_v20 = vadd.f32 %v1487_v13, %v1442_v2  ;;  %v1791_v50 = vadd.f32 %v1787_v0, %v1714_v38  ;;  %v6793_v2 = vld [vmem:[#allocation67_spill] sm:$0xff]  ;;  %v2108_v49 = vpop.permute.xlu0 %2107 }
 0xad1   : > { %v2060_v21 = vsel %vm2010_vm14, %v2055_v55, %v6793_v2  ;;  %v2110_v55 = vsel %vm2010_vm14, %v6794_v3, %v2108_v49 }
 0xad2   : > { %v1568_v39 = vadd.f32 %v1564_v56, %v1491_v20  ;;  %v1840_v24 = vadd.f32 %v1836_v43, %v1791_v50  ;;  %v2109_v20 = vsel %vm2010_vm14, %v2104_v23, %v6794_v3 }
 0xad4   : > { %v1617_v27 = vadd.f32 %v1613_v30, %v1568_v39  ;;  %v1889_v14 = vadd.f32 %v1885_v36, %v1840_v24  ;;  %v2061_v30 = vsel %vm2010_vm14, %v6793_v2, %v2059_v57 }
 0xad6   : > { %v1666_v22 = vadd.f32 %v1662_v48, %v1617_v27  ;;  %v1938_v9 = vadd.f32 %v1934_v32, %v1889_v14 }
 0xad8   : > { %v1715_v12 = vadd.f32 %v1711_v54, %v1666_v22  ;;  %v2015_v56 = vadd.f32 %v2011_v44, %v1938_v9 }
 0xada   : > { %v1792_v11 = vadd.f32 %v1788_v60, %v1715_v12  ;;  %v2064_v1 = vadd.f32 %v2060_v21, %v2015_v56 }
 0xadc   : > { %v1841_v13 = vadd.f32 %v1837_v19, %v1792_v11  ;;  %v2113_v35 = vadd.f32 %v2109_v20, %v2064_v1  ;;  %v2590_v1 = vld [vmem:[#allocation7 + $0x2] ss:$8 sm:$0x3] }
 0xade   : > { %v1890_v33 = vadd.f32 %v1886_v5, %v1841_v13 }
 0xae0   : > { %v1939_v40 = vadd.f32 %v1935_v16, %v1890_v33 }
 0xae2   : > { %v2016_v26 = vadd.f32 %v2012_v62, %v1939_v40 }
 0xae4   : > { %v2065_v63 = vadd.f32 %v2061_v30, %v2016_v26 }
 0xae6   : > { %v2114_v58 = vadd.f32 %v2110_v55, %v2065_v63 }
 0xaf0   : > { %v2155_v45 = vpop.permute.xlu1 %2154  ;;  %v2153_v39 = vpop.permute.xlu0 %2152 }
 0xaf1   : > { %v2158_v41 = vsel %vm2010_vm14, %v2153_v39, %v2155_v45  ;;  %v2599_v39 = vrot.slane %v2590_v1, %v4889_v8 }
 0xaf2   : > { %v2162_v48 = vadd.f32 %v2158_v41, %v2113_v35 }
 0xaf4   : > { %v2157_v59 = vpop.permute.xlu0 %2156  ;;  %v2168_v27 = vmul.f32 %v2167_v52, %v2162_v48  ;;  %vm2165_vm15 = vcmp.ge.f32.partialorder %v2162_v48, 0.0 }
 0xaf5   : > { %v2159_v0 = vsel %vm2010_vm14, %v2155_v45, %v2157_v59  ;;  %v2595_v45 = vrot.slane %v2590_v1, %v4886_v7 }
 0xaf6   : > { %v2163_v38 = vadd.f32 %v2159_v0, %v2114_v58  ;;  %v2170_v53 = vsel %vm2165_vm15, %v2162_v48, %v2168_v27 }
 0xaf7   : > { %v2600_v58 = vcombine.low %v2595_v45, %v2599_v39 }
 0xaf8   : > { %vm2166_vm1 = vcmp.ge.f32.partialorder %v2163_v38, 0.0  ;;  %v2169_v57 = vmul.f32 %v2167_v52, %v2163_v38  ;;  %v5885_v43 = vpop.permute.xlu0 %2199 }
 0xafa   : > { %v2171_v54 = vsel %vm2166_vm1, %v2163_v38, %v2169_v57 }
 0xafb   : > { %v5880_v25 = vcombine.low %v2170_v53, %v2171_v54 }
 0xafd   : > { %2179 = vst [vmem:[#allocation2 + $0x4] sm:$0xff] %v5880_v25 }
 0xb01   : > { %v5883_v4 = vpop.permute.xlu1 %2183 }
 0xb04   : > { %v2360_v31 = vld [vmem:[#allocation2 + $0x8] sm:$0xf]  ;;  %v5893_v36 = vld [vmem:[#allocation2] sm:$0xff] }
 0xb05   : > { %v5887_v22 = vpop.permute.xlu1 %2210 }
 0xb09   : > { %v5889_v50 = vpop.permute.xlu0 %2249 }
 0xb0a   : > { %v5891_v15 = vpop.permute.xlu1 %2286 }
 0xb0d   : > { %v2373_v60 = vpop.permute.xlu0 %2372 }
 0xb0e   : > { %v2374_v51 = vrot.slane %v2373_v60, 4 }
 0xb0f   : > { %v5896_v23 = vpop.permute.xlu1 %2323 }
 0xb10   : > { %v2375_v12 = vsel %vm915_vm9, %v2374_v51, %v2373_v60  ;;  %v2379_v24 = vmul.f32 %v2374_v51, %v2360_v31  ;;  %v5940_v31 = vld [vmem:[%s6599_s2 + $0x4] sm:$0xf] }
 0xb11   : > { %v2378_v46 = vmul.f32 %v2375_v12, %v5893_v36  ;;  %v6796_v12 = vmov 12  }
 0xb12   : > { %v2399_v32 = vrot.slane %v2379_v24, %v4886_v7  ;;  %v2450_v33 = vrot.slane %v2379_v24, %v4889_v8  ;;  %v2501_v48 = vrot.slane %v2379_v24, %v5001_v28  ;;  %v2552_v57 = vrot.slane %v2379_v24, %v5056_v42 }
 0xb13   : > { %v2391_v19 = vrot.slane %v2378_v46, %v4886_v7  ;;  %v2395_v34 = vrot.slane %v2378_v46, %v6795_v18  ;;  %v2446_v14 = vrot.slane %v2378_v46, %v4977_v61  ;;  %v2442_v29 = vrot.slane %v2378_v46, %v4889_v8 }
 0xb14   : > { %v2384_v11 = vpop.permute.xlu1 %2383  ;;  %v2414_v47 = vrot.slane %v2399_v32, %v4886_v7  ;;  %v2497_v16 = vrot.slane %v2378_v46, %v4986_v6  ;;  %v2548_v3 = vrot.slane %v2378_v46, %v5039_v10  ;;  %v2465_v30 = vrot.slane %v2450_v33, %v4889_v8 }
 0xb15   : > { %v2406_v17 = vrot.slane %v2391_v19, %v4886_v7  ;;  %v2410_v5 = vrot.slane %v2395_v34, %v4886_v7  ;;  %v2461_v13 = vrot.slane %v2446_v14, %v4889_v8  ;;  %v2457_v56 = vrot.slane %v2442_v29, %v4889_v8 }
 0xb16   : > { %v2417_v21 = vmul.f32 %v2414_v47, %v2384_v11  ;;  %v2512_v49 = vrot.slane %v2497_v16, %v5001_v28  ;;  %v2493_v26 = vrot.slane %v2378_v46, %v5001_v28  ;;  %v2563_v35 = vrot.slane %v2548_v3, %v5056_v42 }
 0xb17   : > { %v2415_v37 = vmul.f32 %v2406_v17, %v2384_v11  ;;  %v2416_v44 = vmul.f32 %v2410_v5, %v2384_v11  ;;  %v2516_v0 = vrot.slane %v2501_v48, %v5001_v28  ;;  %v2544_v27 = vrot.slane %v2378_v46, %v5056_v42 }
 0xb18   : > { %v2508_v52 = vrot.slane %v2493_v26, %v5001_v28  ;;  %v2567_v60 = vrot.slane %v2552_v57, %v5056_v42  ;;  %v6798_v57 = vmov 11  }
 0xb19   : > { %v2437_v9 = vpop.permute.xlu1 %2436  ;;  %2423 = vrot.lane.b32.xlu1 %v2416_v44, %s4645_s26  ;;  %2421 = vrot.lane.b32.xlu0 %v2415_v37, %s4645_s26  ;;  %v2559_v53 = vrot.slane %v2544_v27, %v5056_v42 }
 0xb1a   : > { %v2467_v2 = vmul.f32 %v2461_v13, %v2437_v9  ;;  %v2466_v20 = vmul.f32 %v2457_v56, %v2437_v9  ;;  %v2468_v55 = vmul.f32 %v2465_v30, %v2437_v9  ;;  %v2589_v9 = vld [vmem:[#allocation2 + $0x8] sm:$0xf] }
 0xb1d   : > { %2474 = vrot.lane.b32.xlu1 %v2467_v2, %s4645_s26  ;;  %2425 = vrot.lane.b32.xlu0 %v2417_v21, %s4645_s26 }
 0xb1e   : > { %v2488_v62 = vpop.permute.xlu1 %2487 }
 0xb1f   : > { %v2518_v40 = vmul.f32 %v2512_v49, %v2488_v62  ;;  %v2517_v59 = vmul.f32 %v2508_v52, %v2488_v62  ;;  %v2519_v38 = vmul.f32 %v2516_v0, %v2488_v62 }
 0xb21   : > { %2525 = vrot.lane.b32.xlu1 %v2518_v40, %s4645_s26  ;;  %2472 = vrot.lane.b32.xlu0 %v2466_v20, %s4645_s26 }
 0xb23   : > { %v2539_v41 = vpop.permute.xlu1 %2538 }
 0xb24   : > { %v2569_v63 = vmul.f32 %v2563_v35, %v2539_v41  ;;  %v2568_v54 = vmul.f32 %v2559_v53, %v2539_v41  ;;  %v2570_v51 = vmul.f32 %v2567_v60, %v2539_v41  ;;  %v6797_v35 = vmov 10  }
 0xb25   : > { %2476 = vrot.lane.b32.xlu0 %v2468_v55, %s4645_s26 }
 0xb26   : > { %2576 = vrot.lane.b32.xlu1 %v2569_v63, %s4645_s26 }
 0xb29   : > { %2523 = vrot.lane.b32.xlu0 %v2517_v59, %s4645_s26 }
 0xb2a   : > { %2601 = vrot.lane.b32.xlu1 %v2600_v58, %s4673_s15 }
 0xb2d   : > { %2527 = vrot.lane.b32.xlu0 %v2519_v38, %s4645_s26 }
 0xb31   : > { %2574 = vrot.lane.b32.xlu0 %v2568_v54, %s4645_s26 }
 0xb35   : > { %2578 = vrot.lane.b32.xlu0 %v2570_v51, %s4645_s26 }
 0xb39   : > { %2613 = vperm.xlu0 %4436, %v5940_v31  }
 0xb3d   : > { %4440 = vset.pattern.permute.xlu0 %v6796_v12 }
 0xb8b   : > { %v5944_v24 = vpop.permute.xlu0 %2421  ;;  %v5946_v46 = vpop.permute.xlu1 %2423 }
 0xb8f   : > { %v5948_v19 = vpop.permute.xlu0 %2425  ;;  %v5950_v34 = vpop.permute.xlu1 %2474 }
 0xb93   : > { %v5952_v32 = vpop.permute.xlu0 %2472  ;;  %v5954_v11 = vpop.permute.xlu1 %2525 }
 0xb97   : > { %v5956_v14 = vpop.permute.xlu0 %2476 }
 0xb98   : > { %v5958_v17 = vpop.permute.xlu1 %2576 }
 0xb9b   : > { %v5960_v5 = vpop.permute.xlu0 %2523 }
 0xb9c   : > { %v2602_v47 = vpop.permute.xlu1 %2601 }
 0xb9d   : > { %v2603_v37 = vrot.slane %v2602_v47, 4 }
 0xb9f   : > { %v5962_v44 = vpop.permute.xlu0 %2527  ;;  %v2605_v13 = vsel %vm2604_vm3, %v2603_v37, %v2602_v47  ;;  %v5967_v2 = vmul.f32 %v2603_v37, %v2589_v9 }
 0xba0   : > { %v2608_v16 = vmul.f32 %v2605_v13, %v5893_v36 }
 0xba1   : > { %v2629_v33 = vrot.slane %v5967_v2, %v4886_v7  ;;  %v2680_v63 = vrot.slane %v5967_v2, %v4889_v8  ;;  %v2731_v51 = vrot.slane %v5967_v2, %v5001_v28 }
 0xba2   : > { %v2621_v21 = vrot.slane %v2608_v16, %v4886_v7  ;;  %v2625_v49 = vrot.slane %v2608_v16, %v6795_v18  ;;  %v2672_v39 = vrot.slane %v2608_v16, %v4889_v8  ;;  %v2676_v55 = vrot.slane %v2608_v16, %v4977_v61 }
 0xba3   : > { %v5964_v29 = vpop.permute.xlu0 %2574  ;;  %v2644_v3 = vrot.slane %v2629_v33, %v4886_v7  ;;  %v2695_v27 = vrot.slane %v2680_v63, %v4889_v8  ;;  %v2723_v53 = vrot.slane %v2608_v16, %v5001_v28  ;;  %v2727_v54 = vrot.slane %v2608_v16, %v4986_v6 }
 0xba4   : > { %v2636_v62 = vrot.slane %v2621_v21, %v4886_v7  ;;  %v2640_v30 = vrot.slane %v2625_v49, %v4886_v7  ;;  %v2687_v48 = vrot.slane %v2672_v39, %v4889_v8  ;;  %v2691_v52 = vrot.slane %v2676_v55, %v4889_v8 }
 0xba5   : > { %v2738_v12 = vrot.slane %v2723_v53, %v5001_v28  ;;  %v2742_v47 = vrot.slane %v2727_v54, %v5001_v28  ;;  %v2746_v21 = vrot.slane %v2731_v51, %v5001_v28  ;;  %v6799_v49 = vmov 13  }
 0xba6   : > { %v6804_v53 = vmov 17   ;;  %v6805_v54 = vmov 20  }
 0xba7   : > { %v5972_v56 = vpop.permute.xlu0 %2578 }
 0xbb8   : > { %v2614_v20 = vpop.permute.xlu0 %2613 }
 0xbb9   : > { %v2645_v40 = vmul.f32 %v2636_v62, %v2614_v20  ;;  %v2647_v1 = vmul.f32 %v2644_v3, %v2614_v20  ;;  %v2646_v26 = vmul.f32 %v2640_v30, %v2614_v20  ;;  %v2774_v62 = vrot.slane %v2608_v16, %v5056_v42 }
 0xbba   : > { %v2778_v3 = vrot.slane %v2608_v16, %v5039_v10 }
 0xbbb   : > { %2655 = vrot.lane.b32.xlu0 %v2647_v1, %s4646_s13  ;;  %2651 = vrot.lane.b32.xlu1 %v2645_v40, %s4646_s13  ;;  %v2820_v40 = vld [vmem:[#allocation7 + $0x3] ss:$8 sm:$0x3]  ;;  %v2782_v1 = vrot.slane %v5967_v2, %v5056_v42  ;;  %v2789_v30 = vrot.slane %v2774_v62, %v5056_v42  ;;  %v2839_v2 = vld [vmem:[%s6599_s2 + $0x4] sm:$0xf]  ;;  %v6808_v62 = vmov 25  }
 0xbbf   : > { %2653 = vrot.lane.b32.xlu1 %v2646_v26, %s4646_s13  ;;  %v2793_v26 = vrot.slane %v2778_v3, %v5056_v42  ;;  %v6809_v3 = vmov 0.0  }
 0xbc0   : > { %2174 = vst.msk [vmem:[#allocation2 + $0xc] sm:$0xf] %vm2173_vm4, %v6809_v3 }
 0xbc3   : > { %2666 = vperm.xlu1 %4437, %v5940_v31  }
 0xbc7   : > { %4438 = vset.pattern.permute.xlu1 %v6797_v35  ;;  %v2829_v35 = vrot.slane %v2820_v40, %v4889_v8 }
 0xc2d   : > { %v5983_v45 = vpop.permute.xlu1 %2651 }
 0xc31   : > { %v5987_v41 = vpop.permute.xlu1 %2653 }
 0xc42   : > { %v2667_v58 = vpop.permute.xlu1 %2666 }
 0xc43   : > { %v2696_v59 = vmul.f32 %v2687_v48, %v2667_v58  ;;  %v2697_v0 = vmul.f32 %v2691_v52, %v2667_v58  ;;  %v2698_v38 = vmul.f32 %v2695_v27, %v2667_v58  ;;  %v2797_v48 = vrot.slane %v2782_v1, %v5056_v42 }
 0xc44   : > { %v6800_v58 = vmov 14   ;;  %v6803_v27 = vmov 18  }
 0xc45   : > { %2704 = vrot.lane.b32.xlu1 %v2697_v0, %s4646_s13  ;;  %2702 = vrot.lane.b32.xlu0 %v2696_v59, %s4646_s13  ;;  %v6801_v59 = vmov 15   ;;  %v6802_v0 = vmov 16  }
 0xc49   : > { %2717 = vperm.xlu1 %4438, %v5940_v31   ;;  %2706 = vrot.lane.b32.xlu0 %v2698_v38, %s4646_s13  ;;  %v3218_v38 = vld [vmem:[%s6599_s2 + $0x4] sm:$0xf] }
 0xc4d   : > { %4439 = vset.pattern.permute.xlu1 %v6798_v57  ;;  %v3199_v57 = vld [vmem:[#allocation7 + $0x5] ss:$8 sm:$0x3] }
 0xc4e   : > { %v3204_v51 = vrot.slane %v3199_v57, %v4886_v7 }
 0xcb7   : > { %v6001_v60 = vpop.permute.xlu1 %2704 }
 0xcc8   : > { %v2718_v37 = vpop.permute.xlu1 %2717 }
 0xcc9   : > { %v2747_v13 = vmul.f32 %v2738_v12, %v2718_v37  ;;  %v2748_v9 = vmul.f32 %v2742_v47, %v2718_v37  ;;  %v2749_v33 = vmul.f32 %v2746_v21, %v2718_v37  ;;  %v3208_v12 = vrot.slane %v3199_v57, %v4889_v8  ;;  %v3658_v47 = vld [vmem:[#allocation7 + $0x7] ss:$8 sm:$0x3] }
 0xcca   : > { %v6806_v37 = vmov 19   ;;  %v3663_v21 = vrot.slane %v3658_v47, %v4886_v7  ;;  %v6817_v57 = vmov 27  }
 0xccb   : > { %2755 = vrot.lane.b32.xlu1 %v2748_v9, %s4646_s13  ;;  %2753 = vrot.lane.b32.xlu0 %v2747_v13, %s4646_s13  ;;  %v6807_v13 = vmov 23   ;;  %v3209_v9 = vcombine.low %v3204_v51, %v3208_v12  ;;  %v6819_v51 = vmov 30  }
 0xccf   : > { %2768 = vperm.xlu1 %4439, %v5940_v31   ;;  %2757 = vrot.lane.b32.xlu0 %v2749_v33, %s4646_s13  ;;  %v2825_v31 = vrot.slane %v2820_v40, %v4886_v7  ;;  %v3667_v33 = vrot.slane %v3658_v47, %v4889_v8  ;;  %v6810_v40 = vmov 21  }
 0xcd1   : > { %v2830_v16 = vcombine.low %v2825_v31, %v2829_v35  ;;  %v3668_v1 = vcombine.low %v3663_v21, %v3667_v33 }
 0xcd3   : > { %4441 = vset.pattern.permute.xlu1 %v6799_v49  ;;  %v3448_v49 = vld [vmem:[%s6599_s2 + $0x4] sm:$0xf] }
 0xd3d   : > { %v6015_v20 = vpop.permute.xlu1 %2755 }
 0xd4e   : > { %v2769_v39 = vpop.permute.xlu1 %2768 }
 0xd4f   : > { %v2798_v55 = vmul.f32 %v2789_v30, %v2769_v39  ;;  %v2799_v63 = vmul.f32 %v2793_v26, %v2769_v39  ;;  %v2800_v52 = vmul.f32 %v2797_v48, %v2769_v39  ;;  %v3428_v30 = vld [vmem:[#allocation7 + $0x6] ss:$8 sm:$0x3]  ;;  %v3887_v26 = vld [vmem:[#allocation7 + $0x10] ss:$8 sm:$0x3] }
 0xd50   : > { %v3433_v31 = vrot.slane %v3428_v30, %v4886_v7  ;;  %v3437_v35 = vrot.slane %v3428_v30, %v4889_v8  ;;  %v3892_v39 = vrot.slane %v3887_v26, %v4886_v7  ;;  %v3677_v48 = vld [vmem:[%s6599_s2 + $0x4] sm:$0xf] }
 0xd51   : > { %2806 = vrot.lane.b32.xlu1 %v2799_v63, %s4646_s13  ;;  %2804 = vrot.lane.b32.xlu0 %v2798_v55, %s4646_s13  ;;  %v3896_v55 = vrot.slane %v3887_v26, %v4889_v8  ;;  %v6811_v63 = vmov 29  }
 0xd55   : > { %2831 = vrot.lane.b32.xlu1 %v2830_v16, %s4645_s26  ;;  %2808 = vrot.lane.b32.xlu0 %v2800_v52, %s4646_s13  ;;  %v6812_v16 = vmov 22   ;;  %v3438_v52 = vcombine.low %v3433_v31, %v3437_v35  ;;  %v6100_v35 = vpop.permute.xlu0 %2655 }
 0xd59   : > { %2895 = vperm.xlu1 %4441, %v2839_v2   ;;  %2842 = vperm.xlu0 %4440, %v2839_v2  }
 0xd5d   : > { %4442 = vset.pattern.permute.xlu1 %v6800_v58  ;;  %4443 = vset.pattern.permute.xlu0 %v6801_v59  ;;  %v6813_v58 = vmov 24   ;;  %v6814_v59 = vmov 33  }
 0xd5e   : > { %2946 = vperm.xlu1 %4442, %v2839_v2   ;;  %2997 = vperm.xlu0 %4443, %v2839_v2  }
 0xd62   : > { %4444 = vset.pattern.permute.xlu1 %v6802_v0  ;;  %4446 = vset.pattern.permute.xlu0 %v6803_v27  ;;  %v3907_v0 = vld [vmem:[%s6599_s2 + $0x4] sm:$0xf]  ;;  %v6815_v27 = vmov 26  }
 0xd63   : > { %3049 = vperm.xlu1 %4444, %v2839_v2   ;;  %3124 = vperm.xlu0 %4446, %v2839_v2  }
 0xd67   : > { %4445 = vset.pattern.permute.xlu1 %v6804_v53  ;;  %4448 = vset.pattern.permute.xlu0 %v6805_v54  ;;  %v6818_v53 = vmov 28   ;;  %v2201_v54 = vrot.slane %v5885_v43, 4 }
 0xd68   : > { %3087 = vperm.xlu1 %4445, %v2839_v2   ;;  %3221 = vperm.xlu0 %4448, %v3218_v38  }
 0xd69   : > { %v2202_v12 = vsel %vm1116_vm10, %v2201_v54, %v5885_v43 }
 0xd6a   : > { %v6080_v47 = vmul.f32 %v2202_v12, %v5893_v36 }
 0xd6c   : > { %4447 = vset.pattern.permute.xlu1 %v6806_v37  ;;  %4451 = vset.pattern.permute.xlu0 %v6807_v13  ;;  %v6820_v37 = vmov 31   ;;  %v2218_v13 = vrot.slane %v6080_v47, %v4886_v7  ;;  %v2255_v33 = vrot.slane %v6080_v47, %v4889_v8  ;;  %v2329_v31 = vrot.slane %v6080_v47, %v5056_v42 }
 0xd6d   : > { %3161 = vperm.xlu1 %4447, %v2839_v2   ;;  %3376 = vperm.xlu0 %4451, %v3218_v38   ;;  %v3897_v2 = vcombine.low %v3892_v39, %v3896_v55 }
 0xd6e   : > { %v2233_v21 = vrot.slane %v2218_v13, %v4886_v7  ;;  %v2270_v3 = vrot.slane %v2255_v33, %v4889_v8 }
 0xd70   : > { %v2279_v30 = vmul.f32 %v2270_v3, %v5889_v50 }
 0xd71   : > { %3210 = vrot.lane.b32.xlu1 %v3209_v9, %s4625_s23  ;;  %4453 = vset.pattern.permute.xlu0 %v6808_v62  ;;  %v6821_v9 = vmov 32   ;;  %v2242_v62 = vmul.f32 %v2233_v21, %v5887_v22  ;;  %s4676_s23 = smov [#allocation10]  }
 0xd72   : > { %3504 = vperm.xlu0 %4453, %v3448_v49   ;;  %4449 = vset.pattern.permute.xlu1 %v6810_v40  ;;  %v2292_v40 = vrot.slane %v6080_v47, %v5001_v28  ;;  %s4544_s9 = sshll.u32 %s4676_s23, 4  ;;  %s4545_s9 = int_to_ptr.vmem [resolvable:$false] %s4544_s9 }
 0xd74   : > { %v2307_v26 = vrot.slane %v2292_v40, %v5001_v28 }
 0xd75   : > { %3274 = vperm.xlu1 %4449, %v3218_v38  }
 0xd76   : > { %3669 = vrot.lane.b32.xlu0 %v3668_v1, %s4636_s30  ;;  %s4674_s30 = smov 15   ;;  %v2245_v1 = vadd.f32 %v2242_v62, %v5883_v4  ;;  %v2316_v55 = vmul.f32 %v2307_v26, %v5891_v15  ;;  %v2819_v26 = vld [vmem:[#allocation2 + $0x8] sm:$0xf] }
 0xd77   : > { %4457 = vset.pattern.permute.xlu0 %v6811_v63  ;;  %v2344_v63 = vrot.slane %v2329_v31, %v5056_v42 }
 0xd78   : > { %v2282_v39 = vadd.f32 %v2279_v30, %v2245_v1 }
 0xd79   : > { %4450 = vset.pattern.permute.xlu1 %v6812_v16 }
 0xd7a   : > { %3325 = vperm.xlu1 %4450, %v3218_v38   ;;  %3733 = vperm.xlu0 %4457, %v3677_v48   ;;  %v6816_v38 = vmov 35   ;;  %v2319_v16 = vadd.f32 %v2316_v55, %v2282_v39 }
 0xd7e   : > { %3439 = vrot.lane.b32.xlu1 %v3438_v52, %s4674_s30  ;;  %3898 = vrot.lane.b32.xlu0 %v3897_v2, %s4675_s6  ;;  %v2353_v52 = vmul.f32 %v2344_v63, %v5896_v23  ;;  %v2427_v2 = vsel %vm467_vm7, %v5944_v24, %v5946_v46  ;;  %v2657_v24 = vsel %vm691_vm8, %v5983_v45, %v5987_v41  ;;  %s4546_s30 = scalar_lea.vmem %s4545_s9, 256 }
 0xd7f   : > { %4452 = vset.pattern.permute.xlu1 %v6813_v58  ;;  %4461 = vset.pattern.permute.xlu0 %v6814_v59 }
 0xd80   : > { %v2356_v58 = vadd.f32 %v2353_v52, %v2319_v16 }
 0xd82   : > { %3451 = vperm.xlu1 %4452, %v3448_v49   ;;  %3963 = vperm.xlu0 %4461, %v3907_v0  }
 0xd86   : > { %4454 = vset.pattern.permute.xlu1 %v6815_v27  ;;  %4464 = vset.pattern.permute.xlu0 %v6816_v38  ;;  %v2432_v27 = vadd.f32 %v2427_v2, %v2356_v58 }
 0xd87   : > { %3555 = vperm.xlu1 %4454, %v3448_v49  }
 0xd8b   : > { %4455 = vset.pattern.permute.xlu1 %v6817_v57 }
 0xd8c   : > { %3606 = vperm.xlu1 %4455, %v3448_v49   ;;  %v6822_v49 = vmov 34  }
 0xd90   : > { %4456 = vset.pattern.permute.xlu1 %v6818_v53 }
 0xd91   : > { %3680 = vperm.xlu1 %4456, %v3677_v48  }
 0xd95   : > { %4458 = vset.pattern.permute.xlu1 %v6819_v51  ;;  %v2580_v51 = vsel %vm467_vm7, %v5964_v29, %v5958_v17 }
 0xd96   : > { %3784 = vperm.xlu1 %4458, %v3677_v48  }
 0xd9a   : > { %4459 = vset.pattern.permute.xlu1 %v6820_v37 }
 0xd9b   : > { %3835 = vperm.xlu1 %4459, %v3677_v48   ;;  %v2703_v48 = vpop.permute.xlu0 %2702 }
 0xd9f   : > { %4460 = vset.pattern.permute.xlu1 %v6821_v9  ;;  %v6108_v59 = vpop.permute.xlu0 %2706 }
 0xda0   : > { %3910 = vperm.xlu1 %4460, %v3907_v0  }
 0xda3   : > { %v2754_v53 = vpop.permute.xlu0 %2753 }
 0xda4   : > { %4462 = vset.pattern.permute.xlu1 %v6822_v49 }
 0xda5   : > { %4014 = vperm.xlu1 %4462, %v3907_v0  }
 0xda7   : > { %v6124_v9 = vpop.permute.xlu0 %2757 }
 0xda9   : > { %4463 = vset.pattern.permute.xlu1 %v6816_v38  ;;  %v2529_v38 = vsel %vm467_vm7, %v5960_v5, %v5954_v11  ;;  %v2759_v5 = vsel %vm691_vm8, %v2754_v53, %v6015_v20 }
 0xdaa   : > { %4065 = vperm.xlu1 %4463, %v3907_v0   ;;  %v2478_v0 = vsel %vm467_vm7, %v5952_v32, %v5950_v34  ;;  %v2708_v32 = vsel %vm691_vm8, %v2703_v48, %v6001_v60 }
 0xdab   : > { %v2483_v57 = vadd.f32 %v2478_v0, %v2432_v27 }
 0xdad   : > { %v2534_v12 = vadd.f32 %v2529_v38, %v2483_v57 }
 0xdaf   : > { %v2585_v37 = vadd.f32 %v2580_v51, %v2534_v12 }
 0xdb1   : > { %v2662_v13 = vadd.f32 %v2657_v24, %v2585_v37 }
 0xdb3   : > { %v2713_v21 = vadd.f32 %v2708_v32, %v2662_v13 }
 0xdb5   : > { %v2764_v33 = vadd.f32 %v2759_v5, %v2713_v21 }
 0xdc3   : > { %v6128_v49 = vpop.permute.xlu1 %2806  ;;  %v2805_v29 = vpop.permute.xlu0 %2804 }
 0xdc4   : > { %v2810_v62 = vsel %vm691_vm8, %v2805_v29, %v6128_v49 }
 0xdc5   : > { %v6132_v3 = vadd.f32 %v2810_v62, %v2764_v33 }
 0xdc7   : > { %v2832_v45 = vpop.permute.xlu1 %2831  ;;  %v6137_v55 = vpop.permute.xlu0 %2808 }
 0xdc8   : > { %v2833_v40 = vrot.slane %v2832_v45, 4 }
 0xdca   : > { %v2834_v1 = vsel %vm467_vm7, %v2833_v40, %v2832_v45  ;;  %v2838_v31 = vmul.f32 %v2833_v40, %v2819_v26 }
 0xdcb   : > { %v2837_v30 = vmul.f32 %v2834_v1, %v5893_v36 }
 0xdcc   : > { %v2858_v48 = vrot.slane %v2838_v31, %v4886_v7  ;;  %v2909_v53 = vrot.slane %v2838_v31, %v4889_v8  ;;  %v2960_v45 = vrot.slane %v2838_v31, %v5001_v28 }
 0xdcd   : > { %v2850_v39 = vrot.slane %v2837_v30, %v4886_v7  ;;  %v2854_v63 = vrot.slane %v2837_v30, %v6795_v18  ;;  %v2901_v52 = vrot.slane %v2837_v30, %v4889_v8  ;;  %v2905_v38 = vrot.slane %v2837_v30, %v4977_v61 }
 0xdce   : > { %v2873_v57 = vrot.slane %v2858_v48, %v4886_v7  ;;  %v2952_v13 = vrot.slane %v2837_v30, %v5001_v28  ;;  %v2924_v5 = vrot.slane %v2909_v53, %v4889_v8  ;;  %v2956_v21 = vrot.slane %v2837_v30, %v4986_v6 }
 0xdcf   : > { %v2865_v16 = vrot.slane %v2850_v39, %v4886_v7  ;;  %v2869_v58 = vrot.slane %v2854_v63, %v4886_v7  ;;  %v2916_v51 = vrot.slane %v2901_v52, %v4889_v8  ;;  %v2920_v32 = vrot.slane %v2905_v38, %v4889_v8 }
 0xdd0   : > { %v2967_v40 = vrot.slane %v2952_v13, %v5001_v28  ;;  %v2971_v1 = vrot.slane %v2956_v21, %v5001_v28  ;;  %v3003_v26 = vrot.slane %v2837_v30, %v5056_v42  ;;  %v2975_v48 = vrot.slane %v2960_v45, %v5001_v28 }
 0xdd1   : > { %v3060_v53 = vrot.slane %v5880_v25, %v6795_v18  ;;  %v3097_v13 = vrot.slane %v5880_v25, %v4977_v61  ;;  %v3130_v45 = vrot.slane %v5880_v25, %v5001_v28 }
 0xdd8   : > { %v2896_v2 = vpop.permute.xlu1 %2895  ;;  %v2843_v0 = vpop.permute.xlu0 %2842 }
 0xdd9   : > { %v2874_v27 = vmul.f32 %v2865_v16, %v2843_v0  ;;  %v2875_v36 = vmul.f32 %v2869_v58, %v2843_v0  ;;  %v2876_v12 = vmul.f32 %v2873_v57, %v2843_v0  ;;  %v2925_v37 = vmul.f32 %v2916_v51, %v2896_v2 }
 0xdda   : > { %v2926_v33 = vmul.f32 %v2920_v32, %v2896_v2  ;;  %v2927_v29 = vmul.f32 %v2924_v5, %v2896_v2  ;;  %v3007_v16 = vrot.slane %v2837_v30, %v5039_v10  ;;  %v3011_v58 = vrot.slane %v2838_v31, %v5056_v42 }
 0xddb   : > { %2880 = vrot.lane.b32.xlu0 %v2874_v27, %s4647_s16  ;;  %2882 = vrot.lane.b32.xlu1 %v2875_v36, %s4647_s16  ;;  %v3018_v0 = vrot.slane %v3003_v26, %v5056_v42  ;;  %v3056_v57 = vrot.slane %v5880_v25, %v4886_v7  ;;  %v3070_v32 = vrot.slane %v3060_v53, %v4886_v7 }
 0xddc   : > { %v3022_v38 = vrot.slane %v3007_v16, %v5056_v42  ;;  %v3026_v30 = vrot.slane %v3011_v58, %v5056_v42  ;;  %v3134_v26 = vrot.slane %v5880_v25, %v4986_v6  ;;  %v3140_v58 = vrot.slane %v3130_v45, %v5001_v28 }
 0xddd   : > { %v2947_v24 = vpop.permute.xlu1 %2946  ;;  %v2998_v52 = vpop.permute.xlu0 %2997 }
 0xdde   : > { %v2976_v39 = vmul.f32 %v2967_v40, %v2947_v24  ;;  %v2977_v63 = vmul.f32 %v2971_v1, %v2947_v24  ;;  %v2978_v27 = vmul.f32 %v2975_v48, %v2947_v24  ;;  %v3027_v36 = vmul.f32 %v3018_v0, %v2998_v52 }
 0xddf   : > { %2884 = vrot.lane.b32.xlu0 %v2876_v12, %s4647_s16  ;;  %2931 = vrot.lane.b32.xlu1 %v2925_v37, %s4647_s16  ;;  %v3028_v51 = vmul.f32 %v3022_v38, %v2998_v52  ;;  %v3029_v12 = vmul.f32 %v3026_v30, %v2998_v52  ;;  %v3066_v24 = vrot.slane %v3056_v57, %v4886_v7 }
 0xde0   : > { %v3093_v37 = vrot.slane %v5880_v25, %v4889_v8  ;;  %v3167_v0 = vrot.slane %v5880_v25, %v5056_v42  ;;  %v3171_v38 = vrot.slane %v5880_v25, %v5039_v10 }
 0xde2   : > { %v3050_v62 = vpop.permute.xlu1 %3049  ;;  %v3103_v40 = vrot.slane %v3093_v37, %v4889_v8  ;;  %v3125_v48 = vpop.permute.xlu0 %3124 }
 0xde3   : > { %2933 = vrot.lane.b32.xlu0 %v2926_v33, %s4647_s16  ;;  %2935 = vrot.lane.b32.xlu1 %v2927_v29, %s4647_s16  ;;  %v3071_v21 = vmul.f32 %v3066_v24, %v3050_v62  ;;  %v3072_v29 = vmul.f32 %v3070_v32, %v3050_v62  ;;  %v3198_v62 = vld [vmem:[#allocation2 + $0xc] sm:$0xf] }
 0xde7   : > { %v3088_v2 = vpop.permute.xlu1 %3087  ;;  %2982 = vrot.lane.b32.xlu0 %v2976_v39, %s4647_s16  ;;  %2984 = vrot.lane.b32.xlu1 %v2977_v63, %s4647_s16  ;;  %v3107_v39 = vrot.slane %v3097_v13, %v4889_v8  ;;  %v3222_v45 = vpop.permute.xlu0 %3221 }
 0xde8   : > { %v3108_v63 = vmul.f32 %v3103_v40, %v3088_v2 }
 0xde9   : > { %v3109_v16 = vmul.f32 %v3107_v39, %v3088_v2  ;;  %v3145_v2 = vmul.f32 %v3140_v58, %v3125_v48 }
 0xdeb   : > { %2986 = vrot.lane.b32.xlu0 %v2978_v27, %s4647_s16  ;;  %3033 = vrot.lane.b32.xlu1 %v3027_v36, %s4647_s16  ;;  %v3144_v36 = vrot.slane %v3134_v26, %v5001_v28 }
 0xdec   : > { %v3162_v31 = vpop.permute.xlu1 %3161 }
 0xded   : > { %v3146_v30 = vmul.f32 %v3144_v36, %v3125_v48 }
 0xdef   : > { %3035 = vrot.lane.b32.xlu0 %v3028_v51, %s4647_s16  ;;  %3037 = vrot.lane.b32.xlu1 %v3029_v12, %s4647_s16  ;;  %v3177_v51 = vrot.slane %v3167_v0, %v5056_v42  ;;  %v3181_v12 = vrot.slane %v3171_v38, %v5056_v42  ;;  %s4257_s16 = sshll.u32 %s4857_s29, 3 }
 0xdf0   : > { %v3211_v5 = vpop.permute.xlu1 %3210 }
 0xdf1   : > { %v3212_v33 = vrot.slane %v3211_v5, 4  ;;  %v3182_v37 = vmul.f32 %v3177_v51, %v3162_v31 }
 0xdf3   : > { %v3213_v1 = vsel %vm414_vm0, %v3212_v33, %v3211_v5  ;;  %3075 = vrot.lane.b32.xlu0 %v3071_v21, %s4644_s8  ;;  %3077 = vrot.lane.b32.xlu1 %v3072_v29, %s4644_s8  ;;  %v6204_v57 = vmul.f32 %v3212_v33, %v3198_v62  ;;  %v3183_v5 = vmul.f32 %v3181_v12, %v3162_v31  ;;  %vm3442_vm0 = vcmask 121856  }
 0xdf4   : > { %v6194_v52 = vmul.f32 %v3213_v1, %v5880_v25  ;;  %v3275_v27 = vpop.permute.xlu1 %3274 }
 0xdf5   : > { %v3237_v13 = vrot.slane %v6204_v57, %v4886_v7  ;;  %v3288_v31 = vrot.slane %v6204_v57, %v4889_v8 }
 0xdf6   : > { %v3233_v53 = vrot.slane %v6194_v52, %v6795_v18  ;;  %v3229_v24 = vrot.slane %v6194_v52, %v4886_v7  ;;  %v3280_v21 = vrot.slane %v6194_v52, %v4889_v8  ;;  %v3284_v40 = vrot.slane %v6194_v52, %v4977_v61 }
 0xdf7   : > { %3112 = vrot.lane.b32.xlu0 %v3108_v63, %s4644_s8  ;;  %3114 = vrot.lane.b32.xlu1 %v3109_v16, %s4644_s8  ;;  %v3252_v26 = vrot.slane %v3237_v13, %v4886_v7  ;;  %v3331_v62 = vrot.slane %v6194_v52, %v5001_v28  ;;  %v3303_v0 = vrot.slane %v3288_v31, %v4889_v8 }
 0xdf8   : > { %v3248_v33 = vrot.slane %v3233_v53, %v4886_v7  ;;  %v3244_v29 = vrot.slane %v3229_v24, %v4886_v7  ;;  %v3295_v39 = vrot.slane %v3280_v21, %v4889_v8  ;;  %v3299_v16 = vrot.slane %v3284_v40, %v4889_v8 }
 0xdf9   : > { %v3326_v32 = vpop.permute.xlu1 %3325  ;;  %v3255_v58 = vmul.f32 %v3252_v26, %v3222_v45  ;;  %v3335_v38 = vrot.slane %v6194_v52, %v4986_v6  ;;  %v3339_v53 = vrot.slane %v6204_v57, %v5001_v28  ;;  %v3346_v51 = vrot.slane %v3331_v62, %v5001_v28  ;;  %v3377_v26 = vpop.permute.xlu0 %3376 }
 0xdfa   : > { %v3253_v1 = vmul.f32 %v3244_v29, %v3222_v45  ;;  %v3254_v63 = vmul.f32 %v3248_v33, %v3222_v45  ;;  %v3304_v36 = vmul.f32 %v3295_v39, %v3275_v27  ;;  %v3306_v12 = vmul.f32 %v3303_v0, %v3275_v27  ;;  %v3427_v45 = vld [vmem:[#allocation2 + $0xc] sm:$0xf] }
 0xdfb   : > { %3149 = vrot.lane.b32.xlu0 %v3145_v2, %s4644_s8  ;;  %3151 = vrot.lane.b32.xlu1 %v3146_v30, %s4644_s8  ;;  %v3305_v30 = vmul.f32 %v3299_v16, %v3275_v27  ;;  %v3350_v24 = vrot.slane %v3335_v38, %v5001_v28  ;;  %v3382_v13 = vrot.slane %v6194_v52, %v5056_v42 }
 0xdfc   : > { %v3355_v21 = vmul.f32 %v3346_v51, %v3326_v32  ;;  %v3386_v29 = vrot.slane %v6194_v52, %v5039_v10 }
 0xdfd   : > { %v3440_v48 = vpop.permute.xlu1 %3439  ;;  %v3356_v27 = vmul.f32 %v3350_v24, %v3326_v32  ;;  %v3397_v40 = vrot.slane %v3382_v13, %v5056_v42 }
 0xdfe   : > { %v3441_v2 = vrot.slane %v3440_v48, 4  ;;  %v3401_v52 = vrot.slane %v3386_v29, %v5056_v42 }
 0xdff   : > { %3186 = vrot.lane.b32.xlu0 %v3182_v37, %s4644_s8  ;;  %3188 = vrot.lane.b32.xlu1 %v3183_v5, %s4644_s8  ;;  %v3354_v5 = vrot.slane %v3339_v53, %v5001_v28  ;;  %v3406_v16 = vmul.f32 %v3397_v40, %v3377_v26  ;;  %s4258_s8 = sld [smem:[#allocation9 + $0x1]] }
 0xe00   : > { %v3443_v37 = vsel %vm3442_vm0, %v3441_v2, %v3440_v48  ;;  %v6257_v39 = vmul.f32 %v3441_v2, %v3427_v45  ;;  %v3505_v2 = vpop.permute.xlu0 %3504 }
 0xe01   : > { %v6248_v33 = vmul.f32 %v3443_v37, %v5880_v25  ;;  %v3357_v31 = vmul.f32 %v3354_v5, %v3326_v32 }
 0xe02   : > { %v3518_v13 = vrot.slane %v6257_v39, %v4889_v8 }
 0xe03   : > { %3259 = vrot.lane.b32.xlu0 %v3253_v1, %s4651_s14  ;;  %3261 = vrot.lane.b32.xlu1 %v3254_v63, %s4651_s14  ;;  %v3390_v1 = vrot.slane %v6204_v57, %v5056_v42  ;;  %v3459_v63 = vrot.slane %v6248_v33, %v4886_v7  ;;  %v3463_v48 = vrot.slane %v6248_v33, %v6795_v18 }
 0xe04   : > { %v3467_v57 = vrot.slane %v6257_v39, %v4886_v7  ;;  %v3510_v38 = vrot.slane %v6248_v33, %v4889_v8  ;;  %v3670_v5 = vpop.permute.xlu0 %3669  ;;  %v3561_v29 = vrot.slane %v6248_v33, %v5001_v28  ;;  %v3565_v45 = vrot.slane %v6248_v33, %v4986_v6 }
 0xe05   : > { %v3405_v62 = vrot.slane %v3390_v1, %v5056_v42  ;;  %v3474_v32 = vrot.slane %v3459_v63, %v4886_v7  ;;  %v3478_v0 = vrot.slane %v3463_v48, %v4886_v7  ;;  %v3533_v1 = vrot.slane %v3518_v13, %v4889_v8 }
 0xe06   : > { %v3482_v53 = vrot.slane %v3467_v57, %v4886_v7  ;;  %v3525_v37 = vrot.slane %v3510_v38, %v4889_v8  ;;  %v3576_v48 = vrot.slane %v3561_v29, %v5001_v28 }
 0xe07   : > { %3263 = vrot.lane.b32.xlu0 %v3255_v58, %s4651_s14  ;;  %3310 = vrot.lane.b32.xlu1 %v3304_v36, %s4651_s14  ;;  %v3407_v58 = vmul.f32 %v3401_v52, %v3377_v26  ;;  %v3408_v36 = vmul.f32 %v3405_v62, %v3377_v26  ;;  %v2187_v26 = vld [vmem:[#allocation2 + $0x8] sm:$0xf]  ;;  %v3569_v52 = vrot.slane %v6257_v39, %v5001_v28 }
 0xe08   : > { %v3534_v40 = vmul.f32 %v3525_v37, %v3505_v2  ;;  %v3580_v62 = vrot.slane %v3565_v45, %v5001_v28  ;;  %v3536_v57 = vmul.f32 %v3533_v1, %v3505_v2  ;;  %v2259_v45 = vrot.slane %v6080_v47, %v4977_v61 }
 0xe0b   : > { %3312 = vrot.lane.b32.xlu0 %v3305_v30, %s4651_s14  ;;  %3314 = vrot.lane.b32.xlu1 %v3306_v12, %s4651_s14  ;;  %v3452_v30 = vpop.permute.xlu1 %3451  ;;  %v3514_v12 = vrot.slane %v6248_v33, %v4977_v61 }
 0xe0c   : > { %v3483_v51 = vmul.f32 %v3474_v32, %v3452_v30  ;;  %v3484_v24 = vmul.f32 %v3478_v0, %v3452_v30  ;;  %v6297_v32 = vmul.f32 %v2201_v54, %v2187_v26  ;;  %v3612_v0 = vrot.slane %v6248_v33, %v5056_v42 }
 0xe0d   : > { %v2222_v54 = vrot.slane %v6080_v47, %v6795_v18 }
 0xe0e   : > { %v3627_v37 = vrot.slane %v3612_v0, %v5056_v42  ;;  %v2263_v26 = vrot.slane %v6297_v32, %v4889_v8  ;;  %v2274_v0 = vrot.slane %v2259_v45, %v4889_v8 }
 0xe0f   : > { %3361 = vrot.lane.b32.xlu0 %v3355_v21, %s4651_s14  ;;  %3363 = vrot.lane.b32.xlu1 %v3356_v27, %s4651_s14  ;;  %v3485_v21 = vmul.f32 %v3482_v53, %v3452_v30  ;;  %v3529_v27 = vrot.slane %v3514_v12, %v4889_v8  ;;  %v3556_v63 = vpop.permute.xlu1 %3555  ;;  %v3657_v30 = vld [vmem:[#allocation2 + $0xc] sm:$0xf]  ;;  %v2237_v29 = vrot.slane %v2222_v54, %v4886_v7 }
 0xe10   : > { %v3585_v38 = vmul.f32 %v3576_v48, %v3556_v63  ;;  %v3586_v53 = vmul.f32 %v3580_v62, %v3556_v63 }
 0xe13   : > { %3365 = vrot.lane.b32.xlu0 %v3357_v31, %s4651_s14  ;;  %3412 = vrot.lane.b32.xlu1 %v3406_v16, %s4651_s14  ;;  %v3671_v31 = vrot.slane %v3670_v5, 4  ;;  %v3535_v16 = vmul.f32 %v3529_v27, %v3505_v2  ;;  %v3620_v2 = vrot.slane %v6257_v39, %v5056_v42  ;;  %v3607_v43 = vpop.permute.xlu1 %3606 }
 0xe15   : > { %v6319_v39 = vmul.f32 %v3671_v31, %v3657_v30 }
 0xe17   : > { %3414 = vrot.lane.b32.xlu0 %v3407_v58, %s4651_s14  ;;  %3416 = vrot.lane.b32.xlu1 %v3408_v36, %s4651_s14  ;;  %v3672_v58 = vsel %vm862_vm2, %v3671_v31, %v3670_v5  ;;  %v3584_v36 = vrot.slane %v3569_v52, %v5001_v28  ;;  %v3635_v5 = vrot.slane %v3620_v2, %v5056_v42  ;;  %vm3901_vm2 = vcmask 138240   ;;  %s4264_s14 = sshll.u32 %s4728_s22, 7 }
 0xe18   : > { %v6312_v12 = vmul.f32 %v3672_v58, %v5880_v25  ;;  %v3747_v54 = vrot.slane %v6319_v39, %v4889_v8  ;;  %s6552_s15 = scalar_lea.hbm %s6602_s5, %s4264_s14 }
 0xe19   : > { %v3587_v13 = vmul.f32 %v3584_v36, %v3556_v63  ;;  %v3696_v63 = vrot.slane %v6319_v39, %v4886_v7  ;;  %v3638_v48 = vmul.f32 %v3635_v5, %v3607_v43  ;;  %v2296_v36 = vrot.slane %v6080_v47, %v4986_v6 }
 0xe1a   : > { %v3692_v1 = vrot.slane %v6312_v12, %v6795_v18  ;;  %v3739_v52 = vrot.slane %v6312_v12, %v4889_v8 }
 0xe1b   : > { %3489 = vrot.lane.b32.xlu0 %v3483_v51, %s4657_s17  ;;  %3491 = vrot.lane.b32.xlu1 %v3484_v24, %s4657_s17  ;;  %v2226_v51 = vrot.slane %v6297_v32, %v4886_v7  ;;  %v3616_v24 = vrot.slane %v6248_v33, %v5039_v10  ;;  %v3688_v33 = vrot.slane %v6312_v12, %v4886_v7 }
 0xe1c   : > { %v3707_v30 = vrot.slane %v3692_v1, %v4886_v7  ;;  %v3711_v2 = vrot.slane %v3696_v63, %v4886_v7 }
 0xe1d   : > { %v2241_v25 = vrot.slane %v2226_v51, %v4886_v7  ;;  %v3631_v27 = vrot.slane %v3616_v24, %v5056_v42  ;;  %v3703_v58 = vrot.slane %v3688_v33, %v4886_v7  ;;  %v3754_v51 = vrot.slane %v3739_v52, %v4889_v8 }
 0xe1e   : > { %v2337_v33 = vrot.slane %v6297_v32, %v5056_v42 }
 0xe1f   : > { %3493 = vrot.lane.b32.xlu0 %v3485_v21, %s4657_s17  ;;  %3540 = vrot.lane.b32.xlu1 %v3534_v40, %s4657_s17  ;;  %v3636_v21 = vmul.f32 %v3627_v37, %v3607_v43  ;;  %v3681_v40 = vpop.permute.xlu1 %3680  ;;  %v3637_v31 = vmul.f32 %v3631_v27, %v3607_v43  ;;  %v2244_v62 = vmul.f32 %v2241_v25, %v5887_v22 }
 0xe20   : > { %v3712_v43 = vmul.f32 %v3703_v58, %v3681_v40  ;;  %v3713_v24 = vmul.f32 %v3707_v30, %v3681_v40 }
 0xe21   : > { %v2247_v5 = vadd.f32 %v2244_v62, %v5883_v4 }
 0xe23   : > { %3542 = vrot.lane.b32.xlu0 %v3535_v16, %s4657_s17  ;;  %3544 = vrot.lane.b32.xlu1 %v3536_v57, %s4657_s17  ;;  %v2243_v16 = vmul.f32 %v2237_v29, %v5887_v22  ;;  %v3734_v57 = vpop.permute.xlu0 %3733  ;;  %v3743_v22 = vrot.slane %v6312_v12, %v4977_v61  ;;  %v3785_v37 = vpop.permute.xlu1 %3784  ;;  %v2311_v29 = vrot.slane %v2296_v36, %v5001_v28 }
 0xe24   : > { %v3763_v63 = vmul.f32 %v3754_v51, %v3734_v57  ;;  %v3798_v36 = vrot.slane %v6319_v39, %v5001_v28 }
 0xe25   : > { %v3758_v45 = vrot.slane %v3743_v22, %v4889_v8 }
 0xe27   : > { %3591 = vrot.lane.b32.xlu0 %v3585_v38, %s4657_s17  ;;  %3593 = vrot.lane.b32.xlu1 %v3586_v53, %s4657_s17  ;;  %v2300_v38 = vrot.slane %v6297_v32, %v5001_v28  ;;  %v2278_v53 = vrot.slane %v2263_v26, %v4889_v8  ;;  %v3899_v1 = vpop.permute.xlu0 %3898  ;;  %v3714_v26 = vmul.f32 %v3711_v2, %v3681_v40  ;;  %v3836_v58 = vpop.permute.xlu1 %3835 }
 0xe28   : > { %v3900_v62 = vrot.slane %v3899_v1, 4  ;;  %v3794_v40 = vrot.slane %v6312_v12, %v4986_v6 }
 0xe29   : > { %v2315_v25 = vrot.slane %v2300_v38, %v5001_v28  ;;  %v2281_v27 = vmul.f32 %v2278_v53, %v5889_v50 }
 0xe2a   : > { %v3809_v51 = vrot.slane %v3794_v40, %v5001_v28 }
 0xe2b   : > { %3595 = vrot.lane.b32.xlu0 %v3587_v13, %s4657_s17  ;;  %3642 = vrot.lane.b32.xlu1 %v3636_v21, %s4657_s17  ;;  %v2246_v13 = vadd.f32 %v2243_v16, %v5883_v4  ;;  %v2280_v21 = vmul.f32 %v2274_v0, %v5889_v50  ;;  %v2333_v4 = vrot.slane %v6080_v47, %v5039_v10 }
 0xe2c   : > { %v3790_v16 = vrot.slane %v6312_v12, %v5001_v28  ;;  %v2317_v50 = vmul.f32 %v2311_v29, %v5891_v15  ;;  %v2318_v32 = vmul.f32 %v2315_v25, %v5891_v15  ;;  %v2352_v47 = vrot.slane %v2337_v33, %v5056_v42  ;;  %v3911_v25 = vpop.permute.xlu1 %3910  ;;  %v4466_v33 = vld [vmem:[#allocation2 + $0x4] sm:$0xff] }
 0xe2d   : > { %v2283_v52 = vadd.f32 %v2280_v21, %v2246_v13  ;;  %v3764_v0 = vmul.f32 %v3758_v45, %v3734_v57  ;;  %v2348_v38 = vrot.slane %v2333_v4, %v5056_v42  ;;  %v3815_v21 = vmul.f32 %v3809_v51, %v3785_v37 }
 0xe2e   : > { %v2355_v15 = vmul.f32 %v2352_v47, %v5896_v23  ;;  %v3805_v2 = vrot.slane %v3790_v16, %v5001_v28  ;;  %v3849_v29 = vrot.slane %v6319_v39, %v5056_v42 }
 0xe2f   : > { %3644 = vrot.lane.b32.xlu0 %v3637_v31, %s4657_s17  ;;  %3646 = vrot.lane.b32.xlu1 %v3638_v48, %s4657_s17  ;;  %v3762_v31 = vrot.slane %v3747_v54, %v4889_v8  ;;  %v2284_v48 = vadd.f32 %v2281_v27, %v2247_v5  ;;  %v2320_v53 = vadd.f32 %v2317_v50, %v2283_v52  ;;  %v3886_v5 = vld [vmem:[#allocation2 + $0xc] sm:$0xf]  ;;  %s269_s17 = scalar_lea.vmem [#allocation10], %s4257_s16 }
 0xe30   : > { %v3902_v54 = vsel %vm3901_vm2, %v3900_v62, %v3899_v1  ;;  %v3814_v13 = vmul.f32 %v3805_v2, %v3785_v37  ;;  %v3845_v1 = vrot.slane %v6312_v12, %v5039_v10  ;;  %v2530_v50 = vsel %vm467_vm7, %v5954_v11, %v5962_v44 }
 0xe31   : > { %v3765_v30 = vmul.f32 %v3762_v31, %v3734_v57  ;;  %v2321_v22 = vadd.f32 %v2318_v32, %v2284_v48  ;;  %v3813_v57 = vrot.slane %v3798_v36, %v5001_v28  ;;  %v6398_v45 = vmul.f32 %v4466_v33, %v3902_v54 }
 0xe32   : > { %v2479_v31 = vsel %vm467_vm7, %v5950_v34, %v5956_v14  ;;  %v3864_v48 = vrot.slane %v3849_v29, %v5056_v42  ;;  %v3860_v32 = vrot.slane %v3845_v1, %v5056_v42  ;;  %v2581_v11 = vsel %vm467_vm7, %v5958_v17, %v5972_v56 }
 0xe33   : > { %3718 = vrot.lane.b32.xlu0 %v3712_v43, %s4663_s11  ;;  %3720 = vrot.lane.b32.xlu1 %v3713_v24, %s4663_s11  ;;  %v2354_v43 = vmul.f32 %v2348_v38, %v5896_v23  ;;  %v3841_v24 = vrot.slane %v6312_v12, %v5056_v42  ;;  %v2358_v27 = vadd.f32 %v2355_v15, %v2321_v22  ;;  %v3964_v22 = vpop.permute.xlu0 %3963 }
 0xe34   : > { %v2428_v23 = vsel %vm467_vm7, %v5946_v46, %v5948_v19  ;;  %v6409_v46 = vmul.f32 %v3900_v62, %v3886_v5  ;;  %v6422_v62 = vpop.permute.xlu1 %4014  ;;  %v3866_v40 = vmul.f32 %v3860_v32, %v3836_v58  ;;  %v3969_v36 = vrot.slane %v6398_v45, %v4889_v8 }
 0xe35   : > { %v3856_v4 = vrot.slane %v3841_v24, %v5056_v42  ;;  %v2434_v39 = vadd.f32 %v5948_v19, %v2358_v27  ;;  %v3918_v19 = vrot.slane %v6398_v45, %v4886_v7  ;;  %v3867_v38 = vmul.f32 %v3864_v48, %v3836_v58 }
 0xe36   : > { %v3926_v47 = vrot.slane %v6409_v46, %v4886_v7  ;;  %v2658_v17 = vsel %vm691_vm8, %v5987_v41, %v6100_v35  ;;  %v3977_v41 = vrot.slane %v6409_v46, %v4889_v8  ;;  %v3984_v54 = vrot.slane %v3969_v36, %v4889_v8 }
 0xe37   : > { %3722 = vrot.lane.b32.xlu0 %v3714_v26, %s4663_s11  ;;  %3769 = vrot.lane.b32.xlu1 %v3763_v63, %s4663_s11  ;;  %v2357_v26 = vadd.f32 %v2354_v43, %v2320_v53  ;;  %v3816_v63 = vmul.f32 %v3813_v57, %v3785_v37  ;;  %v3865_v12 = vmul.f32 %v3856_v4, %v3836_v58 }
 0xe38   : > { %v2485_v16 = vadd.f32 %v5956_v14, %v2434_v39  ;;  %v3922_v37 = vrot.slane %v6398_v45, %v6795_v18  ;;  %v3973_v58 = vrot.slane %v6398_v45, %v4977_v61  ;;  %v2709_v43 = vsel %vm691_vm8, %v6001_v60, %v6108_v59  ;;  %v6451_v24 = vpop.permute.xlu1 %4065 }
 0xe39   : > { %v2433_v52 = vadd.f32 %v2428_v23, %v2357_v26  ;;  %v2811_v29 = vsel %vm691_vm8, %v6128_v49, %v6137_v55  ;;  %v3992_v27 = vrot.slane %v3977_v41, %v4889_v8  ;;  %v4028_v4 = vrot.slane %v6409_v46, %v5001_v28 }
 0xe3a   : > { %v2536_v14 = vadd.f32 %v5962_v44, %v2485_v16  ;;  %v3937_v53 = vrot.slane %v3922_v37, %v4886_v7  ;;  %v3988_v57 = vrot.slane %v3973_v58, %v4889_v8 }
 0xe3b   : > { %3771 = vrot.lane.b32.xlu0 %v3764_v0, %s4663_s11  ;;  %3773 = vrot.lane.b32.xlu1 %v3765_v30, %s4663_s11  ;;  %v2484_v34 = vadd.f32 %v2479_v31, %v2433_v52  ;;  %v3933_v30 = vrot.slane %v3918_v19, %v4886_v7  ;;  %v3995_v31 = vmul.f32 %v3992_v27, %v3964_v22 }
 0xe3c   : > { %v2587_v18 = vadd.f32 %v5972_v56, %v2536_v14  ;;  %v3941_v56 = vrot.slane %v3926_v47, %v4886_v7  ;;  %v3943_v51 = vmul.f32 %v3937_v53, %v3911_v25  ;;  %v2760_v7 = vsel %vm691_vm8, %v6015_v20, %v6124_v9 }
 0xe3d   : > { %v2535_v0 = vadd.f32 %v2530_v50, %v2484_v34  ;;  %v3942_v2 = vmul.f32 %v3933_v30, %v3911_v25  ;;  %v4020_v20 = vrot.slane %v6398_v45, %v5001_v28  ;;  %v3994_v49 = vmul.f32 %v3988_v57, %v3964_v22 }
 0xe3e   : > { %v2664_v15 = vadd.f32 %v6100_v35, %v2587_v18  ;;  %v4043_v16 = vrot.slane %v4028_v4, %v5001_v28  ;;  %v4079_v34 = vrot.slane %v6409_v46, %v5056_v42  ;;  %vm4136_vm8 = vcmask 1043456  }
 0xe3f   : > { %3820 = vrot.lane.b32.xlu0 %v3814_v13, %s4663_s11  ;;  %3822 = vrot.lane.b32.xlu1 %v3815_v21, %s4663_s11  ;;  %v2586_v44 = vadd.f32 %v2581_v11, %v2535_v0  ;;  %v3944_v13 = vmul.f32 %v3941_v56, %v3911_v25  ;;  %v4075_v11 = vrot.slane %v6398_v45, %v5039_v10 }
 0xe40   : > { %v2715_v61 = vadd.f32 %v6108_v59, %v2664_v15  ;;  %v3993_v59 = vmul.f32 %v3984_v54, %v3964_v22  ;;  %v4094_v18 = vrot.slane %v4079_v34, %v5056_v42 }
 0xe41   : > { %v2663_v35 = vadd.f32 %v2658_v17, %v2586_v44  ;;  %v4090_v10 = vrot.slane %v4075_v11, %v5056_v42 }
 0xe42   : > { %v2766_v21 = vadd.f32 %v6124_v9, %v2715_v61  ;;  %v4024_v9 = vrot.slane %v6398_v45, %v4986_v6 }
 0xe43   : > { %3824 = vrot.lane.b32.xlu0 %v3816_v63, %s4663_s11  ;;  %3871 = vrot.lane.b32.xlu1 %v3865_v12, %s4663_s11  ;;  %v2714_v60 = vadd.f32 %v2709_v43, %v2663_v35  ;;  %v4096_v53 = vmul.f32 %v4090_v10, %v6451_v24 }
 0xe44   : > { %v2817_v25 = vadd.f32 %v6137_v55, %v2766_v21  ;;  %v4035_v55 = vrot.slane %v4020_v20, %v5001_v28  ;;  %v4039_v6 = vrot.slane %v4024_v9, %v5001_v28 }
 0xe45   : > { %v2765_v33 = vadd.f32 %v2760_v7, %v2714_v60 }
 0xe46   : > { %v4044_v50 = vmul.f32 %v4035_v55, %v6422_v62  ;;  %v4045_v19 = vmul.f32 %v4039_v6, %v6422_v62 }
 0xe47   : > { %3873 = vrot.lane.b32.xlu0 %v3866_v40, %s4663_s11  ;;  %3875 = vrot.lane.b32.xlu1 %v3867_v38, %s4663_s11  ;;  %v2816_v8 = vadd.f32 %v2811_v29, %v2765_v33  ;;  %v4046_v38 = vmul.f32 %v4043_v16, %v6422_v62  ;;  %v4097_v62 = vmul.f32 %v4094_v18, %v6451_v24  ;;  %s4156_s11 = sshll.u32 %s269_s17, 4  ;;  %s6554_s11 = int_to_ptr.vmem [resolvable:$true] %s4156_s11 }
 0xe48   : > { %s4540_s22 = scalar_lea.vmem %s6554_s11, 128  ;;  %p4547_p1 = scmp.lt.s32.totalorder %s6554_s11, %s4545_s9 }
 0xe49   : > { %p4541_p9 = scmp.ne.s32.totalorder %s6554_s11, %s4540_s22  ;;  %p4548_p6 = scmp.lt.s32.totalorder %s4546_s30, %s4540_s22 }
 0xe4b   : > { %3948 = vrot.lane.b32.xlu0 %v3942_v2, %s4669_s27  ;;  %3950 = vrot.lane.b32.xlu1 %v3943_v51, %s4669_s27  ;;  %p4542_p12 = pnand %p4541_p9, %p4808_p7  ;;  %p4549_p8 = por %p4548_p6, %p4547_p1 }
 0xe4d   : > { %v2881_v5 = vpop.permute.xlu0 %2880  ;;  %v2883_v23 = vpop.permute.xlu1 %2882  ;;  %p4543_p10 = pneg %p4542_p12 }
 0xe4e   : > { %v2886_v1 = vsel %vm915_vm9, %v2881_v5, %v2883_v23 }
 0xe4f   : > { %3952 = vrot.lane.b32.xlu0 %v3944_v13, %s4669_s27  ;;  %v2891_v26 = vadd.f32 %v2886_v1, %v6132_v3  ;;  %3999 = vrot.lane.b32.xlu1 %v3993_v59, %s4669_s27  ;;  %v4071_v3 = vrot.slane %v6398_v45, %v5056_v42  ;;  %p4550_p13 = pnand %p4549_p8, %p4543_p10 }
 0xe51   : > { %v2885_v39 = vpop.permute.xlu0 %2884  ;;  %v2932_v63 = vpop.permute.xlu1 %2931  ;;  %v4086_v28 = vrot.slane %v4071_v3, %v5056_v42 }
 0xe52   : > { %v2887_v52 = vsel %vm915_vm9, %v2883_v23, %v2885_v39  ;;  %v2893_v48 = vadd.f32 %v2885_v39, %v2817_v25 }
 0xe53   : > { %v2892_v12 = vadd.f32 %v2887_v52, %v2816_v8  ;;  %4001 = vrot.lane.b32.xlu0 %v3994_v49, %s4669_s27  ;;  %4003 = vrot.lane.b32.xlu1 %v3995_v31, %s4669_s27  ;;  %v4095_v30 = vmul.f32 %v4086_v28, %v6451_v24 }
 0xe55   : > { %v2934_v32 = vpop.permute.xlu0 %2933  ;;  %v2936_v37 = vpop.permute.xlu1 %2935 }
 0xe56   : > { %v2937_v14 = vsel %vm915_vm9, %v2932_v63, %v2934_v32  ;;  %v2944_v40 = vadd.f32 %v2936_v37, %v2893_v48  ;;  %v2938_v47 = vsel %vm915_vm9, %v2934_v32, %v2936_v37 }
 0xe57   : > { %v2942_v0 = vadd.f32 %v2937_v14, %v2891_v26  ;;  %4050 = vrot.lane.b32.xlu0 %v4044_v50, %s4669_s27  ;;  %v2943_v36 = vadd.f32 %v2938_v47, %v2892_v12  ;;  %4052 = vrot.lane.b32.xlu1 %v4045_v19, %s4669_s27 }
 0xe59   : > { %v2983_v46 = vpop.permute.xlu0 %2982  ;;  %v2985_v44 = vpop.permute.xlu1 %2984 }
 0xe5a   : > { %v2988_v45 = vsel %vm915_vm9, %v2983_v46, %v2985_v44 }
 0xe5b   : > { %4054 = vrot.lane.b32.xlu0 %v4046_v38, %s4669_s27  ;;  %v2993_v17 = vadd.f32 %v2988_v45, %v2942_v0  ;;  %4101 = vrot.lane.b32.xlu1 %v4095_v30, %s4669_s27 }
 0xe5d   : > { %v2987_v15 = vpop.permute.xlu0 %2986  ;;  %v3034_v58 = vpop.permute.xlu1 %3033 }
 0xe5e   : > { %v2989_v22 = vsel %vm915_vm9, %v2985_v44, %v2987_v15  ;;  %v2995_v56 = vadd.f32 %v2987_v15, %v2944_v40 }
 0xe5f   : > { %v2994_v2 = vadd.f32 %v2989_v22, %v2943_v36  ;;  %4103 = vrot.lane.b32.xlu0 %v4096_v53, %s4669_s27  ;;  %4105 = vrot.lane.b32.xlu1 %v4097_v62, %s4669_s27 }
 0xe61   : > { %v3036_v42 = vpop.permute.xlu0 %3035  ;;  %v3038_v43 = vpop.permute.xlu1 %3037 }
 0xe62   : > { %v3039_v41 = vsel %vm915_vm9, %v3034_v58, %v3036_v42  ;;  %v3046_v54 = vadd.f32 %v3038_v43, %v2995_v56  ;;  %v3040_v51 = vsel %vm915_vm9, %v3036_v42, %v3038_v43 }
 0xe63   : > { %v3044_v35 = vadd.f32 %v3039_v41, %v2993_v17  ;;  %v3045_v61 = vadd.f32 %v3040_v51, %v2994_v2 }
 0xe65   : > { %v3076_v7 = vpop.permute.xlu0 %3075  ;;  %v3078_v24 = vpop.permute.xlu1 %3077 }
 0xe66   : > { %v3083_v60 = vadd.f32 %v3076_v7, %v3044_v35  ;;  %v3085_v57 = vadd.f32 %v3078_v24, %v3046_v54  ;;  %v3079_v13 = vsel %vm1116_vm10, %v3076_v7, %v3078_v24 }
 0xe67   : > { %v3084_v5 = vadd.f32 %v3079_v13, %v3045_v61 }
 0xe69   : > { %v3113_v21 = vpop.permute.xlu0 %3112  ;;  %v3115_v29 = vpop.permute.xlu1 %3114 }
 0xe6a   : > { %v3120_v27 = vadd.f32 %v3113_v21, %v3083_v60  ;;  %v3122_v59 = vadd.f32 %v3115_v29, %v3085_v57  ;;  %v3116_v23 = vsel %vm1116_vm10, %v3113_v21, %v3115_v29 }
 0xe6b   : > { %v3121_v33 = vadd.f32 %v3116_v23, %v3084_v5 }
 0xe6d   : > { %v3150_v20 = vpop.permute.xlu0 %3149  ;;  %v3152_v1 = vpop.permute.xlu1 %3151 }
 0xe6e   : > { %v3157_v25 = vadd.f32 %v3150_v20, %v3120_v27  ;;  %v3159_v9 = vadd.f32 %v3152_v1, %v3122_v59  ;;  %v3153_v26 = vsel %vm1116_vm10, %v3150_v20, %v3152_v1 }
 0xe6f   : > { %v3158_v8 = vadd.f32 %v3153_v26, %v3121_v33 }
 0xe71   : > { %v3187_v49 = vpop.permute.xlu0 %3186  ;;  %v3189_v4 = vpop.permute.xlu1 %3188 }
 0xe72   : > { %v3194_v39 = vadd.f32 %v3187_v49, %v3157_v25  ;;  %v3196_v31 = vadd.f32 %v3189_v4, %v3159_v9  ;;  %v3190_v63 = vsel %vm1116_vm10, %v3187_v49, %v3189_v4 }
 0xe73   : > { %v3195_v52 = vadd.f32 %v3190_v63, %v3158_v8 }
 0xe75   : > { %v3260_v48 = vpop.permute.xlu0 %3259  ;;  %v3262_v55 = vpop.permute.xlu1 %3261 }
 0xe76   : > { %v3270_v22 = vadd.f32 %v3260_v48, %v3194_v39  ;;  %v3265_v2 = vsel %vm1338_vm11, %v3260_v48, %v3262_v55 }
 0xe77   : > { %v3271_v51 = vadd.f32 %v3265_v2, %v3195_v52 }
 0xe79   : > { %v3264_v12 = vpop.permute.xlu0 %3263  ;;  %v3311_v6 = vpop.permute.xlu1 %3310 }
 0xe7a   : > { %v3321_v43 = vadd.f32 %v3311_v6, %v3270_v22  ;;  %v3266_v41 = vsel %vm1338_vm11, %v3262_v55, %v3264_v12 }
 0xe7b   : > { %v3272_v24 = vadd.f32 %v3266_v41, %v3196_v31 }
 0xe7d   : > { %v3313_v3 = vpop.permute.xlu0 %3312  ;;  %v3315_v16 = vpop.permute.xlu1 %3314 }
 0xe7e   : > { %v3316_v54 = vsel %vm1338_vm11, %v3311_v6, %v3313_v3  ;;  %v3317_v35 = vsel %vm1338_vm11, %v3313_v3, %v3315_v16 }
 0xe7f   : > { %v3322_v13 = vadd.f32 %v3316_v54, %v3271_v51  ;;  %v3323_v29 = vadd.f32 %v3317_v35, %v3272_v24 }
 0xe81   : > { %v3362_v50 = vpop.permute.xlu0 %3361  ;;  %v3364_v32 = vpop.permute.xlu1 %3363 }
 0xe82   : > { %v3372_v61 = vadd.f32 %v3362_v50, %v3321_v43  ;;  %v3367_v60 = vsel %vm1338_vm11, %v3362_v50, %v3364_v32 }
 0xe83   : > { %v3373_v59 = vadd.f32 %v3367_v60, %v3322_v13 }
 0xe85   : > { %v3366_v19 = vpop.permute.xlu0 %3365  ;;  %v3413_v34 = vpop.permute.xlu1 %3412 }
 0xe86   : > { %v3423_v5 = vadd.f32 %v3413_v34, %v3372_v61  ;;  %v3368_v21 = vsel %vm1338_vm11, %v3364_v32, %v3366_v19 }
 0xe87   : > { %v3374_v1 = vadd.f32 %v3368_v21, %v3323_v29 }
 0xe89   : > { %v3415_v37 = vpop.permute.xlu0 %3414  ;;  %v3417_v14 = vpop.permute.xlu1 %3416 }
 0xe8a   : > { %v3418_v27 = vsel %vm1338_vm11, %v3413_v34, %v3415_v37  ;;  %v3419_v23 = vsel %vm1338_vm11, %v3415_v37, %v3417_v14 }
 0xe8b   : > { %v3424_v26 = vadd.f32 %v3418_v27, %v3373_v59  ;;  %v3425_v4 = vadd.f32 %v3419_v23, %v3374_v1 }
 0xe8d   : > { %v3490_v11 = vpop.permute.xlu0 %3489  ;;  %v3492_v40 = vpop.permute.xlu1 %3491 }
 0xe8e   : > { %v3500_v33 = vadd.f32 %v3490_v11, %v3423_v5  ;;  %v3495_v25 = vsel %vm1562_vm12, %v3490_v11, %v3492_v40 }
 0xe8f   : > { %v3501_v31 = vadd.f32 %v3495_v25, %v3424_v26  ;;  %v4119_v26 = vstv %s4258_s8 }
 0xe91   : > { %v3494_v47 = vpop.permute.xlu0 %3493  ;;  %v3541_v0 = vpop.permute.xlu1 %3540 }
 0xe92   : > { %v3551_v8 = vadd.f32 %v3541_v0, %v3500_v33  ;;  %v3496_v49 = vsel %vm1562_vm12, %v3492_v40, %v3494_v47 }
 0xe93   : > { %v3502_v55 = vadd.f32 %v3496_v49, %v3425_v4 }
 0xe95   : > { %v3543_v28 = vpop.permute.xlu0 %3542  ;;  %v3545_v36 = vpop.permute.xlu1 %3544 }
 0xe96   : > { %v3546_v39 = vsel %vm1562_vm12, %v3541_v0, %v3543_v28  ;;  %v3547_v63 = vsel %vm1562_vm12, %v3543_v28, %v3545_v36 }
 0xe97   : > { %v3552_v3 = vadd.f32 %v3546_v39, %v3501_v31  ;;  %v3553_v32 = vadd.f32 %v3547_v63, %v3502_v55 }
 0xe99   : > { %v3592_v38 = vpop.permute.xlu0 %3591  ;;  %v3594_v46 = vpop.permute.xlu1 %3593 }
 0xe9a   : > { %v3602_v52 = vadd.f32 %v3592_v38, %v3551_v8  ;;  %v3597_v12 = vsel %vm1562_vm12, %v3592_v38, %v3594_v46 }
 0xe9b   : > { %v3603_v34 = vadd.f32 %v3597_v12, %v3552_v3 }
 0xe9d   : > { %v3596_v18 = vpop.permute.xlu0 %3595  ;;  %v3643_v30 = vpop.permute.xlu1 %3642 }
 0xe9e   : > { %v3653_v16 = vadd.f32 %v3643_v30, %v3602_v52  ;;  %v3598_v50 = vsel %vm1562_vm12, %v3594_v46, %v3596_v18 }
 0xe9f   : > { %v3604_v40 = vadd.f32 %v3598_v50, %v3553_v32 }
 0xea1   : > { %v3645_v44 = vpop.permute.xlu0 %3644  ;;  %v3647_v10 = vpop.permute.xlu1 %3646 }
 0xea2   : > { %v3648_v19 = vsel %vm1562_vm12, %v3643_v30, %v3645_v44  ;;  %v3649_v37 = vsel %vm1562_vm12, %v3645_v44, %v3647_v10 }
 0xea3   : > { %v3654_v28 = vadd.f32 %v3648_v19, %v3603_v34  ;;  %v3655_v22 = vadd.f32 %v3649_v37, %v3604_v40 }
 0xea5   : > { %v3719_v45 = vpop.permute.xlu0 %3718  ;;  %v3721_v17 = vpop.permute.xlu1 %3720 }
 0xea6   : > { %v3729_v14 = vadd.f32 %v3719_v45, %v3653_v16  ;;  %v3724_v47 = vsel %vm1786_vm13, %v3719_v45, %v3721_v17 }
 0xea7   : > { %v3730_v46 = vadd.f32 %v3724_v47, %v3654_v28 }
 0xea9   : > { %v3723_v53 = vpop.permute.xlu0 %3722  ;;  %v3770_v15 = vpop.permute.xlu1 %3769 }
 0xeaa   : > { %v3780_v36 = vadd.f32 %v3770_v15, %v3729_v14  ;;  %v3725_v38 = vsel %vm1786_vm13, %v3721_v17, %v3723_v53 }
 0xeab   : > { %v3731_v41 = vadd.f32 %v3725_v38, %v3655_v22 }
 0xead   : > { %v3772_v62 = vpop.permute.xlu0 %3771  ;;  %v3774_v58 = vpop.permute.xlu1 %3773 }
 0xeae   : > { %v3775_v2 = vsel %vm1786_vm13, %v3770_v15, %v3772_v62  ;;  %v3776_v18 = vsel %vm1786_vm13, %v3772_v62, %v3774_v58 }
 0xeaf   : > { %v3781_v54 = vadd.f32 %v3775_v2, %v3730_v46  ;;  %v3782_v35 = vadd.f32 %v3776_v18, %v3731_v41 }
 0xeb1   : > { %v3821_v56 = vpop.permute.xlu0 %3820  ;;  %v3823_v42 = vpop.permute.xlu1 %3822 }
 0xeb2   : > { %v3831_v30 = vadd.f32 %v3821_v56, %v3780_v36  ;;  %v3826_v44 = vsel %vm1786_vm13, %v3821_v56, %v3823_v42 }
 0xeb3   : > { %v3832_v17 = vadd.f32 %v3826_v44, %v3781_v54 }
 0xeb5   : > { %v3825_v7 = vpop.permute.xlu0 %3824  ;;  %v3872_v57 = vpop.permute.xlu1 %3871 }
 0xeb6   : > { %v3882_v51 = vadd.f32 %v3872_v57, %v3831_v30  ;;  %v3827_v45 = vsel %vm1786_vm13, %v3823_v42, %v3825_v7 }
 0xeb7   : > { %v3833_v62 = vadd.f32 %v3827_v45, %v3782_v35 }
 0xeb9   : > { %v3874_v20 = vpop.permute.xlu0 %3873  ;;  %v3876_v9 = vpop.permute.xlu1 %3875 }
 0xeba   : > { %v3877_v61 = vsel %vm1786_vm13, %v3872_v57, %v3874_v20  ;;  %v3878_v53 = vsel %vm1786_vm13, %v3874_v20, %v3876_v9 }
 0xebb   : > { %v3883_v13 = vadd.f32 %v3877_v61, %v3832_v17  ;;  %v3884_v21 = vadd.f32 %v3878_v53, %v3833_v62 }
 0xebd   : > { %v3949_v48 = vpop.permute.xlu0 %3948  ;;  %v3951_v6 = vpop.permute.xlu1 %3950 }
 0xebe   : > { %v3959_v15 = vadd.f32 %v3949_v48, %v3882_v51  ;;  %v3954_v58 = vsel %vm2010_vm14, %v3949_v48, %v3951_v6 }
 0xebf   : > { %v3960_v7 = vadd.f32 %v3954_v58, %v3883_v13 }
 0xec1   : > { %v3953_v11 = vpop.permute.xlu0 %3952  ;;  %v4000_v0 = vpop.permute.xlu1 %3999 }
 0xec2   : > { %v4010_v56 = vadd.f32 %v4000_v0, %v3959_v15  ;;  %v3955_v5 = vsel %vm2010_vm14, %v3951_v6, %v3953_v11 }
 0xec3   : > { %v3961_v59 = vadd.f32 %v3955_v5, %v3884_v21 }
 0xec5   : > { %v4002_v43 = vpop.permute.xlu0 %4001  ;;  %v4004_v10 = vpop.permute.xlu1 %4003 }
 0xec6   : > { %v4005_v42 = vsel %vm2010_vm14, %v4000_v0, %v4002_v43  ;;  %v4006_v57 = vsel %vm2010_vm14, %v4002_v43, %v4004_v10 }
 0xec7   : > { %v4011_v20 = vadd.f32 %v4005_v42, %v3960_v7  ;;  %v4012_v9 = vadd.f32 %v4006_v57, %v3961_v59 }
 0xec9   : > { %v4051_v24 = vpop.permute.xlu0 %4050  ;;  %v4053_v60 = vpop.permute.xlu1 %4052 }
 0xeca   : > { %v4061_v29 = vadd.f32 %v4051_v24, %v4010_v56  ;;  %v4056_v23 = vsel %vm2010_vm14, %v4051_v24, %v4053_v60 }
 0xecb   : > { %v4062_v8 = vadd.f32 %v4056_v23, %v4011_v20 }
 0xecd   : > { %v4055_v27 = vpop.permute.xlu0 %4054  ;;  %v4102_v33 = vpop.permute.xlu1 %4101 }
 0xece   : > { %v4112_v1 = vadd.f32 %v4102_v33, %v4061_v29  ;;  %v4057_v25 = vsel %vm2010_vm14, %v4053_v60, %v4055_v27 }
 0xecf   : > { %v4063_v4 = vadd.f32 %v4057_v25, %v4012_v9 }
 0xed0   : > { %v4120_v63 = vmul.f32 %v4119_v26, %v4112_v1  ;;  %vm4116_vm5 = vcmp.ge.f32.partialorder %v4112_v1, 0.0 }
 0xed1   : > { %v4104_v49 = vpop.permute.xlu0 %4103  ;;  %v4106_v39 = vpop.permute.xlu1 %4105 }
 0xed2   : > { %v4107_v31 = vsel %vm2010_vm14, %v4102_v33, %v4104_v49  ;;  %v4108_v52 = vsel %vm2010_vm14, %v4104_v49, %v4106_v39  ;;  %v4123_v3 = vsel %vm4116_vm5, %v4112_v1, %v4120_v63 }
 0xed3   : > { %v4113_v48 = vadd.f32 %v4107_v31, %v4062_v8  ;;  %v4114_v55 = vadd.f32 %v4108_v52, %v4063_v4 }
 0xed5   : > { %vm4117_vm6 = vcmp.ge.f32.partialorder %v4113_v48, 0.0  ;;  %v4121_v12 = vmul.f32 %v4119_v26, %v4113_v48  ;;  %v4122_v6 = vmul.f32 %v4119_v26, %v4114_v55  ;;  %vm4118_vm7 = vcmp.ge.f32.partialorder %v4114_v55, 0.0 }
 0xed7   : > { %v4124_v16 = vsel %vm4117_vm6, %v4113_v48, %v4121_v12  ;;  %v4125_v50 = vsel %vm4118_vm7, %v4114_v55, %v4122_v6 }
 0xed8   : > { %v4129_v32 = vcombine.low %v4123_v3, %v4124_v16  ;;  %4132 = vrot.lane.b32.xlu1 %v4125_v50, %s4675_s6 }
 0xeda   : > { %4130 = vrot.lane.b32.xlu0 %v4129_v32, %s4675_s6 }
 0xf4a   : > { %v4133_v19 = vpop.permute.xlu1 %4132 }
 0xf4b   : > { %v4135_v37 = vrot.slane %v4133_v19, 4 }
 0xf4c   : > { %v4131_v34 = vpop.permute.xlu0 %4130 }
 0xf4d   : > { %v4134_v14 = vrot.slane %v4131_v34, 4 }
 0xf4f   : > { %v4137_v11 = vsel %vm4136_vm8, %v4134_v14, %v4135_v37 }
 0xf50   : > { %v4138_v40 = vsel %vm3901_vm2, %v4131_v34, %v4137_v11 }
 0xf51   : > { %4140 = vst [vmem:[%s269_s17] sm:$0xff] %v4138_v40 }
 0xf52   : > { %4553 = shalt.err (!%p4550_p13)
}
 0xf53   : > { %s4554_s29 = scalar_lea.hbm %s6552_s15, 128  ;;  %s4558_s26 = scalar_lea.hbm %s6602_s5, 256 }
 0xf54   : > { %p4555_p4 = scmp.ne.s32.totalorder %s6552_s15, %s4554_s29  ;;  %p4559_p0 = scmp.lt.u32.totalorder %s6552_s15, %s6602_s5 }
 0xf55   : > { %p4560_p3 = scmp.lt.u32.totalorder %s4558_s26, %s4554_s29  ;;  %p4562_p9 = scmp.lt.u32.totalorder %s4554_s29, %s6552_s15 }
 0xf56   : > { %p4556_p2 = pnand %p4555_p4, %p4808_p7 }
 0xf57   : > { %p4561_p5 = por %p4560_p3, %p4559_p0 }
 0xf58   : > { %p4557_p11 = pneg %p4556_p2 }
 0xf59   : > { %p4563_p12 = por %p4562_p9, %p4561_p5 }
 0xf5b   : > { %p4564_p10 = pnand %p4563_p12, %p4557_p11 }
 0xf5d   : > { %4567 = shalt.err (!%p4564_p10)
}
 0xf5e   : > { %4278 = dma.vmem_to_hbm [thread:$0]  (%p4808_p7), %s6554_s11, 128, %s6552_s15, %s4142_s24  }
 0xf5f PF: > { %s4168_s14 = sand.u32 1, %s4602_s18   ;;  %p6823_p1 = scmp.ne.s32.totalorder %s6666_s25, 0 }
 0xf60   : > { %p6824_p6 = scmp.ge.s32.totalorder %s4614_s21, 2  ;;  %s4169_s17 = scalar_lea.sflag [#allocation5], %s4168_s14 }
 0xf62   : > { %p4292_p8 = pnand %p6824_p6, %p6823_p1 }
 0xf64   : > { %4597 = dma.done.wait (!%p4292_p8), %s4169_s17, 128  }
 0xf65   : > { %4599 = vsyncadd (!%p4292_p8), %s4169_s17, 4294967168  ;;  %p20_p13 = scmp.ge.s32.totalorder %s4798_s28, 4   ;;  %s6825_s18 = smov %s4606_s19 }
 0xf66   : > { %s6826_s19 = smov %s4610_s20  ;;  %s6827_s20 = smov %s4814_s10 }
 0xf67   : > { %s6828_s21 = smov %s4798_s28  ;;  %22 = sbr.rel (!%p20_p13) target bundleno = 7 (0x7), region = 101 }
 0xf6e   :  { %4174 = vsyncpa [#allocation4], 1 }
 0xf6f   :  { %4176 = vsyncpa [#allocation4 + $0x1], 1 }
 0xf70   :  { %4177 = vsyncpa [#allocation8], 1 }
 0xf71   :  { %4178 = vsyncpa [#allocation5], 1 }
 0xf72   :  { %4180 = vsyncpa [#allocation5 + $0x1], 1 }
 0xf73   :  { %4181 = vsyncpa [#allocation6], 1 }
 0xf74   :  { %4183 = vsyncpa [#allocation6 + $0x1], 1 }

</bundles_post_ra>
